<compile_context>
chip_gen: v7x
topology: tpu7x:2x2x1
jax: 0.10.0
libtpu: 0.0.40
codegen_flags: <defaults>
</compile_context>

<pallas_src>
import functools

import jax
import jax.numpy as jnp
from jax.experimental import pallas as pl
from jax.experimental.pallas import tpu as pltpu


def _round_up(x, m):
    return (x + m - 1) // m * m


def gcn_kernel(*refs, k, pad, stack_first, stack_second):
    if pad > 0:
        xm_ref, xh_ref, w1a_ref, w1b_ref, w2a_ref, w2b_ref, o_ref = refs
    else:
        xm_ref, w1a_ref, w1b_ref, w2a_ref, w2b_ref, o_ref = refs
        xh_ref = None
    Th, Wo, Cout = o_ref.shape
    _, Wk, Cin = xm_ref.shape
    cdt = xm_ref.dtype

    x = xm_ref[...]
    if pad > 0:
        # Reassemble the (Th + k - 1)-row strip from the non-overlapping main
        # block and the tiny halo block: one strip-sized VMEM copy, no HBM
        # duplication (this replaces the old wrapper-side strip materialization).
        x = jnp.concatenate([x, xh_ref[...]], axis=0)          # (Hs, Wk, Cin)

    def wshift(arr, t):
        # arr shifted along W so result[:, w, :] == arr[:, w + t, :] for the
        # first Wo columns.  XLU rotate (vrot slot) instead of a sublane-offset
        # slice, keeping the shift off the vld/vst/VALU critical path.
        if t == 0:
            return arr
        return pltpu.roll(arr, shift=arr.shape[1] - t, axis=1)

    def conv_h(src, w_ref, cpt, out_rows, stacked):
        # (k,1) conv over the leading (H) axis: out[h] = sum_t src[h+t] @ W[t].
        # H windows are free leading-axis views.
        rows, width = out_rows, src.shape[1]
        if stacked:
            views = [src[t:t + rows] for t in range(k)]
            lhs = jnp.concatenate(views, axis=-1) if k > 1 else views[0]
            acc = jnp.dot(lhs.reshape(rows * width, k * cpt), w_ref[...],
                          preferred_element_type=jnp.float32)
        else:
            acc = jnp.dot(src[0:rows].reshape(rows * width, cpt), w_ref[0],
                          preferred_element_type=jnp.float32)
            for t in range(1, k):
                acc = acc + jnp.dot(src[t:t + rows].reshape(rows * width, cpt),
                                    w_ref[t], preferred_element_type=jnp.float32)
        return acc.reshape(rows, width, -1)

    def conv_w(src, w_ref, cpt, stacked):
        # (1,k) conv over the W (sublane) axis: out[:, w] = sum_t src[:, w+t] @ W[t].
        rows, width, _ = src.shape
        if stacked:
            # Tap-stack: shifted views via XLU rolls + free offset-0 slices,
            # then a single MXU matmul with contraction dim k*cpt.
            views = [wshift(src, t)[:, :Wo, :] for t in range(k)]
            lhs = jnp.concatenate(views, axis=-1) if k > 1 else views[0]
            acc = jnp.dot(lhs.reshape(rows * Wo, k * cpt), w_ref[...],
                          preferred_element_type=jnp.float32)
            return acc.reshape(rows, Wo, -1)
        # Tap loop (large channel counts): k full-width matmuls on the
        # *unshifted* lhs; roll the f32 partial result on the XLU instead of
        # relayouting the lhs, then accumulate (init from tap 0, no zero-fill).
        lhs2d = src.reshape(rows * width, cpt)
        p = jnp.dot(lhs2d, w_ref[0], preferred_element_type=jnp.float32)
        acc = p.reshape(rows, width, -1)[:, :Wo, :]
        for t in range(1, k):
            p = jnp.dot(lhs2d, w_ref[t], preferred_element_type=jnp.float32)
            acc = acc + wshift(p.reshape(rows, width, -1), t)[:, :Wo, :]
        return acc

    # ---- Branch 1: (k,1) over H then (1,k) over W ----
    a = conv_h(x, w1a_ref, Cin, Th, stack_first).astype(cdt)    # (Th, Wk, Cout)
    y = conv_w(a, w1b_ref, Cout, stack_second)                  # (Th, Wo, Cout) f32

    # ---- Branch 2: (1,k) over W then (k,1) over H ----
    b = conv_w(x, w2a_ref, Cin, stack_first).astype(cdt)        # (Hs, Wo, Cout)
    y = y + conv_h(b, w2b_ref, Cout, Th, stack_second)          # (Th, Wo, Cout) f32

    o_ref[...] = y.astype(o_ref.dtype)


def _vmem_params(vmem_limit_bytes):
    """Generation-aware tile budget / scoped-VMEM limit (v5e/v6e: 128 MiB, v7x: 64 MiB)."""
    try:
        cap = int(pltpu.get_tpu_info().vmem_capacity_bytes)
    except Exception:
        cap = 64 * 1024 * 1024          # conservative (v7x-sized) fallback
    budget = int(cap * 0.40)
    limit = int(vmem_limit_bytes) if vmem_limit_bytes is not None else int(cap * 0.78)
    return budget, limit


def _pick_tile_h(H, Wk, Wo, Cin, Cout, k, cb, ob, stack_first, stack_second,
                 budget, granule, n_batch):
    """Output-row tile height keeping the per-step VMEM roughly under budget."""
    halo = k - 1
    kc_in = k * Cin if stack_first else Cin
    kc_mid = k * Cout if stack_second else Cout
    # Buffers spanning the full (Th + halo)-row strip:
    strip_row = (3 * Wk * Cin * cb              # main-block double buffer + concat strip
                 + 2 * Wo * kc_in * cb          # branch-2 first-conv rolled views / stacked lhs
                 + Wo * Cout * (4 + cb))        # branch-2 intermediate b (f32 + cast)
    # Buffers spanning only the Th output rows:
    out_row = (Wk * kc_in * cb                  # branch-1 first-conv stacked lhs
               + Wk * Cout * (4 + cb)           # branch-1 intermediate a (f32 + cast / rolled partial)
               + 2 * Wo * kc_mid * cb           # second-conv stacked lhs (both branches)
               + 2 * Wo * Cout * 4              # f32 partials / accumulator
               + 2 * Wo * Cout * ob)            # double-buffered output block
    avail = budget - halo * strip_row
    th = avail // max(strip_row + out_row, 1) if avail > 0 else 0
    th = (int(th) // granule) * granule
    # Graceful floor: one granule is the functional minimum; if even that busts
    # the budget we still emit it (raise vmem_limit_bytes / pass tile_h) rather
    # than silently picking an oversized tile.
    th = max(granule, th)
    if n_batch == 1 and H > granule:
        # v7x has 2 TensorCores per chip: keep >= 2 grid points so the
        # ("parallel","parallel") semantics can actually shard the work.
        th = min(th, max(granule, _round_up(-(-H // 2), granule)))
    return max(granule, min(th, _round_up(H, granule)))


def gcn_forward(x_nchw, w1a, w1b, w2a, w2b, *, k, compute_dtype=None,
                tile_h=None, vmem_limit_bytes=None):
    """x_nchw: (N, Cin, H, W).  Weights in (tap, in_channels, out_channels) layout."""
    assert k % 2 == 1, "GCNModule uses odd kernel sizes"
    pad = (k - 1) // 2
    N, Cin, H, W = x_nchw.shape
    Cout = w1a.shape[-1]
    out_dtype = x_nchw.dtype
    if compute_dtype is None:
        # bf16 compute (f32 MXU accumulation) by default for f32 inputs: halves
        # DMA / VMEM bytes and is the MXU-native input dtype on v5e/v6e/v7x.
        # Note: intermediates are rounded to bf16 between the two convs.
        compute_dtype = jnp.bfloat16 if out_dtype == jnp.float32 else out_dtype
    cdt = jnp.dtype(compute_dtype)

    # 8-aligned widths keep every (rows, width, C) -> (rows*width, C) reshape in
    # the kernel layout-preserving (no relayout copies).
    Wo = _round_up(W, 8)                      # kernel output width (cropped later)
    Wk = _round_up(Wo + 2 * pad, 8)           # zero-padded input width

    # Tap-stack while the per-tap channel count is below the MXU contraction
    # granule (128 on v5e, 256 on v6e/v7x): one matmul with contraction k*C
    # instead of k nearly-empty passes.  At >= 256 channels each tap already
    # fills a pass, so loop taps and accumulate (cheap on v7x's MRB).
    stack_first = Cin < 256
    stack_second = Cout < 256

    budget, vmem_limit = _vmem_params(vmem_limit_bytes)
    granule = 2 * pad if pad > 0 else 8       # halo BlockSpec needs Th % (2*pad) == 0

    in_b = cdt.itemsize
    out_b = jnp.dtype(out_dtype).itemsize
    if tile_h is None:
        Th = _pick_tile_h(H, Wk, Wo, Cin, Cout, k, in_b, out_b,
                          stack_first, stack_second, budget, granule, N)
    else:
        Th = min(_round_up(max(int(tile_h), 1), granule), _round_up(H, granule))
    nT = -(-H // Th)
    Hpad = nT * Th

    # NCHW -> NHWC (channels on lanes) + zero pad H/W once; convolving the zero
    # border reproduces PyTorch's per-stage 'same' padding.  No strip stacking:
    # the kernel reads non-overlapping Th-row main blocks plus (k-1)-row halo
    # blocks straight out of this array via two auto-pipelined BlockSpecs.
    # TODO(synk): fold this layout/pad pass and the final NHWC->NCHW transpose
    # into the kernel (NCHW-native, lane-dense output for Cout < 128).
    x = jnp.transpose(x_nchw, (0, 2, 3, 1)).astype(cdt)
    x = jnp.pad(x, ((0, 0), (pad, pad + Hpad - H), (pad, Wk - W - pad), (0, 0)))
    # x: (N, Hpad + 2*pad, Wk, Cin)

    def prep_w(w, stacked):
        # (k, C, Cout) -> (k*C, Cout) for the stacked path (row index t*C + c
        # matching the kernel's lane concat), or kept 3-D for the tap loop.
        w = w.astype(cdt)
        kk, c, co = w.shape
        return w.reshape(kk * c, co) if stacked else w

    w1a_p = prep_w(w1a, stack_first)
    w1b_p = prep_w(w1b, stack_second)
    w2a_p = prep_w(w2a, stack_first)
    w2b_p = prep_w(w2b, stack_second)

    def full_spec(arr):
        if arr.ndim == 2:
            return pl.BlockSpec(arr.shape, lambda n, t: (0, 0))
        return pl.BlockSpec(arr.shape, lambda n, t: (0, 0, 0))

    in_specs = [pl.BlockSpec((None, Th, Wk, Cin), lambda n, t: (n, t, 0, 0))]
    operands = [x]
    if pad > 0:
        hb = Th // (2 * pad)   # halo blocks of height 2*pad start at (t+1)*Th
        in_specs.append(pl.BlockSpec((None, 2 * pad, Wk, Cin),
                                     lambda n, t: (n, (t + 1) * hb, 0, 0)))
        operands.append(x)
    in_specs += [full_spec(w1a_p), full_spec(w1b_p),
                 full_spec(w2a_p), full_spec(w2b_p)]
    operands += [w1a_p, w1b_p, w2a_p, w2b_p]

    kern = functools.partial(gcn_kernel, k=k, pad=pad,
                             stack_first=stack_first, stack_second=stack_second)
    out_nhwc = pl.pallas_call(
        kern,
        out_shape=jax.ShapeDtypeStruct((N, Hpad, Wo, Cout), out_dtype),
        grid=(N, nT),
        in_specs=in_specs,
        out_specs=pl.BlockSpec((None, Th, Wo, Cout), lambda n, t: (n, t, 0, 0)),
        compiler_params=pltpu.CompilerParams(
            dimension_semantics=("parallel", "parallel"),
            vmem_limit_bytes=vmem_limit),
    )(*operands)

    # Crop alignment padding and return NCHW to match PyTorch.
    return jnp.transpose(out_nhwc[:, :H, :W, :], (0, 3, 1, 2))


def ref_forward(x, w10, w11, w20, w21, pad):
    """Pure-JAX reference using lax convs with PyTorch OIHW weights (NCHW)."""
    dn = ("NCHW", "OIHW", "NCHW")

    def conv(inp, w, ph, pw):
        return jax.lax.conv_general_dilated(
            inp, w, (1, 1), ((ph, ph), (pw, pw)), dimension_numbers=dn)

    g1 = conv(conv(x, w10, pad, 0), w11, 0, pad)
    g2 = conv(conv(x, w20, 0, pad), w21, pad, 0)
    return g1 + g2


if __name__ == "__main__":
    # Small deterministic config
    N, Cin, Cout, H, W, K = 2, 4, 4, 16, 16, 3
    pad = (K - 1) // 2

    key = jax.random.PRNGKey(0)
    kx, k1, k2, k3, k4 = jax.random.split(key, 5)

    x = jax.random.normal(kx, (N, Cin, H, W), jnp.float32)

    # PyTorch-shaped (OIHW) weights
    w_gcn1_0 = jax.random.normal(k1, (Cout, Cin, K, 1), jnp.float32) * 0.1   # (k,1)
    w_gcn1_1 = jax.random.normal(k2, (Cout, Cout, 1, K), jnp.float32) * 0.1  # (1,k)
    w_gcn2_0 = jax.random.normal(k3, (Cout, Cin, 1, K), jnp.float32) * 0.1   # (1,k)
    w_gcn2_1 = jax.random.normal(k4, (Cout, Cout, K, 1), jnp.float32) * 0.1  # (k,1)

    # Kernel layout: (tap, in_channels, out_channels)
    w1a = jnp.transpose(w_gcn1_0[:, :, :, 0], (2, 1, 0))  # (K, Cin,  Cout)
    w1b = jnp.transpose(w_gcn1_1[:, :, 0, :], (2, 1, 0))  # (K, Cout, Cout)
    w2a = jnp.transpose(w_gcn2_0[:, :, 0, :], (2, 1, 0))  # (K, Cin,  Cout)
    w2b = jnp.transpose(w_gcn2_1[:, :, :, 0], (2, 1, 0))  # (K, Cout, Cout)

    ref = jax.block_until_ready(
        ref_forward(x, w_gcn1_0, w_gcn1_1, w_gcn2_0, w_gcn2_1, pad))

    # f32 compute path, auto tiling.
    out = jax.block_until_ready(
        gcn_forward(x, w1a, w1b, w2a, w2b, k=K, compute_dtype=jnp.float32))
    assert out.shape == (N, Cout, H, W)
    assert jnp.allclose(out, ref, atol=1e-4, rtol=1e-4), "f32 mismatch vs reference"

    # Explicit H-strip tiling (exercises the halo BlockSpec path): 2 tiles of 8.
    out_t = jax.block_until_ready(
        gcn_forward(x, w1a, w1b, w2a, w2b, k=K, compute_dtype=jnp.float32, tile_h=8))
    assert jnp.allclose(out_t, ref, atol=1e-4, rtol=1e-4), "tiled mismatch vs reference"

    # Non-dividing tile height (ragged last strip covered by zero padding + crop).
    out_r = jax.block_until_ready(
        gcn_forward(x, w1a, w1b, w2a, w2b, k=K, compute_dtype=jnp.float32, tile_h=6))
    assert jnp.allclose(out_r, ref, atol=1e-4, rtol=1e-4), "ragged-tile mismatch vs reference"

    # Default path: bf16 compute with f32 MXU accumulation (looser tolerance).
    out_bf = jax.block_until_ready(gcn_forward(x, w1a, w1b, w2a, w2b, k=K))
    assert jnp.allclose(out_bf, ref, atol=5e-2, rtol=5e-2), "bf16 mismatch vs reference"

    print("KERNEL_OK")
</pallas_src>

<mosaic_0001>
module attributes {stable_mosaic.version = 11 : i64} {
  func.func @gcn_kernel(%arg0: i32, %arg1: i32, %arg2: memref<1x16x24x4xf32, #tpu.memory_space<vmem>>, %arg3: memref<1x2x24x4xf32, #tpu.memory_space<vmem>>, %arg4: memref<12x4xf32, #tpu.memory_space<vmem>>, %arg5: memref<12x4xf32, #tpu.memory_space<vmem>>, %arg6: memref<12x4xf32, #tpu.memory_space<vmem>>, %arg7: memref<12x4xf32, #tpu.memory_space<vmem>>, %arg8: memref<1x16x16x4xf32, #tpu.memory_space<vmem>>) attributes {dimension_semantics = [#tpu.dimension_semantics<parallel>, #tpu.dimension_semantics<parallel>], iteration_bounds = array<i64: 2, 1>, scalar_prefetch = 0 : i64, scratch_operands = 0 : i64, tpu.core_type = #tpu.core_type<tc>, window_params = [{transform_indices = @transform_0, window_bounds = array<i64: 1, 16, 24, 4>}, {transform_indices = @transform_1, window_bounds = array<i64: 1, 2, 24, 4>}, {pipeline_mode = #tpu.pipeline_mode<synchronous>, transform_indices = @transform_2, window_bounds = array<i64: 12, 4>}, {pipeline_mode = #tpu.pipeline_mode<synchronous>, transform_indices = @transform_3, window_bounds = array<i64: 12, 4>}, {pipeline_mode = #tpu.pipeline_mode<synchronous>, transform_indices = @transform_4, window_bounds = array<i64: 12, 4>}, {pipeline_mode = #tpu.pipeline_mode<synchronous>, transform_indices = @transform_5, window_bounds = array<i64: 12, 4>}, {transform_indices = @transform_6, window_bounds = array<i64: 1, 16, 16, 4>}]} {
    %c0 = arith.constant 0 : index
    %c0_0 = arith.constant 0 : index
    %c0_1 = arith.constant 0 : index
    %c0_2 = arith.constant 0 : index
    %0 = vector.load %arg2[%c0, %c0_0, %c0_1, %c0_2] : memref<1x16x24x4xf32, #tpu.memory_space<vmem>>, vector<1x16x24x4xf32>
    %1 = vector.shape_cast %0 : vector<1x16x24x4xf32> to vector<16x24x4xf32>
    %c0_3 = arith.constant 0 : index
    %c0_4 = arith.constant 0 : index
    %c0_5 = arith.constant 0 : index
    %c0_6 = arith.constant 0 : index
    %2 = vector.load %arg3[%c0_3, %c0_4, %c0_5, %c0_6] : memref<1x2x24x4xf32, #tpu.memory_space<vmem>>, vector<1x2x24x4xf32>
    %3 = vector.shape_cast %2 : vector<1x2x24x4xf32> to vector<2x24x4xf32>
    %4 = tpu.concatenate %1, %3 in 0 : vector<16x24x4xf32>, vector<2x24x4xf32> -> vector<18x24x4xf32>
    %5 = vector.extract_strided_slice %4 {offsets = [0, 0, 0], sizes = [16, 24, 4], strides = [1, 1, 1]} : vector<18x24x4xf32> to vector<16x24x4xf32>
    %6 = vector.extract_strided_slice %4 {offsets = [1, 0, 0], sizes = [16, 24, 4], strides = [1, 1, 1]} : vector<18x24x4xf32> to vector<16x24x4xf32>
    %7 = vector.extract_strided_slice %4 {offsets = [2, 0, 0], sizes = [16, 24, 4], strides = [1, 1, 1]} : vector<18x24x4xf32> to vector<16x24x4xf32>
    %8 = tpu.concatenate %5, %6, %7 in 2 : vector<16x24x4xf32>, vector<16x24x4xf32>, vector<16x24x4xf32> -> vector<16x24x12xf32>
    %9 = vector.shape_cast %8 : vector<16x24x12xf32> to vector<384x12xf32>
    %c0_7 = arith.constant 0 : index
    %c0_8 = arith.constant 0 : index
    %10 = vector.load %arg4[%c0_7, %c0_8] : memref<12x4xf32, #tpu.memory_space<vmem>>, vector<12x4xf32>
    %cst = arith.constant dense<0.000000e+00> : vector<384x4xf32>
    %11 = tpu.matmul %9, %10, %cst {dimension_numbers = #tpu.dot_dimension_numbers<[1], [0], [0], [1], [0, 0, 1, 1], [], []>} : vector<384x12xf32>, vector<12x4xf32>, vector<384x4xf32> -> vector<384x4xf32>
    %12 = vector.shape_cast %11 : vector<384x4xf32> to vector<16x24x4xf32>
    %13 = vector.extract_strided_slice %12 {offsets = [0, 0, 0], sizes = [16, 16, 4], strides = [1, 1, 1]} : vector<16x24x4xf32> to vector<16x16x4xf32>
    %c23_i32 = arith.constant 23 : i32
    %14 = tpu.dynamic_rotate %12 by %c23_i32 dim 1 : vector<16x24x4xf32>, i32 -> vector<16x24x4xf32>
    %15 = vector.extract_strided_slice %14 {offsets = [0, 0, 0], sizes = [16, 16, 4], strides = [1, 1, 1]} : vector<16x24x4xf32> to vector<16x16x4xf32>
    %c22_i32 = arith.constant 22 : i32
    %16 = tpu.dynamic_rotate %12 by %c22_i32 dim 1 : vector<16x24x4xf32>, i32 -> vector<16x24x4xf32>
    %17 = vector.extract_strided_slice %16 {offsets = [0, 0, 0], sizes = [16, 16, 4], strides = [1, 1, 1]} : vector<16x24x4xf32> to vector<16x16x4xf32>
    %18 = tpu.concatenate %13, %15, %17 in 2 : vector<16x16x4xf32>, vector<16x16x4xf32>, vector<16x16x4xf32> -> vector<16x16x12xf32>
    %19 = vector.shape_cast %18 : vector<16x16x12xf32> to vector<256x12xf32>
    %c0_9 = arith.constant 0 : index
    %c0_10 = arith.constant 0 : index
    %20 = vector.load %arg5[%c0_9, %c0_10] : memref<12x4xf32, #tpu.memory_space<vmem>>, vector<12x4xf32>
    %cst_11 = arith.constant dense<0.000000e+00> : vector<256x4xf32>
    %21 = tpu.matmul %19, %20, %cst_11 {dimension_numbers = #tpu.dot_dimension_numbers<[1], [0], [0], [1], [0, 0, 1, 1], [], []>} : vector<256x12xf32>, vector<12x4xf32>, vector<256x4xf32> -> vector<256x4xf32>
    %22 = vector.shape_cast %21 : vector<256x4xf32> to vector<16x16x4xf32>
    %23 = vector.extract_strided_slice %4 {offsets = [0, 0, 0], sizes = [18, 16, 4], strides = [1, 1, 1]} : vector<18x24x4xf32> to vector<18x16x4xf32>
    %c23_i32_12 = arith.constant 23 : i32
    %24 = tpu.dynamic_rotate %4 by %c23_i32_12 dim 1 : vector<18x24x4xf32>, i32 -> vector<18x24x4xf32>
    %25 = vector.extract_strided_slice %24 {offsets = [0, 0, 0], sizes = [18, 16, 4], strides = [1, 1, 1]} : vector<18x24x4xf32> to vector<18x16x4xf32>
    %c22_i32_13 = arith.constant 22 : i32
    %26 = tpu.dynamic_rotate %4 by %c22_i32_13 dim 1 : vector<18x24x4xf32>, i32 -> vector<18x24x4xf32>
    %27 = vector.extract_strided_slice %26 {offsets = [0, 0, 0], sizes = [18, 16, 4], strides = [1, 1, 1]} : vector<18x24x4xf32> to vector<18x16x4xf32>
    %28 = tpu.concatenate %23, %25, %27 in 2 : vector<18x16x4xf32>, vector<18x16x4xf32>, vector<18x16x4xf32> -> vector<18x16x12xf32>
    %29 = vector.shape_cast %28 : vector<18x16x12xf32> to vector<288x12xf32>
    %c0_14 = arith.constant 0 : index
    %c0_15 = arith.constant 0 : index
    %30 = vector.load %arg6[%c0_14, %c0_15] : memref<12x4xf32, #tpu.memory_space<vmem>>, vector<12x4xf32>
    %cst_16 = arith.constant dense<0.000000e+00> : vector<288x4xf32>
    %31 = tpu.matmul %29, %30, %cst_16 {dimension_numbers = #tpu.dot_dimension_numbers<[1], [0], [0], [1], [0, 0, 1, 1], [], []>} : vector<288x12xf32>, vector<12x4xf32>, vector<288x4xf32> -> vector<288x4xf32>
    %32 = vector.shape_cast %31 : vector<288x4xf32> to vector<18x16x4xf32>
    %33 = vector.extract_strided_slice %32 {offsets = [0, 0, 0], sizes = [16, 16, 4], strides = [1, 1, 1]} : vector<18x16x4xf32> to vector<16x16x4xf32>
    %34 = vector.extract_strided_slice %32 {offsets = [1, 0, 0], sizes = [16, 16, 4], strides = [1, 1, 1]} : vector<18x16x4xf32> to vector<16x16x4xf32>
    %35 = vector.extract_strided_slice %32 {offsets = [2, 0, 0], sizes = [16, 16, 4], strides = [1, 1, 1]} : vector<18x16x4xf32> to vector<16x16x4xf32>
    %36 = tpu.concatenate %33, %34, %35 in 2 : vector<16x16x4xf32>, vector<16x16x4xf32>, vector<16x16x4xf32> -> vector<16x16x12xf32>
    %37 = vector.shape_cast %36 : vector<16x16x12xf32> to vector<256x12xf32>
    %c0_17 = arith.constant 0 : index
    %c0_18 = arith.constant 0 : index
    %38 = vector.load %arg7[%c0_17, %c0_18] : memref<12x4xf32, #tpu.memory_space<vmem>>, vector<12x4xf32>
    %cst_19 = arith.constant dense<0.000000e+00> : vector<256x4xf32>
    %39 = tpu.matmul %37, %38, %cst_19 {dimension_numbers = #tpu.dot_dimension_numbers<[1], [0], [0], [1], [0, 0, 1, 1], [], []>} : vector<256x12xf32>, vector<12x4xf32>, vector<256x4xf32> -> vector<256x4xf32>
    %40 = vector.shape_cast %39 : vector<256x4xf32> to vector<16x16x4xf32>
    %41 = arith.addf %22, %40 : vector<16x16x4xf32>
    %c0_20 = arith.constant 0 : index
    %c0_21 = arith.constant 0 : index
    %c0_22 = arith.constant 0 : index
    %c0_23 = arith.constant 0 : index
    %42 = vector.load %arg8[%c0_20, %c0_21, %c0_22, %c0_23] : memref<1x16x16x4xf32, #tpu.memory_space<vmem>>, vector<1x16x16x4xf32>
    %43 = vector.shape_cast %42 : vector<1x16x16x4xf32> to vector<16x16x4xf32>
    %44 = vector.shape_cast %41 : vector<16x16x4xf32> to vector<1x16x16x4xf32>
    tpu.vector_store %arg8[%c0_20, %c0_21, %c0_22, %c0_23], %44 {strides = array<i32>} : memref<1x16x16x4xf32, #tpu.memory_space<vmem>>, vector<1x16x16x4xf32>,
    return
  }
  func.func @transform_0(%arg0: i32, %arg1: i32) -> (i32, i32, i32, i32) {
    %c0_i32 = arith.constant 0 : i32
    %c0_i32_0 = arith.constant 0 : i32
    %c0_i32_1 = arith.constant 0 : i32
    return %arg0, %arg1, %c0_i32, %c0_i32_0 : i32, i32, i32, i32
  }
  func.func @transform_1(%arg0: i32, %arg1: i32) -> (i32, i32, i32, i32) {
    %c1_i32 = arith.constant 1 : i32
    %0 = arith.addi %arg1, %c1_i32 : i32
    %c8_i32 = arith.constant 8 : i32
    %1 = arith.muli %0, %c8_i32 : i32
    %c0_i32 = arith.constant 0 : i32
    %c0_i32_0 = arith.constant 0 : i32
    %c0_i32_1 = arith.constant 0 : i32
    return %arg0, %1, %c0_i32, %c0_i32_0 : i32, i32, i32, i32
  }
  func.func @transform_2(%arg0: i32, %arg1: i32) -> (i32, i32) {
    %c0_i32 = arith.constant 0 : i32
    %c0_i32_0 = arith.constant 0 : i32
    %c0_i32_1 = arith.constant 0 : i32
    return %c0_i32, %c0_i32_0 : i32, i32
  }
  func.func @transform_3(%arg0: i32, %arg1: i32) -> (i32, i32) {
    %c0_i32 = arith.constant 0 : i32
    %c0_i32_0 = arith.constant 0 : i32
    %c0_i32_1 = arith.constant 0 : i32
    return %c0_i32, %c0_i32_0 : i32, i32
  }
  func.func @transform_4(%arg0: i32, %arg1: i32) -> (i32, i32) {
    %c0_i32 = arith.constant 0 : i32
    %c0_i32_0 = arith.constant 0 : i32
    %c0_i32_1 = arith.constant 0 : i32
    return %c0_i32, %c0_i32_0 : i32, i32
  }
  func.func @transform_5(%arg0: i32, %arg1: i32) -> (i32, i32) {
    %c0_i32 = arith.constant 0 : i32
    %c0_i32_0 = arith.constant 0 : i32
    %c0_i32_1 = arith.constant 0 : i32
    return %c0_i32, %c0_i32_0 : i32, i32
  }
  func.func @transform_6(%arg0: i32, %arg1: i32) -> (i32, i32, i32, i32) {
    %c0_i32 = arith.constant 0 : i32
    %c0_i32_0 = arith.constant 0 : i32
    %c0_i32_1 = arith.constant 0 : i32
    return %arg0, %arg1, %c0_i32, %c0_i32_0 : i32, i32, i32, i32
  }
}

</mosaic_0001>

<bundles_post_ra>
// kernel: tpu_custom_call.1
= control target key start
LH: loop header
LB: loop body
LE: loop exit
PB: predicated region body
PF: predicated region fallthrough
CT: control target
= control target key end

     0   :  { %s4581_s21 = smov 0   ;;  %s4583_s22 = smov 0   ;;  %s6931_s0 = inlined_call_operand.vmem [shape: f32[2,18,24,4], index: 0, kind: input, shape index: {}]   ;;  %s6932_s1 = inlined_call_operand.vmem [shape: f32[2,18,24,4], index: 1, kind: input, shape index: {}]   ;;  %s6933_s2 = inlined_call_operand.vmem [shape: f32[12,4], index: 2, kind: input, shape index: {}]   ;;  %s6934_s3 = inlined_call_operand.vmem [shape: f32[12,4], index: 3, kind: input, shape index: {}]   ;;  %s6935_s4 = inlined_call_operand.vmem [shape: f32[12,4], index: 4, kind: input, shape index: {}]   ;;  %s6936_s5 = inlined_call_operand.vmem [shape: f32[12,4], index: 5, kind: input, shape index: {}]   ;;  %s6937_s6 = inlined_call_operand.vmem [shape: f32[2,16,16,4], index: 6, kind: output, shape index: {}]  }
   0x1   :  { %s4585_s23 = smov 0  }
   0x2 LB: > { %s28_s24 = sadd.s32 1, %s4537_s22  ;;  %p3830_p0 = scmp.ge.s32.totalorder %s4541_s23, 1  ;;  %s4541_s23 = sphi %s4585_s23, %s16_s23   ;;  %s4537_s22 = sphi %s4583_s22, %s7151_s22   ;;  %s4533_s21 = sphi %s4581_s21, %s7150_s21  }
   0x3   : > { %p30_p1 = scmp.ge.s32.totalorder %s28_s24, 2  ;;  %p270_p2 = scmp.lt.s32.totalorder %s4541_s23, 3 }
   0x5   : > { %s7153_s24 = smov (%p30_p1, %s28_s24), 0  ;;  %p271_p3 = pnand %p3830_p0, %p270_p2 }
   0x7   : > { %274 = sbr.rel (%p271_p3) target bundleno = 1391 (0x56f), region = 44 }
   0xe   : > { %p333_p4 = scmp.lt.s32.totalorder %s4533_s21, 1  ;;  %v865_v0 = vld [vmem:[%s6933_s2] sm:$0xff]  ;;  %v866_v1 = vld [vmem:[%s6933_s2 + $0x8] sm:$0xf]  ;;  %vm1012_vm0 = vcmask 1043456   ;;  %vm4543_vm1 = vmmov 1  }
   0xf   : > { %v4386_v2 = vpack.c.bf16 %v866_v1, %v865_v0  ;;  %vm4607_vm2 = vmpackc.low %vm1012_vm0, %vm4543_vm1  ;;  %s4544_s9 = smov 8   ;;  %s4545_s10 = smov 4   ;;  %vm767_vm3 = vcmask 31744   ;;  %vm816_vm4 = vcmask 64512   ;;  %vm867_vm5 = vcmask 97280  }
  0x10   : > { %s7155_s21 = smov (!%p333_p4, %s4533_s21), 1 }
  0x11   : > { %4388 = vmatprep.subr.msk.bf16.mxu0 %vm4607_vm2, %v4386_v2  ;;  %s4444_s29 = smul.u32 432, %s7155_s21  ;;  %s3991_s7 = sshll.u32 %s7155_s21, 8 }
  0x12   : > { %4391 = vmatpush3.bf16.msk.msra.mxu0 %vm4607_vm2, %v4386_v2 }
  0x13   : > { %s4621_s8 = scalar_lea.vmem %s6931_s0, %s4444_s29  ;;  %s3990_s11 = sadd.s32 384, %s4444_s29 }
  0x14   : > { %v4624_v4 = vld [vmem:[%s4621_s8 + $0x30] sm:$0xff]  ;;  %v4627_v5 = vld [vmem:[%s4621_s8 + $0x18] sm:$0xff]  ;;  %v4637_v7 = vld [vmem:[%s4621_s8 + $0x20] sm:$0xff]  ;;  %s4992_s14 = scalar_lea.vmem %s6932_s1, %s3990_s11 }
  0x15   : > { %623 = vrot.lane.b32.xlu1 %v4624_v4, %s4544_s9  ;;  %476 = vrot.lane.b32.xlu0 %v4627_v5, %s4545_s10  ;;  %v4634_v6 = vld [vmem:[%s4621_s8 + $0x38] sm:$0xff]  ;;  %v4644_v8 = vld [vmem:[%s4621_s8 + $0x28] sm:$0xff] }
  0x16   : > { %v4651_v9 = vld [vmem:[%s4621_s8 + $0x48] sm:$0xff]  ;;  %v4654_v10 = vld [vmem:[%s4621_s8 + $0x40] sm:$0xff]  ;;  %v4665_v11 = vld [vmem:[%s4621_s8 + $0x58] sm:$0xff] }
  0x17   : > { %v4668_v12 = vld [vmem:[%s4621_s8 + $0x50] sm:$0xff]  ;;  %v4679_v13 = vld [vmem:[%s4621_s8 + $0x68] sm:$0xff]  ;;  %v4682_v14 = vld [vmem:[%s4621_s8 + $0x60] sm:$0xff] }
  0x18   : > { %v4693_v15 = vld [vmem:[%s4621_s8 + $0x78] sm:$0xff]  ;;  %v4696_v16 = vld [vmem:[%s4621_s8 + $0x70] sm:$0xff]  ;;  %v4707_v17 = vld [vmem:[%s4621_s8 + $0x88] sm:$0xff] }
  0x19   : > { %625 = vrot.lane.b32.xlu1 %v4634_v6, %s4544_s9  ;;  %478 = vrot.lane.b32.xlu0 %v4637_v7, %s4545_s10  ;;  %v4710_v18 = vld [vmem:[%s4621_s8 + $0x80] sm:$0xff]  ;;  %v4721_v19 = vld [vmem:[%s4621_s8 + $0x98] sm:$0xff] }
  0x1a   : > { %v4724_v20 = vld [vmem:[%s4621_s8 + $0x90] sm:$0xff]  ;;  %v4735_v21 = vld [vmem:[%s4621_s8 + $0xa8] sm:$0xff]  ;;  %v4738_v22 = vld [vmem:[%s4621_s8 + $0xa0] sm:$0xff] }
  0x1b   : > { %v4749_v23 = vld [vmem:[%s4621_s8 + $0xb8] sm:$0xff]  ;;  %v4752_v24 = vld [vmem:[%s4621_s8 + $0xb0] sm:$0xff]  ;;  %v4763_v25 = vld [vmem:[%s4621_s8 + $0xc8] sm:$0xff] }
  0x1c   : > { %v4766_v26 = vld [vmem:[%s4621_s8 + $0xc0] sm:$0xff]  ;;  %v4777_v27 = vld [vmem:[%s4621_s8 + $0xd8] sm:$0xff]  ;;  %v4780_v28 = vld [vmem:[%s4621_s8 + $0xd0] sm:$0xff] }
  0x1d   : > { %482 = vrot.lane.b32.xlu1 %v4624_v4, %s4545_s10  ;;  %480 = vrot.lane.b32.xlu0 %v4644_v8, %s4545_s10  ;;  %v4791_v29 = vld [vmem:[%s4621_s8 + $0xe8] sm:$0xff]  ;;  %v4794_v30 = vld [vmem:[%s4621_s8 + $0xe0] sm:$0xff] }
  0x1e   : > { %v4805_v31 = vld [vmem:[%s4621_s8 + $0xf8] sm:$0xff]  ;;  %v4808_v32 = vld [vmem:[%s4621_s8 + $0xf0] sm:$0xff]  ;;  %v4819_v33 = vld [vmem:[%s4621_s8 + $0x108] sm:$0xff] }
  0x1f   : > { %v4822_v34 = vld [vmem:[%s4621_s8 + $0x100] sm:$0xff]  ;;  %v4836_v36 = vld [vmem:[%s4621_s8 + $0x118] sm:$0xff]  ;;  %v4839_v37 = vld [vmem:[%s4621_s8 + $0x110] sm:$0xff] }
  0x20   : > { %v4833_v35 = vld [vmem:[%s4621_s8] sm:$0xff]  ;;  %v4849_v42 = vld [vmem:[%s4621_s8 + $0x8] sm:$0xff]  ;;  %v4867_v51 = vld [vmem:[%s4621_s8 + $0x10] sm:$0xff] }
  0x21   : > { %629 = vrot.lane.b32.xlu1 %v4651_v9, %s4544_s9  ;;  %627 = vrot.lane.b32.xlu0 %v4654_v10, %s4544_s9  ;;  %v4861_v47 = vld [vmem:[%s4621_s8 + $0x128] sm:$0xff]  ;;  %v4864_v48 = vld [vmem:[%s4621_s8 + $0x120] sm:$0xff] }
  0x22   : > { %v4885_v58 = vld [vmem:[%s4621_s8 + $0x138] sm:$0xff]  ;;  %v4888_v59 = vld [vmem:[%s4621_s8 + $0x130] sm:$0xff] }
  0x25   : > { %486 = vrot.lane.b32.xlu1 %v4654_v10, %s4545_s10  ;;  %484 = vrot.lane.b32.xlu0 %v4634_v6, %s4545_s10 }
  0x29   : > { %633 = vrot.lane.b32.xlu1 %v4665_v11, %s4544_s9  ;;  %631 = vrot.lane.b32.xlu0 %v4668_v12, %s4544_s9 }
  0x2d   : > { %490 = vrot.lane.b32.xlu1 %v4668_v12, %s4545_s10  ;;  %488 = vrot.lane.b32.xlu0 %v4651_v9, %s4545_s10 }
  0x31   : > { %637 = vrot.lane.b32.xlu1 %v4679_v13, %s4544_s9  ;;  %635 = vrot.lane.b32.xlu0 %v4682_v14, %s4544_s9 }
  0x35   : > { %494 = vrot.lane.b32.xlu1 %v4682_v14, %s4545_s10  ;;  %492 = vrot.lane.b32.xlu0 %v4665_v11, %s4545_s10 }
  0x39   : > { %641 = vrot.lane.b32.xlu1 %v4693_v15, %s4544_s9  ;;  %639 = vrot.lane.b32.xlu0 %v4696_v16, %s4544_s9 }
  0x3d   : > { %498 = vrot.lane.b32.xlu1 %v4696_v16, %s4545_s10  ;;  %496 = vrot.lane.b32.xlu0 %v4679_v13, %s4545_s10 }
  0x41   : > { %645 = vrot.lane.b32.xlu1 %v4707_v17, %s4544_s9  ;;  %643 = vrot.lane.b32.xlu0 %v4710_v18, %s4544_s9 }
  0x45   : > { %502 = vrot.lane.b32.xlu1 %v4710_v18, %s4545_s10  ;;  %500 = vrot.lane.b32.xlu0 %v4693_v15, %s4545_s10 }
  0x49   : > { %649 = vrot.lane.b32.xlu1 %v4721_v19, %s4544_s9  ;;  %647 = vrot.lane.b32.xlu0 %v4724_v20, %s4544_s9 }
  0x4d   : > { %506 = vrot.lane.b32.xlu1 %v4724_v20, %s4545_s10  ;;  %504 = vrot.lane.b32.xlu0 %v4707_v17, %s4545_s10 }
  0x51   : > { %653 = vrot.lane.b32.xlu1 %v4735_v21, %s4544_s9  ;;  %651 = vrot.lane.b32.xlu0 %v4738_v22, %s4544_s9 }
  0x55   : > { %510 = vrot.lane.b32.xlu1 %v4738_v22, %s4545_s10  ;;  %508 = vrot.lane.b32.xlu0 %v4721_v19, %s4545_s10 }
  0x59   : > { %657 = vrot.lane.b32.xlu1 %v4749_v23, %s4544_s9  ;;  %655 = vrot.lane.b32.xlu0 %v4752_v24, %s4544_s9 }
  0x5d   : > { %514 = vrot.lane.b32.xlu1 %v4752_v24, %s4545_s10  ;;  %512 = vrot.lane.b32.xlu0 %v4735_v21, %s4545_s10 }
  0x61   : > { %661 = vrot.lane.b32.xlu1 %v4763_v25, %s4544_s9  ;;  %659 = vrot.lane.b32.xlu0 %v4766_v26, %s4544_s9 }
  0x65   : > { %518 = vrot.lane.b32.xlu1 %v4766_v26, %s4545_s10  ;;  %516 = vrot.lane.b32.xlu0 %v4749_v23, %s4545_s10 }
  0x69   : > { %665 = vrot.lane.b32.xlu1 %v4777_v27, %s4544_s9  ;;  %663 = vrot.lane.b32.xlu0 %v4780_v28, %s4544_s9 }
  0x6d   : > { %522 = vrot.lane.b32.xlu1 %v4780_v28, %s4545_s10  ;;  %520 = vrot.lane.b32.xlu0 %v4763_v25, %s4545_s10 }
  0x71   : > { %669 = vrot.lane.b32.xlu1 %v4791_v29, %s4544_s9  ;;  %667 = vrot.lane.b32.xlu0 %v4794_v30, %s4544_s9 }
  0x75   : > { %526 = vrot.lane.b32.xlu1 %v4794_v30, %s4545_s10  ;;  %524 = vrot.lane.b32.xlu0 %v4777_v27, %s4545_s10 }
  0x79   : > { %673 = vrot.lane.b32.xlu1 %v4805_v31, %s4544_s9  ;;  %671 = vrot.lane.b32.xlu0 %v4808_v32, %s4544_s9 }
  0x7d   : > { %530 = vrot.lane.b32.xlu1 %v4808_v32, %s4545_s10  ;;  %528 = vrot.lane.b32.xlu0 %v4791_v29, %s4545_s10 }
  0x81   : > { %677 = vrot.lane.b32.xlu1 %v4819_v33, %s4544_s9  ;;  %675 = vrot.lane.b32.xlu0 %v4822_v34, %s4544_s9 }
  0x85   : > { %534 = vrot.lane.b32.xlu1 %v4822_v34, %s4545_s10  ;;  %532 = vrot.lane.b32.xlu0 %v4805_v31, %s4545_s10 }
  0x87   : > { %v624_v38 = vpop.permute.xlu1 %623  ;;  %v477_v39 = vpop.permute.xlu0 %476 }
  0x88   : > { %v768_v40 = vsel %vm767_vm3, %v4833_v35, %v477_v39  ;;  %v4907_v39 = vld [vmem:[%s4621_s8 + $0x148] sm:$0xff] }
  0x89   : > { %681 = vrot.lane.b32.xlu1 %v4836_v36, %s4544_s9  ;;  %679 = vrot.lane.b32.xlu0 %v4839_v37, %s4544_s9  ;;  %v817_v41 = vsel %vm816_vm4, %v768_v40, %v624_v38  ;;  %v4910_v40 = vld [vmem:[%s4621_s8 + $0x140] sm:$0xff] }
  0x8a   : > { %4152 = vmatprep.mubr.msk.f32.mxu0 %vm867_vm5, %v817_v41 }
  0x8b   : > { %v626_v43 = vpop.permute.xlu1 %625  ;;  %v479_v44 = vpop.permute.xlu0 %478 }
  0x8c   : > { %v769_v45 = vsel %vm767_vm3, %v4849_v42, %v479_v44 }
  0x8d   : > { %538 = vrot.lane.b32.xlu1 %v4839_v37, %s4545_s10  ;;  %536 = vrot.lane.b32.xlu0 %v4819_v33, %s4545_s10  ;;  %v818_v46 = vsel %vm816_vm4, %v769_v45, %v626_v43 }
  0x8e   : > { %4153 = vmatmul.mubr.msk.f32.vlgmr.msra.gmra.mrb[0].mxu0 %vm867_vm5, %v818_v46 }
  0x8f   : > { %v483_v49 = vpop.permute.xlu1 %482  ;;  %v481_v50 = vpop.permute.xlu0 %480 }
  0x90   : > { %v771_v52 = vsel %vm767_vm3, %v4627_v5, %v483_v49  ;;  %v770_v53 = vsel %vm767_vm3, %v4867_v51, %v481_v50 }
  0x91   : > { %685 = vrot.lane.b32.xlu1 %v4861_v47, %s4544_s9  ;;  %683 = vrot.lane.b32.xlu0 %v4864_v48, %s4544_s9 }
  0x93   : > { %v630_v54 = vpop.permute.xlu1 %629  ;;  %v628_v55 = vpop.permute.xlu0 %627 }
  0x94   : > { %v820_v56 = vsel %vm816_vm4, %v771_v52, %v630_v54  ;;  %v819_v57 = vsel %vm816_vm4, %v770_v53, %v628_v55  ;;  %v4929_v53 = vld [vmem:[%s4621_s8 + $0x158] sm:$0xff]  ;;  %v4932_v54 = vld [vmem:[%s4621_s8 + $0x150] sm:$0xff] }
  0x95   : > { %542 = vrot.lane.b32.xlu1 %v4864_v48, %s4545_s10  ;;  %540 = vrot.lane.b32.xlu0 %v4836_v36, %s4545_s10 }
  0x96   : > { %4155 = vmatprep.mubr.msk.f32.mxu0 %vm867_vm5, %v819_v57 }
  0x97   : > { %4156 = vmatmul.mubr.msk.f32.gmra.mrb[2].mxu0 %vm867_vm5, %v820_v56  ;;  %v487_v60 = vpop.permute.xlu1 %486  ;;  %v485_v61 = vpop.permute.xlu0 %484 }
  0x98   : > { %v773_v62 = vsel %vm767_vm3, %v4644_v8, %v487_v60  ;;  %v772_v63 = vsel %vm767_vm3, %v4637_v7, %v485_v61 }
  0x99   : > { %689 = vrot.lane.b32.xlu1 %v4885_v58, %s4544_s9  ;;  %687 = vrot.lane.b32.xlu0 %v4888_v59, %s4544_s9 }
  0x9b   : > { %v634_v0 = vpop.permute.xlu1 %633  ;;  %v632_v1 = vpop.permute.xlu0 %631 }
  0x9c   : > { %v822_v2 = vsel %vm816_vm4, %v773_v62, %v634_v0  ;;  %v821_v38 = vsel %vm816_vm4, %v772_v63, %v632_v1  ;;  %v4951_v1 = vld [vmem:[%s4621_s8 + $0x168] sm:$0xff] }
  0x9d   : > { %546 = vrot.lane.b32.xlu1 %v4888_v59, %s4545_s10  ;;  %544 = vrot.lane.b32.xlu0 %v4861_v47, %s4545_s10 }
  0x9e   : > { %4158 = vmatprep.mubr.msk.f32.mxu0 %vm867_vm5, %v821_v38 }
  0x9f   : > { %4159 = vmatmul.mubr.msk.f32.gmra.mrb[4].mxu0 %vm867_vm5, %v822_v2  ;;  %v491_v41 = vpop.permute.xlu1 %490  ;;  %v489_v43 = vpop.permute.xlu0 %488  ;;  %v4954_v2 = vld [vmem:[%s4621_s8 + $0x160] sm:$0xff] }
  0xa0   : > { %v775_v44 = vsel %vm767_vm3, %v4634_v6, %v491_v41  ;;  %v774_v45 = vsel %vm767_vm3, %v4624_v4, %v489_v43 }
  0xa1   : > { %693 = vrot.lane.b32.xlu1 %v4907_v39, %s4544_s9  ;;  %691 = vrot.lane.b32.xlu0 %v4910_v40, %s4544_s9 }
  0xa3   : > { %v638_v46 = vpop.permute.xlu1 %637  ;;  %v636_v49 = vpop.permute.xlu0 %635 }
  0xa4   : > { %v824_v50 = vsel %vm816_vm4, %v775_v44, %v638_v46  ;;  %v823_v52 = vsel %vm816_vm4, %v774_v45, %v636_v49 }
  0xa5   : > { %550 = vrot.lane.b32.xlu1 %v4910_v40, %s4545_s10  ;;  %548 = vrot.lane.b32.xlu0 %v4885_v58, %s4545_s10 }
  0xa6   : > { %4161 = vmatprep.mubr.msk.f32.mxu0 %vm867_vm5, %v823_v52  ;;  %v4973_v52 = vld [vmem:[%s4621_s8 + $0x178] sm:$0xff] }
  0xa7   : > { %4162 = vmatmul.mubr.msk.f32.gmra.mrb[6].mxu0 %vm867_vm5, %v824_v50  ;;  %v495_v55 = vpop.permute.xlu1 %494  ;;  %v493_v56 = vpop.permute.xlu0 %492 }
  0xa8   : > { %v777_v57 = vsel %vm767_vm3, %v4651_v9, %v495_v55  ;;  %v776_v60 = vsel %vm767_vm3, %v4654_v10, %v493_v56  ;;  %v4976_v55 = vld [vmem:[%s4621_s8 + $0x170] sm:$0xff] }
  0xa9   : > { %697 = vrot.lane.b32.xlu1 %v4929_v53, %s4544_s9  ;;  %695 = vrot.lane.b32.xlu0 %v4932_v54, %s4544_s9 }
  0xab   : > { %v642_v61 = vpop.permute.xlu1 %641  ;;  %v640_v62 = vpop.permute.xlu0 %639 }
  0xac   : > { %v826_v63 = vsel %vm816_vm4, %v777_v57, %v642_v61  ;;  %v825_v0 = vsel %vm816_vm4, %v776_v60, %v640_v62 }
  0xad   : > { %554 = vrot.lane.b32.xlu1 %v4932_v54, %s4545_s10  ;;  %552 = vrot.lane.b32.xlu0 %v4907_v39, %s4545_s10 }
  0xae   : > { %4164 = vmatprep.mubr.msk.f32.mxu0 %vm867_vm5, %v825_v0 }
  0xaf   : > { %4165 = vmatmul.mubr.msk.f32.gmra.mrb[8].mxu0 %vm867_vm5, %v826_v63  ;;  %v499_v38 = vpop.permute.xlu1 %498  ;;  %v497_v41 = vpop.permute.xlu0 %496 }
  0xb0   : > { %v779_v43 = vsel %vm767_vm3, %v4665_v11, %v499_v38  ;;  %v778_v44 = vsel %vm767_vm3, %v4668_v12, %v497_v41  ;;  %v423_v41 = vld [vmem:[%s4992_s14 + $0x8] sm:$0xff] }
  0xb1   : > { %701 = vrot.lane.b32.xlu1 %v4951_v1, %s4544_s9  ;;  %699 = vrot.lane.b32.xlu0 %v4954_v2, %s4544_s9 }
  0xb3   : > { %v646_v45 = vpop.permute.xlu1 %645  ;;  %v644_v46 = vpop.permute.xlu0 %643 }
  0xb4   : > { %v828_v49 = vsel %vm816_vm4, %v779_v43, %v646_v45  ;;  %v827_v50 = vsel %vm816_vm4, %v778_v44, %v644_v46  ;;  %v422_v43 = vld [vmem:[%s4992_s14] sm:$0xff] }
  0xb5   : > { %558 = vrot.lane.b32.xlu1 %v4954_v2, %s4545_s10  ;;  %556 = vrot.lane.b32.xlu0 %v4929_v53, %s4545_s10 }
  0xb6   : > { %4167 = vmatprep.mubr.msk.f32.mxu0 %vm867_vm5, %v827_v50 }
  0xb7   : > { %4168 = vmatmul.mubr.msk.f32.gmra.mrb[10].mxu0 %vm867_vm5, %v828_v49  ;;  %v503_v56 = vpop.permute.xlu1 %502  ;;  %v501_v57 = vpop.permute.xlu0 %500 }
  0xb8   : > { %v781_v60 = vsel %vm767_vm3, %v4679_v13, %v503_v56  ;;  %v780_v61 = vsel %vm767_vm3, %v4682_v14, %v501_v57 }
  0xb9   : > { %705 = vrot.lane.b32.xlu1 %v4973_v52, %s4544_s9  ;;  %703 = vrot.lane.b32.xlu0 %v4976_v55, %s4544_s9 }
  0xbb   : > { %v650_v62 = vpop.permute.xlu1 %649  ;;  %v648_v63 = vpop.permute.xlu0 %647 }
  0xbc   : > { %v830_v0 = vsel %vm816_vm4, %v781_v60, %v650_v62  ;;  %v829_v38 = vsel %vm816_vm4, %v780_v61, %v648_v63  ;;  %v425_v61 = vld [vmem:[%s4992_s14 + $0x18] sm:$0xff]  ;;  %v424_v62 = vld [vmem:[%s4992_s14 + $0x10] sm:$0xff] }
  0xbd   : > { %562 = vrot.lane.b32.xlu1 %v4976_v55, %s4545_s10  ;;  %560 = vrot.lane.b32.xlu0 %v4951_v1, %s4545_s10 }
  0xbe   : > { %4170 = vmatprep.mubr.msk.f32.mxu0 %vm867_vm5, %v829_v38 }
  0xbf   : > { %4171 = vmatmul.mubr.msk.f32.gmra.mrb[12].mxu0 %vm867_vm5, %v830_v0  ;;  %v507_v44 = vpop.permute.xlu1 %506  ;;  %v505_v45 = vpop.permute.xlu0 %504 }
  0xc0   : > { %v783_v46 = vsel %vm767_vm3, %v4693_v15, %v507_v44  ;;  %v782_v49 = vsel %vm767_vm3, %v4696_v16, %v505_v45 }
  0xc1   : > { %709 = vrot.lane.b32.xlu1 %v423_v41, %s4544_s9  ;;  %707 = vrot.lane.b32.xlu0 %v422_v43, %s4544_s9 }
  0xc3   : > { %v654_v50 = vpop.permute.xlu1 %653  ;;  %v652_v56 = vpop.permute.xlu0 %651 }
  0xc4   : > { %v832_v57 = vsel %vm816_vm4, %v783_v46, %v654_v50  ;;  %v831_v60 = vsel %vm816_vm4, %v782_v49, %v652_v56  ;;  %v427_v50 = vld [vmem:[%s4992_s14 + $0x28] sm:$0xff]  ;;  %v426_v56 = vld [vmem:[%s4992_s14 + $0x20] sm:$0xff] }
  0xc5   : > { %566 = vrot.lane.b32.xlu1 %v422_v43, %s4545_s10  ;;  %564 = vrot.lane.b32.xlu0 %v4973_v52, %s4545_s10 }
  0xc6   : > { %4173 = vmatprep.mubr.msk.f32.mxu0 %vm867_vm5, %v831_v60 }
  0xc7   : > { %4174 = vmatmul.mubr.msk.f32.gmra.mrb[14].mxu0 %vm867_vm5, %v832_v57  ;;  %v511_v63 = vpop.permute.xlu1 %510  ;;  %v509_v0 = vpop.permute.xlu0 %508 }
  0xc8   : > { %v785_v38 = vsel %vm767_vm3, %v4707_v17, %v511_v63  ;;  %v784_v43 = vsel %vm767_vm3, %v4710_v18, %v509_v0 }
  0xc9   : > { %713 = vrot.lane.b32.xlu1 %v425_v61, %s4544_s9  ;;  %711 = vrot.lane.b32.xlu0 %v424_v62, %s4544_s9 }
  0xcb   : > { %v658_v44 = vpop.permute.xlu1 %657  ;;  %v656_v45 = vpop.permute.xlu0 %655 }
  0xcc   : > { %v834_v46 = vsel %vm816_vm4, %v785_v38, %v658_v44  ;;  %v833_v49 = vsel %vm816_vm4, %v784_v43, %v656_v45 }
  0xcd   : > { %570 = vrot.lane.b32.xlu1 %v424_v62, %s4545_s10  ;;  %568 = vrot.lane.b32.xlu0 %v423_v41, %s4545_s10 }
  0xce   : > { %4176 = vmatprep.mubr.msk.f32.mxu0 %vm867_vm5, %v833_v49 }
  0xcf   : > { %4177 = vmatmul.mubr.msk.f32.gmra.mrb[16].mxu0 %vm867_vm5, %v834_v46  ;;  %v515_v57 = vpop.permute.xlu1 %514  ;;  %v513_v60 = vpop.permute.xlu0 %512 }
  0xd0   : > { %v787_v61 = vsel %vm767_vm3, %v4721_v19, %v515_v57  ;;  %v786_v62 = vsel %vm767_vm3, %v4724_v20, %v513_v60 }
  0xd1   : > { %717 = vrot.lane.b32.xlu1 %v427_v50, %s4544_s9  ;;  %715 = vrot.lane.b32.xlu0 %v426_v56, %s4544_s9 }
  0xd3   : > { %v662_v63 = vpop.permute.xlu1 %661  ;;  %v660_v41 = vpop.permute.xlu0 %659 }
  0xd4   : > { %v836_v0 = vsel %vm816_vm4, %v787_v61, %v662_v63  ;;  %v835_v38 = vsel %vm816_vm4, %v786_v62, %v660_v41 }
  0xd5   : > { %4179 = vmatprep.mubr.msk.f32.mxu0 %vm867_vm5, %v835_v38 }
  0xd6   : > { %4180 = vmatmul.mubr.msk.f32.gmra.mrb[18].mxu0 %vm867_vm5, %v836_v0 }
  0xd7   : > { %v519_v43 = vpop.permute.xlu1 %518  ;;  %v517_v44 = vpop.permute.xlu0 %516 }
  0xd8   : > { %v789_v45 = vsel %vm767_vm3, %v4735_v21, %v519_v43  ;;  %v788_v46 = vsel %vm767_vm3, %v4738_v22, %v517_v44 }
  0xdb   : > { %v666_v49 = vpop.permute.xlu1 %665  ;;  %v664_v50 = vpop.permute.xlu0 %663 }
  0xdc   : > { %v838_v56 = vsel %vm816_vm4, %v789_v45, %v666_v49  ;;  %v837_v57 = vsel %vm816_vm4, %v788_v46, %v664_v50 }
  0xdd   : > { %4182 = vmatprep.mubr.msk.f32.mxu0 %vm867_vm5, %v837_v57 }
  0xde   : > { %4183 = vmatmul.mubr.msk.f32.gmra.mrb[20].mxu0 %vm867_vm5, %v838_v56 }
  0xdf   : > { %v523_v60 = vpop.permute.xlu1 %522  ;;  %v521_v61 = vpop.permute.xlu0 %520 }
  0xe0   : > { %v791_v62 = vsel %vm767_vm3, %v4749_v23, %v523_v60  ;;  %v790_v63 = vsel %vm767_vm3, %v4752_v24, %v521_v61 }
  0xe3   : > { %v670_v41 = vpop.permute.xlu1 %669  ;;  %v668_v0 = vpop.permute.xlu0 %667 }
  0xe4   : > { %v840_v38 = vsel %vm816_vm4, %v791_v62, %v670_v41  ;;  %v839_v43 = vsel %vm816_vm4, %v790_v63, %v668_v0 }
  0xe5   : > { %4185 = vmatprep.mubr.msk.f32.mxu0 %vm867_vm5, %v839_v43 }
  0xe6   : > { %4186 = vmatmul.mubr.msk.f32.gmra.mrb[22].mxu0 %vm867_vm5, %v840_v38 }
  0xe7   : > { %v527_v44 = vpop.permute.xlu1 %526  ;;  %v525_v45 = vpop.permute.xlu0 %524 }
  0xe8   : > { %v793_v46 = vsel %vm767_vm3, %v4763_v25, %v527_v44  ;;  %v792_v49 = vsel %vm767_vm3, %v4766_v26, %v525_v45 }
  0xeb   : > { %v674_v50 = vpop.permute.xlu1 %673  ;;  %v672_v56 = vpop.permute.xlu0 %671 }
  0xec   : > { %v842_v57 = vsel %vm816_vm4, %v793_v46, %v674_v50  ;;  %v841_v60 = vsel %vm816_vm4, %v792_v49, %v672_v56 }
  0xed   : > { %4188 = vmatprep.mubr.msk.f32.mxu0 %vm867_vm5, %v841_v60 }
  0xee   : > { %4189 = vmatmul.mubr.msk.f32.gmra.mrb[24].mxu0 %vm867_vm5, %v842_v57 }
  0xef   : > { %v531_v61 = vpop.permute.xlu1 %530  ;;  %v529_v62 = vpop.permute.xlu0 %528 }
  0xf0   : > { %v795_v63 = vsel %vm767_vm3, %v4777_v27, %v531_v61  ;;  %v794_v41 = vsel %vm767_vm3, %v4780_v28, %v529_v62 }
  0xf3   : > { %v678_v0 = vpop.permute.xlu1 %677  ;;  %v676_v38 = vpop.permute.xlu0 %675 }
  0xf4   : > { %v844_v43 = vsel %vm816_vm4, %v795_v63, %v678_v0  ;;  %v843_v44 = vsel %vm816_vm4, %v794_v41, %v676_v38 }
  0xf5   : > { %4191 = vmatprep.mubr.msk.f32.mxu0 %vm867_vm5, %v843_v44 }
  0xf6   : > { %4192 = vmatmul.mubr.msk.f32.gmra.mrb[26].mxu0 %vm867_vm5, %v844_v43 }
  0xf7   : > { %v535_v45 = vpop.permute.xlu1 %534  ;;  %v533_v46 = vpop.permute.xlu0 %532 }
  0xf8   : > { %v797_v49 = vsel %vm767_vm3, %v4791_v29, %v535_v45  ;;  %v796_v27 = vsel %vm767_vm3, %v4794_v30, %v533_v46 }
  0xfb   : > { %v682_v50 = vpop.permute.xlu1 %681  ;;  %v680_v56 = vpop.permute.xlu0 %679 }
  0xfc   : > { %v846_v57 = vsel %vm816_vm4, %v797_v49, %v682_v50  ;;  %v845_v60 = vsel %vm816_vm4, %v796_v27, %v680_v56 }
  0xfd   : > { %4194 = vmatprep.mubr.msk.f32.mxu0 %vm867_vm5, %v845_v60 }
  0xfe   : > { %4195 = vmatmul.mubr.msk.f32.gmra.mrb[28].mxu0 %vm867_vm5, %v846_v57 }
  0xff   : > { %v539_v61 = vpop.permute.xlu1 %538  ;;  %v537_v62 = vpop.permute.xlu0 %536 }
 0x100   : > { %v799_v63 = vsel %vm767_vm3, %v4805_v31, %v539_v61  ;;  %v798_v29 = vsel %vm767_vm3, %v4808_v32, %v537_v62 }
 0x103   : > { %v686_v41 = vpop.permute.xlu1 %685  ;;  %v684_v30 = vpop.permute.xlu0 %683 }
 0x104   : > { %v848_v0 = vsel %vm816_vm4, %v799_v63, %v686_v41  ;;  %v847_v38 = vsel %vm816_vm4, %v798_v29, %v684_v30 }
 0x105   : > { %4197 = vmatprep.mubr.msk.f32.mxu0 %vm867_vm5, %v847_v38 }
 0x106   : > { %4198 = vmatmul.mubr.msk.f32.gmra.mrb[30].mxu0 %vm867_vm5, %v848_v0 }
 0x107   : > { %v543_v43 = vpop.permute.xlu1 %542  ;;  %v541_v44 = vpop.permute.xlu0 %540 }
 0x108   : > { %v801_v45 = vsel %vm767_vm3, %v4819_v33, %v543_v43  ;;  %v800_v31 = vsel %vm767_vm3, %v4822_v34, %v541_v44 }
 0x10b   : > { %v690_v46 = vpop.permute.xlu1 %689  ;;  %v688_v32 = vpop.permute.xlu0 %687 }
 0x10c   : > { %v850_v49 = vsel %vm816_vm4, %v801_v45, %v690_v46  ;;  %v849_v27 = vsel %vm816_vm4, %v800_v31, %v688_v32 }
 0x10d   : > { %4200 = vmatprep.mubr.msk.f32.mxu0 %vm867_vm5, %v849_v27 }
 0x10e   : > { %4201 = vmatmul.mubr.msk.f32.gmra.mrb[32].mxu0 %vm867_vm5, %v850_v49 }
 0x10f   : > { %v547_v50 = vpop.permute.xlu1 %546  ;;  %v545_v56 = vpop.permute.xlu0 %544 }
 0x110   : > { %v803_v57 = vsel %vm767_vm3, %v4836_v36, %v547_v50  ;;  %v802_v33 = vsel %vm767_vm3, %v4839_v37, %v545_v56 }
 0x113   : > { %v694_v60 = vpop.permute.xlu1 %693  ;;  %v692_v34 = vpop.permute.xlu0 %691 }
 0x114   : > { %v852_v61 = vsel %vm816_vm4, %v803_v57, %v694_v60  ;;  %v851_v62 = vsel %vm816_vm4, %v802_v33, %v692_v34 }
 0x115   : > { %4203 = vmatprep.mubr.msk.f32.mxu0 %vm867_vm5, %v851_v62 }
 0x116   : > { %4204 = vmatmul.mubr.msk.f32.gmra.mrb[34].mxu0 %vm867_vm5, %v852_v61 }
 0x117   : > { %v551_v63 = vpop.permute.xlu1 %550  ;;  %v549_v29 = vpop.permute.xlu0 %548 }
 0x118   : > { %v805_v41 = vsel %vm767_vm3, %v4861_v47, %v551_v63  ;;  %v804_v36 = vsel %vm767_vm3, %v4864_v48, %v549_v29 }
 0x11b   : > { %v698_v30 = vpop.permute.xlu1 %697  ;;  %v696_v37 = vpop.permute.xlu0 %695 }
 0x11c   : > { %v854_v0 = vsel %vm816_vm4, %v805_v41, %v698_v30  ;;  %v853_v38 = vsel %vm816_vm4, %v804_v36, %v696_v37  ;;  %v1369_v41 = vlaneseq }
 0x11d   : > { %4206 = vmatprep.mubr.msk.f32.mxu0 %vm867_vm5, %v853_v38 }
 0x11e   : > { %4207 = vmatmul.mubr.msk.f32.gmra.mrb[36].mxu0 %vm867_vm5, %v854_v0  ;;  %v5139_v37 = vshrl.u32 %v1369_v41, 7  ;;  %v2133_v41 = vrot.slane %v4624_v4, 1 }
 0x11f   : > { %v555_v43 = vpop.permute.xlu1 %554  ;;  %v553_v44 = vpop.permute.xlu0 %552 }
 0x120   : > { %v807_v45 = vsel %vm767_vm3, %v4885_v58, %v555_v43  ;;  %v806_v47 = vsel %vm767_vm3, %v4888_v59, %v553_v44  ;;  %v2149_v43 = vrot.slane %v4849_v42, 1  ;;  %v2167_v44 = vrot.slane %v4867_v51, 1 }
 0x121   : > { %vm1371_vm6 = vcmp.lt.s32.totalorder %v5139_v37, 7  ;;  %vm1452_vm7 = vcmp.lt.s32.totalorder %v5139_v37, 6 }
 0x123   : > { %v702_v31 = vpop.permute.xlu1 %701  ;;  %v700_v48 = vpop.permute.xlu0 %699 }
 0x124   : > { %v856_v46 = vsel %vm816_vm4, %v807_v45, %v702_v31  ;;  %v855_v32 = vsel %vm816_vm4, %v806_v47, %v700_v48  ;;  %v2131_v45 = vrot.slane %v4833_v35, 1  ;;  %v2257_v48 = vrot.slane %v4867_v51, 2 }
 0x125   : > { %4209 = vmatprep.mubr.msk.f32.mxu0 %vm867_vm5, %v855_v32 }
 0x126   : > { %4210 = vmatmul.mubr.msk.f32.gmra.mrb[38].mxu0 %vm867_vm5, %v856_v46 }
 0x127   : > { %v559_v49 = vpop.permute.xlu1 %558  ;;  %v557_v27 = vpop.permute.xlu0 %556 }
 0x128   : > { %v809_v50 = vsel %vm767_vm3, %v4907_v39, %v559_v49  ;;  %v808_v58 = vsel %vm767_vm3, %v4910_v40, %v557_v27  ;;  %v2239_v49 = vrot.slane %v4849_v42, 2  ;;  %v2221_v27 = vrot.slane %v4833_v35, 2 }
 0x129   : > { %v2150_v35 = vrot.slane %v4637_v7, 1 }
 0x12a   : > { %v2293_v51 = vsel %vm1452_vm7, %v2221_v27, %v2239_v49 }
 0x12b   : > { %v706_v56 = vpop.permute.xlu1 %705  ;;  %v704_v59 = vpop.permute.xlu0 %703 }
 0x12c   : > { %v858_v57 = vsel %vm816_vm4, %v809_v50, %v706_v56  ;;  %v857_v33 = vsel %vm816_vm4, %v808_v58, %v704_v59  ;;  %v2168_v50 = vrot.slane %v4644_v8, 1  ;;  %v2275_v58 = vsel %vm1452_vm7, %v2239_v49, %v2257_v48 }
 0x12d   : > { %4212 = vmatprep.mubr.msk.f32.mxu0 %vm867_vm5, %v857_v33  ;;  %v2132_v33 = vrot.slane %v4627_v5, 1  ;;  %v2171_v48 = vrot.slane %v4696_v16, 1  ;;  %v2225_v49 = vrot.slane %v4682_v14, 2 }
 0x12e   : > { %4213 = vmatmul.mubr.msk.f32.gmra.mrb[40].mxu0 %vm867_vm5, %v858_v57 }
 0x12f   : > { %v563_v60 = vpop.permute.xlu1 %562  ;;  %v561_v34 = vpop.permute.xlu0 %560 }
 0x130   : > { %v811_v61 = vsel %vm767_vm3, %v4929_v53, %v563_v60  ;;  %v810_v39 = vsel %vm767_vm3, %v4932_v54, %v561_v34 }
 0x133   : > { %v710_v62 = vpop.permute.xlu1 %709  ;;  %v708_v40 = vpop.permute.xlu0 %707 }
 0x134   : > { %v860_v63 = vsel %vm816_vm4, %v811_v61, %v710_v62  ;;  %v859_v29 = vsel %vm816_vm4, %v810_v39, %v708_v40  ;;  %v2258_v61 = vrot.slane %v4644_v8, 2  ;;  %v2240_v39 = vrot.slane %v4637_v7, 2 }
 0x135   : > { %4215 = vmatprep.mubr.msk.f32.mxu0 %vm867_vm5, %v859_v29  ;;  %v2222_v62 = vrot.slane %v4627_v5, 2  ;;  %v2151_v8 = vrot.slane %v4634_v6, 1  ;;  %v2169_v29 = vrot.slane %v4654_v10, 1 }
 0x136   : > { %4216 = vmatmul.mubr.msk.f32.gmra.mrb[42].mxu0 %vm867_vm5, %v860_v63  ;;  %v2276_v40 = vsel %vm1452_vm7, %v2240_v39, %v2258_v61  ;;  %v2226_v61 = vrot.slane %v4693_v15, 2 }
 0x137   : > { %v567_v36 = vpop.permute.xlu1 %566  ;;  %v565_v30 = vpop.permute.xlu0 %564  ;;  %v2294_v63 = vsel %vm1452_vm7, %v2222_v62, %v2240_v39  ;;  %v2187_v7 = vsel %vm1371_vm6, %v2151_v8, %v2169_v29  ;;  %v2205_v5 = vsel %vm1371_vm6, %v2133_v41, %v2151_v8  ;;  %v2155_v8 = vrot.slane %v4721_v19, 1 }
 0x138   : > { %v813_v53 = vsel %vm767_vm3, %v4951_v1, %v567_v36  ;;  %v812_v54 = vsel %vm767_vm3, %v4954_v2, %v565_v30  ;;  %v2185_v1 = vsel %vm1371_vm6, %v2149_v43, %v2167_v44  ;;  %v2203_v2 = vsel %vm1371_vm6, %v2131_v45, %v2149_v43 }
 0x139   : > { %2349 = vrot.lane.b32.xlu1 %v2185_v1, %s4545_s10  ;;  %2347 = vrot.lane.b32.xlu0 %v2203_v2, %s4545_s10  ;;  %v2241_v36 = vrot.slane %v4634_v6, 2  ;;  %v2259_v30 = vrot.slane %v4654_v10, 2  ;;  %v2170_v43 = vrot.slane %v4665_v11, 1  ;;  %v2134_v6 = vrot.slane %v4651_v9, 1 }
 0x13a   : > { %v2242_v44 = vrot.slane %v4668_v12, 2  ;;  %v2260_v45 = vrot.slane %v4665_v11, 2  ;;  %v2153_v2 = vrot.slane %v4679_v13, 1 }
 0x13b   : > { %v714_v0 = vpop.permute.xlu1 %713  ;;  %v712_v38 = vpop.permute.xlu0 %711 }
 0x13c   : > { %v862_v47 = vsel %vm816_vm4, %v813_v53, %v714_v0  ;;  %v861_v31 = vsel %vm816_vm4, %v812_v54, %v712_v38  ;;  %v2223_v53 = vrot.slane %v4624_v4, 2  ;;  %v2277_v54 = vsel %vm1452_vm7, %v2241_v36, %v2259_v30 }
 0x13d   : > { %4218 = vmatprep.mubr.msk.f32.mxu0 %vm867_vm5, %v861_v31  ;;  %2493 = vrot.lane.b32.xlu1 %v2275_v58, %s4544_s9  ;;  %v2152_v38 = vrot.slane %v4668_v12, 1  ;;  %v2278_v31 = vsel %vm1452_vm7, %v2242_v44, %v2260_v45  ;;  %v2135_v12 = vrot.slane %v4682_v14, 1  ;;  %v2189_v11 = vsel %vm1371_vm6, %v2153_v2, %v2171_v48 }
 0x13e   : > { %4219 = vmatmul.mubr.msk.f32.gmra.mrb[44].mxu0 %vm867_vm5, %v862_v47  ;;  %2491 = vrot.lane.b32.xlu0 %v2293_v51, %s4544_s9  ;;  %v2295_v0 = vsel %vm1452_vm7, %v2223_v53, %v2241_v36  ;;  %v2224_v47 = vrot.slane %v4651_v9, 2  ;;  %v2154_v14 = vrot.slane %v4710_v18, 1  ;;  %v2245_v30 = vrot.slane %v4721_v19, 2 }
 0x13f   : > { %v571_v46 = vpop.permute.xlu1 %570  ;;  %v569_v32 = vpop.permute.xlu0 %568  ;;  %v2188_v10 = vsel %vm1371_vm6, %v2152_v38, %v2170_v43  ;;  %v2206_v4 = vsel %vm1371_vm6, %v2134_v6, %v2152_v38  ;;  %v2207_v9 = vsel %vm1371_vm6, %v2135_v12, %v2153_v2  ;;  %v2263_v53 = vrot.slane %v4738_v22, 2 }
 0x140   : > { %v815_v56 = vsel %vm767_vm3, %v4973_v52, %v571_v46  ;;  %v814_v59 = vsel %vm767_vm3, %v4976_v55, %v569_v32  ;;  %v2186_v52 = vsel %vm1371_vm6, %v2150_v35, %v2168_v50  ;;  %v2204_v55 = vsel %vm1371_vm6, %v2132_v33, %v2150_v35 }
 0x141   : > { %2353 = vrot.lane.b32.xlu1 %v2186_v52, %s4545_s10  ;;  %v2296_v1 = vsel %vm1452_vm7, %v2224_v47, %v2242_v44  ;;  %v2243_v46 = vrot.slane %v4679_v13, 2  ;;  %v2261_v32 = vrot.slane %v4696_v16, 2  ;;  %v2244_v52 = vrot.slane %v4710_v18, 2 }
 0x142   : > { %2351 = vrot.lane.b32.xlu0 %v2204_v55, %s4545_s10  ;;  %v2262_v55 = vrot.slane %v4707_v17, 2  ;;  %v2173_v18 = vrot.slane %v4738_v22, 1  ;;  %v2281_v43 = vsel %vm1452_vm7, %v2245_v30, %v2263_v53  ;;  %v2156_v19 = vrot.slane %v4752_v24, 1 }
 0x143   : > { %v718_v57 = vpop.permute.xlu1 %717  ;;  %v716_v42 = vpop.permute.xlu0 %715 }
 0x144   : > { %v864_v60 = vsel %vm816_vm4, %v815_v56, %v718_v57  ;;  %v863_v34 = vsel %vm816_vm4, %v814_v59, %v716_v42  ;;  %v2279_v56 = vsel %vm1452_vm7, %v2243_v46, %v2261_v32  ;;  %v2297_v59 = vsel %vm1452_vm7, %v2225_v49, %v2243_v46 }
 0x145   : > { %4221 = vmatprep.mubr.msk.f32.mxu0 %vm867_vm5, %v863_v34  ;;  %2497 = vrot.lane.b32.xlu1 %v2276_v40, %s4544_s9  ;;  %v2172_v57 = vrot.slane %v4707_v17, 1  ;;  %v2136_v42 = vrot.slane %v4693_v15, 1  ;;  %v2280_v62 = vsel %vm1452_vm7, %v2244_v52, %v2262_v55  ;;  %v2298_v40 = vsel %vm1452_vm7, %v2226_v61, %v2244_v52 }
 0x146   : > { %4222 = vmatmul.mubr.msk.f32.gmra.mrb[46].mxu0 %vm867_vm5, %v864_v60  ;;  %2495 = vrot.lane.b32.xlu0 %v2294_v63, %s4544_s9  ;;  %v2137_v15 = vrot.slane %v4724_v20, 1  ;;  %v2191_v41 = vsel %vm1371_vm6, %v2155_v8, %v2173_v18  ;;  %v2246_v46 = vrot.slane %v4752_v24, 2  ;;  %v2264_v32 = vrot.slane %v4749_v23, 2 }
 0x147   : > { %v2190_v35 = vsel %vm1371_vm6, %v2154_v14, %v2172_v57  ;;  %v2208_v34 = vsel %vm1371_vm6, %v2136_v42, %v2154_v14  ;;  %v2228_v49 = vrot.slane %v4735_v21, 2  ;;  %v2139_v57 = vrot.slane %v4766_v26, 1 }
 0x148   : > { %v2247_v55 = vrot.slane %v4763_v25, 2  ;;  %v2265_v61 = vrot.slane %v4780_v28, 2 }
 0x149   : > { %2357 = vrot.lane.b32.xlu1 %v2187_v7, %s4545_s10  ;;  %v2209_v7 = vsel %vm1371_vm6, %v2137_v15, %v2155_v8 }
 0x14a   : > { %2355 = vrot.lane.b32.xlu0 %v2205_v5, %s4545_s10 }
 0x14d   : > { %2501 = vrot.lane.b32.xlu1 %v2277_v54, %s4544_s9  ;;  %v2227_v54 = vrot.slane %v4724_v20, 2  ;;  %v2174_v20 = vrot.slane %v4749_v23, 1  ;;  %v2175_v23 = vrot.slane %v4780_v28, 1 }
 0x14e   : > { %2499 = vrot.lane.b32.xlu0 %v2295_v0, %s4544_s9 }
 0x14f   : > { %v2299_v6 = vsel %vm1452_vm7, %v2227_v54, %v2245_v30 }
 0x151   : > { %2361 = vrot.lane.b32.xlu1 %v2188_v10, %s4545_s10 }
 0x152   : > { %2359 = vrot.lane.b32.xlu0 %v2206_v4, %s4545_s10 }
 0x155   : > { %2505 = vrot.lane.b32.xlu1 %v2278_v31, %s4544_s9  ;;  %v2138_v31 = vrot.slane %v4735_v21, 1  ;;  %v2157_v21 = vrot.slane %v4763_v25, 1 }
 0x156   : > { %2503 = vrot.lane.b32.xlu0 %v2296_v1, %s4544_s9  ;;  %v2192_v1 = vsel %vm1371_vm6, %v2156_v19, %v2174_v20 }
 0x157   : > { %v2210_v2 = vsel %vm1371_vm6, %v2138_v31, %v2156_v19  ;;  %v2193_v42 = vsel %vm1371_vm6, %v2157_v21, %v2175_v23 }
 0x159   : > { %2365 = vrot.lane.b32.xlu1 %v2189_v11, %s4545_s10 }
 0x15a   : > { %2363 = vrot.lane.b32.xlu0 %v2207_v9, %s4545_s10 }
 0x15d   : > { %2509 = vrot.lane.b32.xlu1 %v2279_v56, %s4544_s9  ;;  %v2300_v56 = vsel %vm1452_vm7, %v2228_v49, %v2246_v46 }
 0x15e   : > { %2507 = vrot.lane.b32.xlu0 %v2297_v59, %s4544_s9 }
 0x161   : > { %v5243_v27 = vpop.f32.mrb[0].mxu0  ;;  %2369 = vrot.lane.b32.xlu1 %v2190_v35, %s4545_s10  ;;  %v2211_v35 = vsel %vm1371_vm6, %v2139_v57, %v2157_v21 }
 0x162   : > { %6982 = vst [vmem:[#allocation2_spill] sm:$0xff] %v5243_v27  ;;  %v1337_v50 = vrot.slane %v5243_v27, 1  ;;  %v1420_v58 = vrot.slane %v5243_v27, 2  ;;  %v5247_v51 = vpop.f32.mrb[1].mxu0  ;;  %2367 = vrot.lane.b32.xlu0 %v2208_v34, %s4545_s10 }
 0x163   : > { %6983 = vst [vmem:[#allocation3_spill] sm:$0xff] %v5247_v51  ;;  %v1321_v13 = vrot.slane %v5247_v51, 1  ;;  %v1404_v16 = vrot.slane %v5247_v51, 2 }
 0x165   : > { %v5264_v33 = vsel %vm1452_vm7, %v1404_v16, %v1420_v58  ;;  %v5268_v60 = vsel %vm1371_vm6, %v1321_v13, %v1337_v50  ;;  %2513 = vrot.lane.b32.xlu1 %v2280_v62, %s4544_s9  ;;  %v2229_v62 = vrot.slane %v4766_v26, 2 }
 0x166   : > { %2511 = vrot.lane.b32.xlu0 %v2298_v40, %s4544_s9 }
 0x167   : > { %v2301_v8 = vsel %vm1452_vm7, %v2229_v62, %v2247_v55 }
 0x169   : > { %2373 = vrot.lane.b32.xlu1 %v2191_v41, %s4545_s10 }
 0x16a   : > { %v5277_v39 = vpop.f32.mrb[2].mxu0  ;;  %2371 = vrot.lane.b32.xlu0 %v2209_v7, %s4545_s10 }
 0x16b   : > { %6984 = vst [vmem:[#allocation4_spill] sm:$0xff] %v5277_v39  ;;  %v1092_v63 = vpop.f32.mrb[3].mxu0  ;;  %v1322_v0 = vrot.slane %v5277_v39, 1  ;;  %v1405_v22 = vrot.slane %v5277_v39, 2 }
 0x16c   : > { %v1353_v17 = vrot.slane %v1092_v63, 1  ;;  %v1436_v29 = vrot.slane %v1092_v63, 2  ;;  %v2283_v63 = vsel %vm1452_vm7, %v2247_v55, %v2265_v61 }
 0x16d   : > { %2517 = vrot.lane.b32.xlu1 %v2281_v43, %s4544_s9 }
 0x16e   : > { %v5294_v5 = vsel %vm1371_vm6, %v1337_v50, %v1353_v17  ;;  %v5298_v36 = vsel %vm1452_vm7, %v1420_v58, %v1436_v29  ;;  %2515 = vrot.lane.b32.xlu0 %v2299_v6, %s4544_s9  ;;  %v2282_v58 = vsel %vm1452_vm7, %v2246_v46, %v2264_v32 }
 0x171   : > { %2377 = vrot.lane.b32.xlu1 %v2192_v1, %s4545_s10 }
 0x172   : > { %v4160_v38 = vpop.f32.mrb[4].mxu0  ;;  %2375 = vrot.lane.b32.xlu0 %v2210_v2, %s4545_s10 }
 0x173   : > { %v1354_v10 = vrot.slane %v4160_v38, 1  ;;  %v1437_v4 = vrot.slane %v4160_v38, 2  ;;  %v5310_v44 = vpop.f32.mrb[5].mxu0 }
 0x174   : > { %6985 = vst [vmem:[#allocation5_spill] sm:$0xff] %v5310_v44  ;;  %v1338_v45 = vrot.slane %v5310_v44, 1  ;;  %v1421_v47 = vrot.slane %v5310_v44, 2 }
 0x175   : > { %2521 = vrot.lane.b32.xlu1 %v2282_v58, %s4544_s9 }
 0x176   : > { %v5326_v48 = vsel %vm1452_vm7, %v1405_v22, %v1421_v47  ;;  %v5330_v12 = vsel %vm1371_vm6, %v1322_v0, %v1338_v45  ;;  %v5334_v11 = vsel %vm1371_vm6, %v1338_v45, %v1354_v10  ;;  %v5340_v9 = vsel %vm1452_vm7, %v1421_v47, %v1437_v4  ;;  %2519 = vrot.lane.b32.xlu0 %v2300_v56, %s4544_s9 }
 0x179   : > { %2381 = vrot.lane.b32.xlu1 %v2193_v42, %s4545_s10 }
 0x17a   : > { %v5345_v50 = vpop.f32.mrb[6].mxu0  ;;  %2379 = vrot.lane.b32.xlu0 %v2211_v35, %s4545_s10 }
 0x17b   : > { %6986 = vst [vmem:[#allocation6_spill] sm:$0xff] %v5345_v50  ;;  %v1339_v59 = vrot.slane %v5345_v50, 1  ;;  %v1422_v13 = vrot.slane %v5345_v50, 2  ;;  %v5353_v16 = vpop.f32.mrb[7].mxu0 }
 0x17c   : > { %6987 = vst [vmem:[#allocation7_spill] sm:$0xff] %v5353_v16  ;;  %v1323_v24 = vrot.slane %v5353_v16, 1  ;;  %v1406_v14 = vrot.slane %v5353_v16, 2 }
 0x17d   : > { %2525 = vrot.lane.b32.xlu1 %v2283_v63, %s4544_s9 }
 0x17e   : > { %v5368_v34 = vsel %vm1452_vm7, %v1406_v14, %v1422_v13  ;;  %v5372_v52 = vsel %vm1371_vm6, %v1323_v24, %v1339_v59  ;;  %2523 = vrot.lane.b32.xlu0 %v2301_v8, %s4544_s9 }
 0x182   : > { %v5379_v40 = vpop.f32.mrb[8].mxu0 }
 0x183   : > { %6988 = vst [vmem:[#allocation8_spill] sm:$0xff] %v5379_v40  ;;  %v1122_v18 = vpop.f32.mrb[9].mxu0  ;;  %v1324_v30 = vrot.slane %v5379_v40, 1  ;;  %v1407_v53 = vrot.slane %v5379_v40, 2 }
 0x184   : > { %v1355_v17 = vrot.slane %v1122_v18, 1  ;;  %v1438_v29 = vrot.slane %v1122_v18, 2 }
 0x186   : > { %v5389_v25 = vsel %vm1371_vm6, %v1339_v59, %v1355_v17  ;;  %v5393_v26 = vsel %vm1452_vm7, %v1422_v13, %v1438_v29 }
 0x18a   : > { %v4169_v28 = vpop.f32.mrb[10].mxu0 }
 0x18b   : > { %v1356_v15 = vrot.slane %v4169_v28, 1  ;;  %v1439_v41 = vrot.slane %v4169_v28, 2  ;;  %v5395_v7 = vpop.f32.mrb[11].mxu0 }
 0x18c   : > { %6989 = vst [vmem:[#allocation9_spill] sm:$0xff] %v5395_v7  ;;  %v1340_v54 = vrot.slane %v5395_v7, 1  ;;  %v1423_v0 = vrot.slane %v5395_v7, 2 }
 0x18e   : > { %v5403_v38 = vsel %vm1452_vm7, %v1407_v53, %v1423_v0  ;;  %v5407_v43 = vsel %vm1371_vm6, %v1324_v30, %v1340_v54  ;;  %v5411_v6 = vsel %vm1371_vm6, %v1340_v54, %v1356_v15  ;;  %v5415_v10 = vsel %vm1452_vm7, %v1423_v0, %v1439_v41 }
 0x192   : > { %v5417_v4 = vpop.f32.mrb[12].mxu0 }
 0x193   : > { %6990 = vst [vmem:[#allocation10_spill] sm:$0xff] %v5417_v4  ;;  %v1341_v19 = vrot.slane %v5417_v4, 1  ;;  %v1424_v20 = vrot.slane %v5417_v4, 2  ;;  %v5421_v22 = vpop.f32.mrb[13].mxu0 }
 0x194   : > { %6991 = vst [vmem:[#allocation11_spill] sm:$0xff] %v5421_v22  ;;  %v1325_v45 = vrot.slane %v5421_v22, 1  ;;  %v1408_v47 = vrot.slane %v5421_v22, 2 }
 0x196   : > { %v5427_v31 = vsel %vm1452_vm7, %v1408_v47, %v1424_v20  ;;  %v5431_v1 = vsel %vm1371_vm6, %v1325_v45, %v1341_v19 }
 0x19a   : > { %v5433_v2 = vpop.f32.mrb[14].mxu0 }
 0x19b   : > { %6992 = vst [vmem:[#allocation12_spill] sm:$0xff] %v5433_v2  ;;  %v1152_v46 = vpop.f32.mrb[15].mxu0  ;;  %v1409_v24 = vrot.slane %v5433_v2, 2  ;;  %v1326_v42 = vrot.slane %v5433_v2, 1 }
 0x19c   : > { %v1357_v32 = vrot.slane %v1152_v46, 1  ;;  %v1440_v49 = vrot.slane %v1152_v46, 2 }
 0x19e   : > { %v5437_v58 = vsel %vm1371_vm6, %v1341_v19, %v1357_v32  ;;  %v5441_v56 = vsel %vm1452_vm7, %v1424_v20, %v1440_v49 }
 0x19f   : > { %6993 = vst [vmem:[#allocation13_spill] sm:$0xff] %v5437_v58  ;;  %6994 = vst [vmem:[#allocation14_spill] sm:$0xff] %v5441_v56  ;;  %v5810_v56 = vld [vmem:[%s4621_s8 + $0x120] sm:$0xff] }
 0x1a0   : > { %7042 = vst [vmem:[#allocation62_spill] sm:$0xff] %v5810_v56 }
 0x1a2   : > { %v4178_v59 = vpop.f32.mrb[16].mxu0 }
 0x1a3   : > { %v1358_v13 = vrot.slane %v4178_v59, 1  ;;  %v1441_v21 = vrot.slane %v4178_v59, 2  ;;  %v5443_v23 = vpop.f32.mrb[17].mxu0 }
 0x1a4   : > { %6995 = vst [vmem:[#allocation15_spill] sm:$0xff] %v5443_v23  ;;  %v1342_v14 = vrot.slane %v5443_v23, 1  ;;  %v1425_v57 = vrot.slane %v5443_v23, 2 }
 0x1a6   : > { %v5451_v35 = vsel %vm1452_vm7, %v1409_v24, %v1425_v57  ;;  %v5455_v55 = vsel %vm1371_vm6, %v1326_v42, %v1342_v14  ;;  %v5459_v61 = vsel %vm1371_vm6, %v1342_v14, %v1358_v13  ;;  %v5463_v62 = vsel %vm1452_vm7, %v1425_v57, %v1441_v21 }
 0x1a7   : > { %6996 = vst [vmem:[#allocation16_spill] sm:$0xff] %v5455_v55  ;;  %6997 = vst [vmem:[#allocation17_spill] sm:$0xff] %v5459_v61 }
 0x1a8   : > { %6998 = vst [vmem:[#allocation18_spill] sm:$0xff] %v5463_v62 }
 0x1a9   : > { %v5465_v63 = vpop.f32.mrb[18].mxu0 }
 0x1aa   : > { %6999 = vst [vmem:[#allocation19_spill] sm:$0xff] %v5465_v63  ;;  %v1343_v8 = vrot.slane %v5465_v63, 1  ;;  %v1426_v18 = vrot.slane %v5465_v63, 2  ;;  %v5469_v17 = vpop.f32.mrb[19].mxu0 }
 0x1ab   : > { %7000 = vst [vmem:[#allocation20_spill] sm:$0xff] %v5469_v17  ;;  %v1327_v29 = vrot.slane %v5469_v17, 1  ;;  %v1410_v28 = vrot.slane %v5469_v17, 2 }
 0x1ad   : > { %v5475_v15 = vsel %vm1452_vm7, %v1410_v28, %v1426_v18  ;;  %v5479_v41 = vsel %vm1371_vm6, %v1327_v29, %v1343_v8 }
 0x1ae   : > { %7001 = vst [vmem:[#allocation21_spill] sm:$0xff] %v5479_v41 }
 0x1b1   : > { %v5481_v30 = vpop.f32.mrb[20].mxu0 }
 0x1b2   : > { %7002 = vst [vmem:[#allocation22_spill] sm:$0xff] %v5481_v30  ;;  %v1182_v53 = vpop.f32.mrb[21].mxu0  ;;  %v1328_v49 = vrot.slane %v5481_v30, 1  ;;  %v1411_v59 = vrot.slane %v5481_v30, 2 }
 0x1b3   : > { %v1359_v54 = vrot.slane %v1182_v53, 1  ;;  %v1442_v0 = vrot.slane %v1182_v53, 2 }
 0x1b5   : > { %v5485_v19 = vsel %vm1371_vm6, %v1343_v8, %v1359_v54  ;;  %v5489_v20 = vsel %vm1452_vm7, %v1426_v18, %v1442_v0 }
 0x1b6   : > { %7003 = vst [vmem:[#allocation23_spill] sm:$0xff] %v5485_v19  ;;  %7004 = vst [vmem:[#allocation24_spill] sm:$0xff] %v5489_v20 }
 0x1b9   : > { %v4187_v45 = vpop.f32.mrb[22].mxu0 }
 0x1ba   : > { %v1360_v47 = vrot.slane %v4187_v45, 1  ;;  %v1443_v46 = vrot.slane %v4187_v45, 2  ;;  %v5491_v32 = vpop.f32.mrb[23].mxu0 }
 0x1bb   : > { %7005 = vst [vmem:[#allocation25_spill] sm:$0xff] %v5491_v32  ;;  %v1344_v13 = vrot.slane %v5491_v32, 1  ;;  %v1427_v21 = vrot.slane %v5491_v32, 2 }
 0x1bd   : > { %v5499_v24 = vsel %vm1452_vm7, %v1411_v59, %v1427_v21  ;;  %v5503_v14 = vsel %vm1371_vm6, %v1328_v49, %v1344_v13  ;;  %v5507_v57 = vsel %vm1371_vm6, %v1344_v13, %v1360_v47  ;;  %v5511_v42 = vsel %vm1452_vm7, %v1427_v21, %v1443_v46 }
 0x1be   : > { %7006 = vst [vmem:[#allocation26_spill] sm:$0xff] %v5503_v14  ;;  %7007 = vst [vmem:[#allocation27_spill] sm:$0xff] %v5507_v57 }
 0x1bf   : > { %7008 = vst [vmem:[#allocation28_spill] sm:$0xff] %v5511_v42  ;;  %v5733_v42 = vld [vmem:[%s4621_s8 + $0xe0] sm:$0xff] }
 0x1c0   : > { %7035 = vst [vmem:[#allocation55_spill] sm:$0xff] %v5733_v42  ;;  %v2248_v57 = vrot.slane %v5733_v42, 2 }
 0x1c1   : > { %v5513_v8 = vpop.f32.mrb[24].mxu0 }
 0x1c2   : > { %7009 = vst [vmem:[#allocation29_spill] sm:$0xff] %v5513_v8  ;;  %v1345_v18 = vrot.slane %v5513_v8, 1  ;;  %v1428_v29 = vrot.slane %v5513_v8, 2  ;;  %v5517_v28 = vpop.f32.mrb[25].mxu0 }
 0x1c3   : > { %7010 = vst [vmem:[#allocation30_spill] sm:$0xff] %v5517_v28  ;;  %v1329_v53 = vrot.slane %v5517_v28, 1  ;;  %v1412_v54 = vrot.slane %v5517_v28, 2 }
 0x1c5   : > { %v5523_v0 = vsel %vm1452_vm7, %v1412_v54, %v1428_v29  ;;  %v5527_v45 = vsel %vm1371_vm6, %v1329_v53, %v1345_v18 }
 0x1c6   : > { %7011 = vst [vmem:[#allocation31_spill] sm:$0xff] %v5527_v45 }
 0x1c9   : > { %v5529_v47 = vpop.f32.mrb[26].mxu0 }
 0x1ca   : > { %7012 = vst [vmem:[#allocation32_spill] sm:$0xff] %v5529_v47  ;;  %v1212_v46 = vpop.f32.mrb[27].mxu0  ;;  %v1330_v53 = vrot.slane %v5529_v47, 1  ;;  %v1413_v30 = vrot.slane %v5529_v47, 2 }
 0x1cb   : > { %v1361_v49 = vrot.slane %v1212_v46, 1  ;;  %v1444_v59 = vrot.slane %v1212_v46, 2 }
 0x1cd   : > { %v5533_v13 = vsel %vm1371_vm6, %v1345_v18, %v1361_v49  ;;  %v5537_v21 = vsel %vm1452_vm7, %v1428_v29, %v1444_v59 }
 0x1ce   : > { %7013 = vst [vmem:[#allocation33_spill] sm:$0xff] %v5533_v13  ;;  %7014 = vst [vmem:[#allocation34_spill] sm:$0xff] %v5537_v21  ;;  %v5729_v13 = vld [vmem:[%s4621_s8 + $0xd8] sm:$0xff] }
 0x1cf   : > { %7034 = vst [vmem:[#allocation54_spill] sm:$0xff] %v5729_v13  ;;  %v2140_v45 = vrot.slane %v5729_v13, 1 }
 0x1d1   : > { %v4196_v8 = vpop.f32.mrb[28].mxu0 }
 0x1d2   : > { %v1362_v54 = vrot.slane %v4196_v8, 1  ;;  %v1445_v28 = vrot.slane %v4196_v8, 2  ;;  %v5539_v32 = vpop.f32.mrb[29].mxu0 }
 0x1d3   : > { %7015 = vst [vmem:[#allocation35_spill] sm:$0xff] %v5539_v32  ;;  %v1346_v63 = vrot.slane %v5539_v32, 1  ;;  %v1429_v46 = vrot.slane %v5539_v32, 2 }
 0x1d5   : > { %v5547_v18 = vsel %vm1452_vm7, %v1413_v30, %v1429_v46  ;;  %v5551_v29 = vsel %vm1371_vm6, %v1330_v53, %v1346_v63  ;;  %v5555_v8 = vsel %vm1371_vm6, %v1346_v63, %v1362_v54  ;;  %v5559_v49 = vsel %vm1452_vm7, %v1429_v46, %v1445_v28 }
 0x1d6   : > { %7016 = vst [vmem:[#allocation36_spill] sm:$0xff] %v5551_v29  ;;  %7017 = vst [vmem:[#allocation37_spill] sm:$0xff] %v5555_v8 }
 0x1d7   : > { %7018 = vst [vmem:[#allocation38_spill] sm:$0xff] %v5559_v49 }
 0x1d9   : > { %v5561_v59 = vpop.f32.mrb[30].mxu0 }
 0x1da   : > { %7019 = vst [vmem:[#allocation39_spill] sm:$0xff] %v5561_v59  ;;  %v1347_v32 = vrot.slane %v5561_v59, 1  ;;  %v1430_v47 = vrot.slane %v5561_v59, 2  ;;  %v5565_v30 = vpop.f32.mrb[31].mxu0 }
 0x1db   : > { %7020 = vst [vmem:[#allocation40_spill] sm:$0xff] %v5565_v30  ;;  %v1331_v17 = vrot.slane %v5565_v30, 1  ;;  %v1414_v53 = vrot.slane %v5565_v30, 2 }
 0x1dd   : > { %v5571_v63 = vsel %vm1452_vm7, %v1414_v53, %v1430_v47  ;;  %v5575_v28 = vsel %vm1371_vm6, %v1331_v17, %v1347_v32 }
 0x1de   : > { %7021 = vst [vmem:[#allocation41_spill] sm:$0xff] %v5575_v28 }
 0x1e1   : > { %v5577_v54 = vpop.f32.mrb[32].mxu0 }
 0x1e2   : > { %7022 = vst [vmem:[#allocation42_spill] sm:$0xff] %v5577_v54  ;;  %v1242_v46 = vpop.f32.mrb[33].mxu0  ;;  %v1332_v17 = vrot.slane %v5577_v54, 1  ;;  %v1415_v40 = vrot.slane %v5577_v54, 2 }
 0x1e3   : > { %v1363_v23 = vrot.slane %v1242_v46, 1  ;;  %v1446_v2 = vrot.slane %v1242_v46, 2 }
 0x1e5   : > { %v5581_v59 = vsel %vm1371_vm6, %v1347_v32, %v1363_v23  ;;  %v5585_v30 = vsel %vm1452_vm7, %v1430_v47, %v1446_v2 }
 0x1e6   : > { %7023 = vst [vmem:[#allocation43_spill] sm:$0xff] %v5581_v59  ;;  %7024 = vst [vmem:[#allocation44_spill] sm:$0xff] %v5585_v30 }
 0x1e9   : > { %v4205_v4 = vpop.f32.mrb[34].mxu0 }
 0x1ea   : > { %v1364_v53 = vrot.slane %v4205_v4, 1  ;;  %v1447_v22 = vrot.slane %v4205_v4, 2  ;;  %v5587_v7 = vpop.f32.mrb[35].mxu0 }
 0x1eb   : > { %7025 = vst [vmem:[#allocation45_spill] sm:$0xff] %v5587_v7  ;;  %v1348_v50 = vrot.slane %v5587_v7, 1  ;;  %v1431_v46 = vrot.slane %v5587_v7, 2 }
 0x1ed   : > { %v5595_v23 = vsel %vm1452_vm7, %v1415_v40, %v1431_v46  ;;  %v5599_v2 = vsel %vm1371_vm6, %v1332_v17, %v1348_v50  ;;  %v5603_v4 = vsel %vm1371_vm6, %v1348_v50, %v1364_v53  ;;  %v5607_v32 = vsel %vm1452_vm7, %v1431_v46, %v1447_v22  ;;  %v1805_v46 = vld [vmem:[%s6934_s3] sm:$0xff] }
 0x1ee   : > { %7026 = vst [vmem:[#allocation46_spill] sm:$0xff] %v5599_v2  ;;  %7027 = vst [vmem:[#allocation47_spill] sm:$0xff] %v5603_v4 }
 0x1ef   : > { %7028 = vst [vmem:[#allocation48_spill] sm:$0xff] %v5607_v32 }
 0x1f1   : > { %v5609_v47 = vpop.f32.mrb[36].mxu0 }
 0x1f2   : > { %7029 = vst [vmem:[#allocation49_spill] sm:$0xff] %v5609_v47  ;;  %v1349_v7 = vrot.slane %v5609_v47, 1  ;;  %v1432_v54 = vrot.slane %v5609_v47, 2  ;;  %v5613_v40 = vpop.f32.mrb[37].mxu0  ;;  %v1806_v47 = vld [vmem:[%s6934_s3 + $0x8] sm:$0xf] }
 0x1f3   : > { %7030 = vst [vmem:[#allocation50_spill] sm:$0xff] %v5613_v40  ;;  %v1333_v16 = vrot.slane %v5613_v40, 1  ;;  %v1416_v17 = vrot.slane %v5613_v40, 2  ;;  %v4392_v40 = vpack.c.bf16 %v1806_v47, %v1805_v46 }
 0x1f5   : > { %v5619_v50 = vsel %vm1452_vm7, %v1416_v17, %v1432_v54  ;;  %v5623_v22 = vsel %vm1371_vm6, %v1333_v16, %v1349_v7  ;;  %4410 = vmatprep.subr.msk.bf16.mxu1 %vm4607_vm2, %v4392_v40  ;;  %4394 = vmatprep.subr.msk.bf16.mxu0 %vm4607_vm2, %v4392_v40 }
 0x1f6   : > { %7031 = vst [vmem:[#allocation51_spill] sm:$0xff] %v5623_v22  ;;  %4411 = vmatpush3.bf16.msk.msra.mxu1 %vm4607_vm2, %v4392_v40  ;;  %4397 = vmatpush3.bf16.msk.msra.mxu0 %vm4607_vm2, %v4392_v40 }
 0x1f9   : > { %v5625_v53 = vpop.f32.mrb[38].mxu0 }
 0x1fa   : > { %v1272_v32 = vpop.f32.mrb[39].mxu0  ;;  %v1334_v2 = vrot.slane %v5625_v53, 1  ;;  %v1417_v30 = vrot.slane %v5625_v53, 2 }
 0x1fb   : > { %v1365_v4 = vrot.slane %v1272_v32, 1  ;;  %v1448_v44 = vrot.slane %v1272_v32, 2 }
 0x1fd   : > { %v5643_v16 = vsel %vm1371_vm6, %v1349_v7, %v1365_v4  ;;  %v5647_v47 = vsel %vm1452_vm7, %v1432_v54, %v1448_v44 }
 0x1fe   : > { %7032 = vst [vmem:[#allocation52_spill] sm:$0xff] %v5643_v16  ;;  %7033 = vst [vmem:[#allocation53_spill] sm:$0xff] %v5647_v47 }
 0x201   : > { %v4214_v32 = vpop.f32.mrb[40].mxu0 }
 0x202   : > { %v1366_v17 = vrot.slane %v4214_v32, 1  ;;  %v1449_v46 = vrot.slane %v4214_v32, 2  ;;  %v5649_v22 = vpop.f32.mrb[41].mxu0 }
 0x203   : > { %v1350_v39 = vrot.slane %v5649_v22, 1  ;;  %v1433_v40 = vrot.slane %v5649_v22, 2 }
 0x205   : > { %v1401_v7 = vsel %vm1371_vm6, %v1334_v2, %v1350_v39  ;;  %v1385_v44 = vsel %vm1371_vm6, %v1350_v39, %v1366_v17  ;;  %v1482_v54 = vsel %vm1452_vm7, %v1417_v30, %v1433_v40  ;;  %v1466_v4 = vsel %vm1452_vm7, %v1433_v40, %v1449_v46  ;;  %v5675_v17 = vpop.permute.xlu1 %2349  ;;  %v5677_v46 = vpop.permute.xlu0 %2347 }
 0x206   : > { %1569 = vrot.lane.b32.xlu0 %v1401_v7, %s4545_s10  ;;  %1571 = vrot.lane.b32.xlu1 %v1385_v44, %s4545_s10  ;;  %v2671_v44 = vld [vmem:[%s6935_s4] sm:$0xff] }
 0x209   : > { %v5665_v32 = vpop.f32.mrb[42].mxu0  ;;  %v5694_v27 = vpop.permute.xlu1 %2493 }
 0x20a   : > { %v1351_v47 = vrot.slane %v5665_v32, 1  ;;  %v1434_v16 = vrot.slane %v5665_v32, 2  ;;  %1697 = vrot.lane.b32.xlu0 %v1482_v54, %s4544_s9  ;;  %1699 = vrot.lane.b32.xlu1 %v1466_v4, %s4544_s9  ;;  %v5671_v39 = vpop.f32.mrb[43].mxu0  ;;  %v2672_v54 = vld [vmem:[%s6935_s4 + $0x8] sm:$0xf] }
 0x20b   : > { %v1335_v30 = vrot.slane %v5671_v39, 1  ;;  %v1418_v2 = vrot.slane %v5671_v39, 2  ;;  %v5690_v4 = vpack.c.bf16 %v2672_v54, %v2671_v44 }
 0x20d   : > { %v1402_v40 = vsel %vm1371_vm6, %v1335_v30, %v1351_v47  ;;  %v1483_v7 = vsel %vm1452_vm7, %v1418_v2, %v1434_v16  ;;  %4400 = vmatprep.subr.msk.bf16.mxu1 %vm4607_vm2, %v5690_v4  ;;  %v5700_v2 = vpop.permute.xlu0 %2491  ;;  %v5707_v54 = vpop.permute.xlu1 %2353 }
 0x20e   : > { %1573 = vrot.lane.b32.xlu0 %v1402_v40, %s4545_s10 }
 0x211   : > { %v5692_v59 = vpop.f32.mrb[44].mxu0  ;;  %v5709_v51 = vpop.permute.xlu0 %2351 }
 0x212   : > { %1701 = vrot.lane.b32.xlu0 %v1483_v7, %s4544_s9  ;;  %v1302_v30 = vpop.f32.mrb[45].mxu0 }
 0x213   : > { %v1367_v40 = vrot.slane %v1302_v30, 1  ;;  %v1450_v28 = vrot.slane %v1302_v30, 2 }
 0x215   : > { %v1386_v49 = vsel %vm1371_vm6, %v1351_v47, %v1367_v40  ;;  %v1467_v44 = vsel %vm1452_vm7, %v1434_v16, %v1450_v28  ;;  %v1336_v47 = vrot.slane %v5692_v59, 1  ;;  %v1419_v28 = vrot.slane %v5692_v59, 2 }
 0x216   : > { %1575 = vrot.lane.b32.xlu1 %v1386_v49, %s4545_s10 }
 0x219   : > { %v4223_v8 = vpop.f32.mrb[46].mxu0 }
 0x21a   : > { %v1368_v7 = vrot.slane %v4223_v8, 1  ;;  %v1451_v29 = vrot.slane %v4223_v8, 2  ;;  %1703 = vrot.lane.b32.xlu1 %v1467_v44, %s4544_s9  ;;  %v5712_v30 = vpop.f32.mrb[47].mxu0 }
 0x21b   : > { %v1352_v49 = vrot.slane %v5712_v30, 1  ;;  %v1435_v16 = vrot.slane %v5712_v30, 2 }
 0x21d   : > { %v1403_v40 = vsel %vm1371_vm6, %v1336_v47, %v1352_v49  ;;  %v1387_v21 = vsel %vm1371_vm6, %v1352_v49, %v1368_v7  ;;  %v1484_v8 = vsel %vm1452_vm7, %v1419_v28, %v1435_v16  ;;  %v1468_v44 = vsel %vm1452_vm7, %v1435_v16, %v1451_v29  ;;  %v5736_v7 = vpop.permute.xlu1 %2497  ;;  %v5738_v49 = vpop.permute.xlu0 %2495  ;;  %v4476_v28 = vld [vmem:[%s4621_s8 + $0xe8] sm:$0xff] }
 0x21e   : > { %1577 = vrot.lane.b32.xlu0 %v1403_v40, %s4545_s10  ;;  %1579 = vrot.lane.b32.xlu1 %v1387_v21, %s4545_s10  ;;  %v2158_v47 = vrot.slane %v5733_v42, 1  ;;  %v2176_v29 = vrot.slane %v4476_v28, 1  ;;  %v2230_v40 = vrot.slane %v5729_v13, 2  ;;  %v2266_v14 = vrot.slane %v4476_v28, 2  ;;  %v4479_v42 = vld [vmem:[%s4621_s8 + $0x100] sm:$0xff] }
 0x21f   : > { %v2267_v62 = vrot.slane %v4479_v42, 2 }
 0x220   : > { %v2212_v21 = vsel %vm1371_vm6, %v2140_v45, %v2158_v47  ;;  %v2194_v16 = vsel %vm1371_vm6, %v2158_v47, %v2176_v29  ;;  %v2302_v28 = vsel %vm1452_vm7, %v2230_v40, %v2248_v57  ;;  %v2284_v29 = vsel %vm1452_vm7, %v2248_v57, %v2266_v14 }
 0x221   : > { %v5749_v20 = vpop.permute.xlu1 %2357  ;;  %v5751_v19 = vpop.permute.xlu0 %2355 }
 0x222   : > { %1705 = vrot.lane.b32.xlu0 %v1484_v8, %s4544_s9  ;;  %1707 = vrot.lane.b32.xlu1 %v1468_v44, %s4544_s9  ;;  %v5756_v8 = vld [vmem:[%s4621_s8 + $0xf0] sm:$0xff]  ;;  %v5760_v44 = vld [vmem:[%s4621_s8 + $0xf8] sm:$0xff] }
 0x223   : > { %7036 = vst [vmem:[#allocation56_spill] sm:$0xff] %v5756_v8  ;;  %v2141_v45 = vrot.slane %v5756_v8, 1  ;;  %7037 = vst [vmem:[#allocation57_spill] sm:$0xff] %v5760_v44  ;;  %v2159_v47 = vrot.slane %v5760_v44, 1  ;;  %v2231_v14 = vrot.slane %v5756_v8, 2  ;;  %v2249_v57 = vrot.slane %v5760_v44, 2 }
 0x225   : > { %v5772_v41 = vpop.permute.xlu1 %2501  ;;  %v5774_v13 = vpop.permute.xlu0 %2499 }
 0x226   : > { %2383 = vrot.lane.b32.xlu0 %v2212_v21, %s4545_s10  ;;  %2385 = vrot.lane.b32.xlu1 %v2194_v16, %s4545_s10  ;;  %v2177_v21 = vrot.slane %v4479_v42, 1  ;;  %v2213_v16 = vsel %vm1371_vm6, %v2141_v45, %v2159_v47  ;;  %7038 = vst [vmem:[#allocation58_spill] sm:$0xff] %v5772_v41  ;;  %v4482_v42 = vld [vmem:[%s4621_s8 + $0x118] sm:$0xff] }
 0x227   : > { %v2268_v55 = vrot.slane %v4482_v42, 2 }
 0x228   : > { %v2195_v40 = vsel %vm1371_vm6, %v2159_v47, %v2177_v21  ;;  %v2303_v47 = vsel %vm1452_vm7, %v2231_v14, %v2249_v57  ;;  %v2285_v21 = vsel %vm1452_vm7, %v2249_v57, %v2267_v62 }
 0x229   : > { %v5795_v44 = vpop.permute.xlu1 %2361 }
 0x22a   : > { %2527 = vrot.lane.b32.xlu0 %v2302_v28, %s4544_s9  ;;  %2529 = vrot.lane.b32.xlu1 %v2284_v29, %s4544_s9  ;;  %v5783_v28 = vld [vmem:[%s4621_s8 + $0x108] sm:$0xff]  ;;  %v5787_v29 = vld [vmem:[%s4621_s8 + $0x110] sm:$0xff]  ;;  %7041 = vst [vmem:[#allocation61_spill] sm:$0xff] %v5795_v44 }
 0x22b   : > { %7039 = vst [vmem:[#allocation59_spill] sm:$0xff] %v5783_v28  ;;  %v2142_v45 = vrot.slane %v5783_v28, 1  ;;  %7040 = vst [vmem:[#allocation60_spill] sm:$0xff] %v5787_v29  ;;  %v2160_v61 = vrot.slane %v5787_v29, 1  ;;  %v2232_v62 = vrot.slane %v5783_v28, 2  ;;  %v2250_v57 = vrot.slane %v5787_v29, 2 }
 0x22c   : > { %v4495_v44 = vld [vmem:[%s4992_s14 + $0x10] sm:$0xff] }
 0x22d   : > { %v2214_v8 = vsel %vm1371_vm6, %v2142_v45, %v2160_v61  ;;  %v5817_v58 = vpop.permute.xlu1 %2505 }
 0x22e   : > { %2387 = vrot.lane.b32.xlu0 %v2213_v16, %s4545_s10  ;;  %2389 = vrot.lane.b32.xlu1 %v2195_v40, %s4545_s10  ;;  %v2178_v16 = vrot.slane %v4482_v42, 1  ;;  %v5797_v40 = vpop.permute.xlu0 %2359  ;;  %7044 = vst [vmem:[#allocation64_spill] sm:$0xff] %v5817_v58  ;;  %v2304_v42 = vsel %vm1452_vm7, %v2232_v62, %v2250_v57  ;;  %v2233_v58 = vrot.slane %v5810_v56, 2 }
 0x230   : > { %v2196_v14 = vsel %vm1371_vm6, %v2160_v61, %v2178_v16  ;;  %v4485_v16 = vld [vmem:[%s4621_s8 + $0x130] sm:$0xff] }
 0x232   : > { %2531 = vrot.lane.b32.xlu0 %v2303_v47, %s4544_s9  ;;  %2533 = vrot.lane.b32.xlu1 %v2285_v21, %s4544_s9  ;;  %v2143_v47 = vrot.slane %v5810_v56, 1  ;;  %v5814_v21 = vld [vmem:[%s4621_s8 + $0x128] sm:$0xff]  ;;  %v5819_v61 = vpop.permute.xlu0 %2503 }
 0x233   : > { %7043 = vst [vmem:[#allocation63_spill] sm:$0xff] %v5814_v21  ;;  %v2161_v45 = vrot.slane %v5814_v21, 1  ;;  %7045 = vst [vmem:[#allocation65_spill] sm:$0xff] %v5819_v61  ;;  %v2251_v62 = vrot.slane %v5814_v21, 2  ;;  %v2269_v61 = vrot.slane %v4485_v16, 2  ;;  %v4488_v21 = vld [vmem:[%s4621_s8 + $0x148] sm:$0xff] }
 0x235   : > { %v2215_v29 = vsel %vm1371_vm6, %v2143_v47, %v2161_v45 }
 0x236   : > { %2391 = vrot.lane.b32.xlu0 %v2214_v8, %s4545_s10  ;;  %2393 = vrot.lane.b32.xlu1 %v2196_v14, %s4545_s10  ;;  %v2286_v8 = vsel %vm1452_vm7, %v2250_v57, %v2268_v55  ;;  %v2179_v14 = vrot.slane %v4485_v16, 1  ;;  %v5834_v55 = vpop.permute.xlu1 %2365  ;;  %v5836_v57 = vpop.permute.xlu0 %2363  ;;  %v2305_v16 = vsel %vm1452_vm7, %v2233_v58, %v2251_v62 }
 0x237   : > { %7046 = vst [vmem:[#allocation66_spill] sm:$0xff] %v5834_v55  ;;  %7047 = vst [vmem:[#allocation67_spill] sm:$0xff] %v5836_v57  ;;  %v2270_v57 = vrot.slane %v4488_v21, 2 }
 0x238   : > { %v2197_v28 = vsel %vm1371_vm6, %v2161_v45, %v2179_v14  ;;  %v2287_v14 = vsel %vm1452_vm7, %v2251_v62, %v2269_v61 }
 0x23a   : > { %2535 = vrot.lane.b32.xlu0 %v2304_v42, %s4544_s9  ;;  %2537 = vrot.lane.b32.xlu1 %v2286_v8, %s4544_s9  ;;  %v5841_v42 = vld [vmem:[%s4621_s8 + $0x138] sm:$0xff]  ;;  %v5845_v8 = vld [vmem:[%s4621_s8 + $0x140] sm:$0xff]  ;;  %v5857_v56 = vpop.permute.xlu1 %2509  ;;  %v5859_v55 = vpop.permute.xlu0 %2507 }
 0x23b   : > { %7048 = vst [vmem:[#allocation68_spill] sm:$0xff] %v5841_v42  ;;  %v2144_v47 = vrot.slane %v5841_v42, 1  ;;  %7049 = vst [vmem:[#allocation69_spill] sm:$0xff] %v5845_v8  ;;  %v2162_v45 = vrot.slane %v5845_v8, 1  ;;  %v2234_v61 = vrot.slane %v5841_v42, 2  ;;  %v2252_v62 = vrot.slane %v5845_v8, 2 }
 0x23c   : > { %7050 = vst [vmem:[#allocation70_spill] sm:$0xff] %v5857_v56  ;;  %7051 = vst [vmem:[#allocation71_spill] sm:$0xff] %v5859_v55 }
 0x23e   : > { %2395 = vrot.lane.b32.xlu0 %v2215_v29, %s4545_s10  ;;  %2397 = vrot.lane.b32.xlu1 %v2197_v28, %s4545_s10  ;;  %v2180_v29 = vrot.slane %v4488_v21, 1  ;;  %v2216_v28 = vsel %vm1371_vm6, %v2144_v47, %v2162_v45  ;;  %v4491_v21 = vld [vmem:[%s4621_s8 + $0x160] sm:$0xff]  ;;  %v5880_v8 = vpop.permute.xlu1 %2369 }
 0x23f   : > { %7054 = vst [vmem:[#allocation74_spill] sm:$0xff] %v5880_v8  ;;  %v2271_v55 = vrot.slane %v4491_v21, 2  ;;  %v5895_v8 = vld [vmem:[%s4621_s8 + $0x168] sm:$0xff] }
 0x240   : > { %v2198_v58 = vsel %vm1371_vm6, %v2162_v45, %v2180_v29  ;;  %v2306_v45 = vsel %vm1452_vm7, %v2234_v61, %v2252_v62  ;;  %v2288_v29 = vsel %vm1452_vm7, %v2252_v62, %v2270_v57  ;;  %7056 = vst [vmem:[#allocation76_spill] sm:$0xff] %v5895_v8 }
 0x242   : > { %2539 = vrot.lane.b32.xlu0 %v2305_v16, %s4544_s9  ;;  %2541 = vrot.lane.b32.xlu1 %v2287_v14, %s4544_s9  ;;  %v5868_v16 = vld [vmem:[%s4621_s8 + $0x150] sm:$0xff]  ;;  %v5872_v14 = vld [vmem:[%s4621_s8 + $0x158] sm:$0xff] }
 0x243   : > { %7052 = vst [vmem:[#allocation72_spill] sm:$0xff] %v5868_v16  ;;  %v2145_v47 = vrot.slane %v5868_v16, 1  ;;  %7053 = vst [vmem:[#allocation73_spill] sm:$0xff] %v5872_v14  ;;  %v2163_v56 = vrot.slane %v5872_v14, 1  ;;  %v2235_v57 = vrot.slane %v5868_v16, 2  ;;  %v2253_v62 = vrot.slane %v5872_v14, 2 }
 0x245   : > { %v2217_v42 = vsel %vm1371_vm6, %v2145_v47, %v2163_v56 }
 0x246   : > { %2399 = vrot.lane.b32.xlu0 %v2216_v28, %s4545_s10  ;;  %2401 = vrot.lane.b32.xlu1 %v2198_v58, %s4545_s10  ;;  %v2181_v28 = vrot.slane %v4491_v21, 1  ;;  %v5882_v58 = vpop.permute.xlu0 %2367  ;;  %v2307_v21 = vsel %vm1452_vm7, %v2235_v57, %v2253_v62 }
 0x247   : > { %7055 = vst [vmem:[#allocation75_spill] sm:$0xff] %v5882_v58  ;;  %v5902_v58 = vpop.permute.xlu1 %2513 }
 0x248   : > { %v2199_v61 = vsel %vm1371_vm6, %v2163_v56, %v2181_v28  ;;  %7058 = vst [vmem:[#allocation78_spill] sm:$0xff] %v5902_v58  ;;  %v4494_v28 = vld [vmem:[%s4621_s8 + $0x178] sm:$0xff]  ;;  %v2236_v58 = vrot.slane %v5895_v8, 2 }
 0x24a   : > { %2543 = vrot.lane.b32.xlu0 %v2306_v45, %s4544_s9  ;;  %2545 = vrot.lane.b32.xlu1 %v2288_v29, %s4544_s9  ;;  %v2146_v45 = vrot.slane %v5895_v8, 1  ;;  %v5899_v29 = vld [vmem:[%s4621_s8 + $0x170] sm:$0xff]  ;;  %v5904_v56 = vpop.permute.xlu0 %2511 }
 0x24b   : > { %7057 = vst [vmem:[#allocation77_spill] sm:$0xff] %v5899_v29  ;;  %v2164_v47 = vrot.slane %v5899_v29, 1  ;;  %7059 = vst [vmem:[#allocation79_spill] sm:$0xff] %v5904_v56  ;;  %v2254_v57 = vrot.slane %v5899_v29, 2  ;;  %v2272_v56 = vrot.slane %v4494_v28, 2 }
 0x24d   : > { %v2218_v14 = vsel %vm1371_vm6, %v2146_v45, %v2164_v47  ;;  %v2308_v45 = vsel %vm1452_vm7, %v2236_v58, %v2254_v57 }
 0x24e   : > { %2403 = vrot.lane.b32.xlu0 %v2217_v42, %s4545_s10  ;;  %2405 = vrot.lane.b32.xlu1 %v2199_v61, %s4545_s10  ;;  %v2289_v42 = vsel %vm1452_vm7, %v2253_v62, %v2271_v55  ;;  %v2182_v61 = vrot.slane %v4494_v28, 1  ;;  %v5919_v55 = vpop.permute.xlu1 %2373  ;;  %v5921_v62 = vpop.permute.xlu0 %2371 }
 0x24f   : > { %7060 = vst [vmem:[#allocation80_spill] sm:$0xff] %v5919_v55  ;;  %7061 = vst [vmem:[#allocation81_spill] sm:$0xff] %v5921_v62  ;;  %v5951_v62 = vld [vmem:[%s4992_s14 + $0x18] sm:$0xff] }
 0x250   : > { %v2200_v16 = vsel %vm1371_vm6, %v2164_v47, %v2182_v61  ;;  %v2290_v47 = vsel %vm1452_vm7, %v2254_v57, %v2272_v56  ;;  %v5935_v61 = vld [vmem:[%s4992_s14 + $0x8] sm:$0xff] }
 0x251   : > { %7063 = vst [vmem:[#allocation83_spill] sm:$0xff] %v5935_v61  ;;  %v2165_v29 = vrot.slane %v5935_v61, 1  ;;  %v2255_v55 = vrot.slane %v5935_v61, 2 }
 0x252   : > { %2547 = vrot.lane.b32.xlu0 %v2307_v21, %s4544_s9  ;;  %2549 = vrot.lane.b32.xlu1 %v2289_v42, %s4544_s9  ;;  %v2183_v21 = vrot.slane %v4495_v44, 1  ;;  %v5931_v42 = vld [vmem:[%s4992_s14] sm:$0xff]  ;;  %v5942_v58 = vpop.permute.xlu0 %2515 }
 0x253   : > { %7062 = vst [vmem:[#allocation82_spill] sm:$0xff] %v5931_v42  ;;  %v2147_v28 = vrot.slane %v5931_v42, 1  ;;  %7065 = vst [vmem:[#allocation85_spill] sm:$0xff] %v5942_v58  ;;  %v2237_v8 = vrot.slane %v5931_v42, 2 }
 0x254   : > { %v2201_v57 = vsel %vm1371_vm6, %v2165_v29, %v2183_v21 }
 0x255   : > { %v2219_v56 = vsel %vm1371_vm6, %v2147_v28, %v2165_v29  ;;  %v2309_v29 = vsel %vm1452_vm7, %v2237_v8, %v2255_v55 }
 0x256   : > { %2407 = vrot.lane.b32.xlu0 %v2218_v14, %s4545_s10  ;;  %2409 = vrot.lane.b32.xlu1 %v2200_v16, %s4545_s10  ;;  %v2273_v14 = vrot.slane %v4495_v44, 2  ;;  %v5940_v16 = vpop.permute.xlu1 %2517  ;;  %v2148_v44 = vrot.slane %v5951_v62, 1  ;;  %v5967_v42 = vpop.permute.xlu0 %2375 }
 0x257   : > { %7064 = vst [vmem:[#allocation84_spill] sm:$0xff] %v5940_v16  ;;  %v5958_v16 = vld [vmem:[%s4992_s14 + $0x20] sm:$0xff] }
 0x258   : > { %v2166_v28 = vrot.slane %v5958_v16, 1  ;;  %v2291_v21 = vsel %vm1452_vm7, %v2255_v55, %v2273_v14  ;;  %v2256_v58 = vrot.slane %v5958_v16, 2 }
 0x25a   : > { %2551 = vrot.lane.b32.xlu0 %v2308_v45, %s4544_s9  ;;  %2553 = vrot.lane.b32.xlu1 %v2290_v47, %s4544_s9  ;;  %v4499_v45 = vld [vmem:[%s4992_s14 + $0x28] sm:$0xff]  ;;  %v5965_v61 = vpop.permute.xlu1 %2377  ;;  %v2220_v41 = vsel %vm1371_vm6, %v2148_v44, %v2166_v28  ;;  %v5981_v14 = vpop.permute.xlu0 %2519 }
 0x25b   : > { %v2184_v47 = vrot.slane %v4499_v45, 1 }
 0x25d   : > { %v2202_v8 = vsel %vm1371_vm6, %v2166_v28, %v2184_v47 }
 0x25e   : > { %2411 = vrot.lane.b32.xlu0 %v2219_v56, %s4545_s10  ;;  %2413 = vrot.lane.b32.xlu1 %v2201_v57, %s4545_s10  ;;  %v2238_v56 = vrot.slane %v5951_v62, 2  ;;  %v2274_v57 = vrot.slane %v4499_v45, 2  ;;  %v5979_v55 = vpop.permute.xlu1 %2521  ;;  %v5991_v47 = vpop.permute.xlu0 %2379 }
 0x260   : > { %v2292_v45 = vsel %vm1452_vm7, %v2256_v58, %v2274_v57  ;;  %v4505_v57 = vld [vmem:[%s4621_s8 + $0x30] sm:$0xff] }
 0x262   : > { %2555 = vrot.lane.b32.xlu0 %v2309_v29, %s4544_s9  ;;  %2557 = vrot.lane.b32.xlu1 %v2291_v21, %s4544_s9  ;;  %v2310_v29 = vsel %vm1452_vm7, %v2238_v56, %v2256_v58  ;;  %v5989_v44 = vpop.permute.xlu1 %2381 }
 0x266   : > { %2415 = vrot.lane.b32.xlu0 %v2220_v41, %s4545_s10  ;;  %2417 = vrot.lane.b32.xlu1 %v2202_v8, %s4545_s10  ;;  %v6001_v37 = vpop.permute.xlu1 %2525  ;;  %v6003_v41 = vpop.permute.xlu0 %2523 }
 0x26a   : > { %2559 = vrot.lane.b32.xlu0 %v2310_v29, %s4544_s9  ;;  %2561 = vrot.lane.b32.xlu1 %v2292_v45, %s4544_s9  ;;  %v4507_v29 = vld [vmem:[%s4621_s8 + $0x48] sm:$0xff] }
 0x26e   : > { %1645 = vrot.lane.b32.xlu0 %v5264_v33, %s4544_s9  ;;  %1517 = vrot.lane.b32.xlu1 %v5268_v60, %s4545_s10 }
 0x272   : > { %1649 = vrot.lane.b32.xlu0 %v5326_v48, %s4544_s9  ;;  %1519 = vrot.lane.b32.xlu1 %v5294_v5, %s4545_s10 }
 0x276   : > { %1653 = vrot.lane.b32.xlu0 %v5368_v34, %s4544_s9  ;;  %1647 = vrot.lane.b32.xlu1 %v5298_v36, %s4544_s9 }
 0x278   : > { %v1570_v33 = vpop.permute.xlu0 %1569  ;;  %v1572_v58 = vpop.permute.xlu1 %1571 }
 0x279   : > { %v1767_v60 = vsel %vm767_vm3, %v5625_v53, %v1570_v33  ;;  %v1768_v5 = vsel %vm767_vm3, %v5649_v22, %v1572_v58  ;;  %v7067_v58 = vld [vmem:[#allocation61_spill] sm:$0xff] }
 0x27a   : > { %1657 = vrot.lane.b32.xlu0 %v5403_v38, %s4544_s9  ;;  %1521 = vrot.lane.b32.xlu1 %v5330_v12, %s4545_s10 }
 0x27c   : > { %v1698_v48 = vpop.permute.xlu0 %1697  ;;  %v1700_v28 = vpop.permute.xlu1 %1699 }
 0x27d   : > { %v1800_v34 = vsel %vm816_vm4, %v1768_v5, %v1700_v28  ;;  %v1799_v36 = vsel %vm816_vm4, %v1767_v60, %v1698_v48  ;;  %v7068_v60 = vld [vmem:[#allocation65_spill] sm:$0xff]  ;;  %v4509_v48 = vld [vmem:[%s4621_s8 + $0x60] sm:$0xff]  ;;  %v7070_v28 = vld [vmem:[#allocation67_spill] sm:$0xff] }
 0x27e   : > { %4267 = vmatprep.mubr.msk.f32.mxu1 %vm867_vm5, %v1799_v36  ;;  %1661 = vrot.lane.b32.xlu0 %v5427_v31, %s4544_s9 }
 0x27f   : > { %1523 = vrot.lane.b32.xlu1 %v5334_v11, %s4545_s10  ;;  %4268 = vmatmul.mubr.msk.f32.vlgmr.msra.gmra.mrb[0].mxu1 %vm867_vm5, %v1800_v34  ;;  %v2607_v34 = vsel %vm767_vm3, %v4509_v48, %v7070_v28  ;;  %v7086_v28 = vld [vmem:[#allocation18_spill] sm:$0xff] }
 0x280   : > { %v1574_v12 = vpop.permute.xlu0 %1573  ;;  %4403 = vmatpush3.bf16.msk.msra.mxu1 %vm4607_vm2, %v5690_v4 }
 0x281   : > { %v1769_v38 = vsel %vm767_vm3, %v5671_v39, %v1574_v12 }
 0x282   : > { %1665 = vrot.lane.b32.xlu0 %v5451_v35, %s4544_s9 }
 0x283   : > { %1651 = vrot.lane.b32.xlu1 %v5340_v9, %s4544_s9 }
 0x284   : > { %v1702_v31 = vpop.permute.xlu0 %1701 }
 0x285   : > { %v1801_v22 = vsel %vm816_vm4, %v1769_v38, %v1702_v31  ;;  %v7071_v38 = vld [vmem:[#allocation64_spill] sm:$0xff] }
 0x286   : > { %4270 = vmatprep.mubr.msk.f32.mxu1 %vm867_vm5, %v1801_v22  ;;  %1669 = vrot.lane.b32.xlu0 %v5475_v15, %s4544_s9  ;;  %v4510_v22 = vld [vmem:[%s4621_s8 + $0x68] sm:$0xff] }
 0x287   : > { %1525 = vrot.lane.b32.xlu1 %v5372_v52, %s4545_s10 }
 0x288   : > { %v1576_v11 = vpop.permute.xlu1 %1575 }
 0x289   : > { %v1770_v9 = vsel %vm767_vm3, %v5665_v32, %v1576_v11  ;;  %v7072_v11 = vld [vmem:[#allocation66_spill] sm:$0xff] }
 0x28a   : > { %1673 = vrot.lane.b32.xlu0 %v5499_v24, %s4544_s9 }
 0x28b   : > { %1527 = vrot.lane.b32.xlu1 %v5389_v25, %s4545_s10  ;;  %v4501_v25 = vld [vmem:[%s4621_s8] sm:$0xff] }
 0x28c   : > { %v1704_v35 = vpop.permute.xlu1 %1703  ;;  %v2599_v24 = vsel %vm767_vm3, %v4501_v25, %v5677_v46  ;;  %v7075_v25 = vld [vmem:[#allocation75_spill] sm:$0xff] }
 0x28d   : > { %v1802_v53 = vsel %vm816_vm4, %v1770_v9, %v1704_v35  ;;  %v2608_v9 = vsel %vm767_vm3, %v4510_v22, %v7072_v11  ;;  %v7073_v35 = vld [vmem:[#allocation71_spill] sm:$0xff] }
 0x28e   : > { %4271 = vmatmul.mubr.msk.f32.gmra.mrb[2].mxu1 %vm867_vm5, %v1802_v53  ;;  %1677 = vrot.lane.b32.xlu0 %v5523_v0, %s4544_s9  ;;  %v2643_v53 = vsel %vm816_vm4, %v2607_v34, %v7073_v35  ;;  %v4518_v11 = vld [vmem:[%s4621_s8 + $0xc8] sm:$0xff] }
 0x28f   : > { %1655 = vrot.lane.b32.xlu1 %v5393_v26, %s4544_s9 }
 0x290   : > { %v1578_v52 = vpop.permute.xlu0 %1577  ;;  %v1580_v15 = vpop.permute.xlu1 %1579 }
 0x291   : > { %v1771_v0 = vsel %vm767_vm3, %v5692_v59, %v1578_v52  ;;  %v1772_v32 = vsel %vm767_vm3, %v5712_v30, %v1580_v15  ;;  %v2635_v59 = vsel %vm816_vm4, %v2599_v24, %v5700_v2  ;;  %v4503_v30 = vld [vmem:[%s4621_s8 + $0x18] sm:$0xff]  ;;  %v7074_v52 = vld [vmem:[#allocation14_spill] sm:$0xff] }
 0x292   : > { %1681 = vrot.lane.b32.xlu0 %v5547_v18, %s4544_s9  ;;  %v2601_v21 = vsel %vm767_vm3, %v4503_v30, %v5709_v51  ;;  %v4511_v15 = vld [vmem:[%s4621_s8 + $0x78] sm:$0xff]  ;;  %v7079_v30 = vld [vmem:[#allocation16_spill] sm:$0xff] }
 0x293   : > { %1529 = vrot.lane.b32.xlu1 %v5407_v43, %s4545_s10  ;;  %v4502_v43 = vld [vmem:[%s4621_s8 + $0x8] sm:$0xff]  ;;  %v2637_v51 = vsel %vm816_vm4, %v2601_v21, %v5738_v49  ;;  %v2609_v24 = vsel %vm767_vm3, %v4511_v15, %v7075_v25  ;;  %v4513_v21 = vld [vmem:[%s4621_s8 + $0x90] sm:$0xff] }
 0x294   : > { %v1706_v26 = vpop.permute.xlu0 %1705  ;;  %v1708_v39 = vpop.permute.xlu1 %1707  ;;  %v2600_v46 = vsel %vm767_vm3, %v4502_v43, %v5675_v17 }
 0x295   : > { %v1803_v4 = vsel %vm816_vm4, %v1771_v0, %v1706_v26  ;;  %v1804_v18 = vsel %vm816_vm4, %v1772_v32, %v1708_v39  ;;  %v2636_v17 = vsel %vm816_vm4, %v2600_v46, %v5694_v27  ;;  %v2603_v27 = vsel %vm767_vm3, %v4505_v57, %v5751_v19  ;;  %v7076_v26 = vld [vmem:[#allocation70_spill] sm:$0xff]  ;;  %v7078_v46 = vld [vmem:[#allocation79_spill] sm:$0xff] }
 0x296   : > { %1685 = vrot.lane.b32.xlu0 %v5571_v63, %s4544_s9  ;;  %4273 = vmatprep.mubr.msk.f32.mxu1 %vm867_vm5, %v1803_v4  ;;  %v2639_v19 = vsel %vm816_vm4, %v2603_v27, %v5774_v13  ;;  %v4508_v13 = vld [vmem:[%s4621_s8 + $0x50] sm:$0xff]  ;;  %v2644_v39 = vsel %vm816_vm4, %v2608_v9, %v7076_v26  ;;  %v4512_v4 = vld [vmem:[%s4621_s8 + $0x80] sm:$0xff]  ;;  %v2616_v9 = vsel %vm767_vm3, %v4518_v11, %v5989_v44  ;;  %v7107_v11 = vld [vmem:[#allocation77_spill] sm:$0xff] }
 0x297   : > { %1531 = vrot.lane.b32.xlu1 %v5411_v6, %s4545_s10  ;;  %4274 = vmatmul.mubr.msk.f32.gmra.mrb[4].mxu1 %vm867_vm5, %v1804_v18  ;;  %v4504_v6 = vld [vmem:[%s4621_s8 + $0x20] sm:$0xff]  ;;  %v2652_v44 = vsel %vm816_vm4, %v2616_v9, %v6001_v37 }
 0x298   : > { %v6079_v63 = vpop.permute.xlu0 %2383  ;;  %4280 = vmatprep.mubr.msk.f32.mxu1 %vm867_vm5, %v2635_v59  ;;  %v6082_v56 = vpop.permute.xlu1 %2385  ;;  %v2602_v2 = vsel %vm767_vm3, %v4504_v6, %v5707_v54  ;;  %v7077_v18 = vld [vmem:[#allocation74_spill] sm:$0xff]  ;;  %v2645_v59 = vsel %vm816_vm4, %v2609_v24, %v7078_v46  ;;  %v7091_v24 = vld [vmem:[#allocation23_spill] sm:$0xff] }
 0x299   : > { %v2638_v54 = vsel %vm816_vm4, %v2602_v2, %v5736_v7  ;;  %v2605_v7 = vsel %vm767_vm3, %v4507_v29, %v5797_v40  ;;  %v7069_v40 = vld [vmem:[#allocation13_spill] sm:$0xff]  ;;  %v2610_v43 = vsel %vm767_vm3, %v4512_v4, %v7077_v18  ;;  %v7081_v57 = vld [vmem:[#allocation78_spill] sm:$0xff] }
 0x29a   : > { %1689 = vrot.lane.b32.xlu0 %v5595_v23, %s4544_s9  ;;  %v2641_v5 = vsel %vm816_vm4, %v2605_v7, %v7068_v60  ;;  %v2646_v27 = vsel %vm816_vm4, %v2610_v43, %v7081_v57  ;;  %v7084_v7 = vld [vmem:[#allocation17_spill] sm:$0xff]  ;;  %v7094_v43 = vld [vmem:[#allocation24_spill] sm:$0xff] }
 0x29b   : > { %1659 = vrot.lane.b32.xlu1 %v5415_v10, %s4544_s9  ;;  %4281 = vmatmul.mubr.msk.f32.vlgmr.msra.gmra.mrb[6].mxu1 %vm867_vm5, %v2636_v17  ;;  %v4506_v10 = vld [vmem:[%s4621_s8 + $0x38] sm:$0xff] }
 0x29c   : > { %v6099_v8 = vpop.permute.xlu0 %2527  ;;  %4283 = vmatprep.mubr.msk.f32.mxu1 %vm867_vm5, %v2637_v51  ;;  %v6102_v23 = vpop.permute.xlu1 %2529  ;;  %v2604_v49 = vsel %vm767_vm3, %v4506_v10, %v5749_v20  ;;  %v7066_v20 = vld [vmem:[#allocation58_spill] sm:$0xff]  ;;  %v7080_v17 = vld [vmem:[#allocation81_spill] sm:$0xff]  ;;  %v7082_v10 = vld [vmem:[#allocation80_spill] sm:$0xff] }
 0x29d   : > { %v2640_v33 = vsel %vm816_vm4, %v2604_v49, %v7066_v20  ;;  %v2611_v6 = vsel %vm767_vm3, %v4513_v21, %v7080_v17  ;;  %v4515_v20 = vld [vmem:[%s4621_s8 + $0xa8] sm:$0xff]  ;;  %v7096_v21 = vld [vmem:[#allocation62_spill] sm:$0xff] }
 0x29e   : > { %1693 = vrot.lane.b32.xlu0 %v5619_v50, %s4544_s9  ;;  %v7097_v17 = vld [vmem:[#allocation26_spill] sm:$0xff] }
 0x29f   : > { %1533 = vrot.lane.b32.xlu1 %v5431_v1, %s4545_s10  ;;  %4284 = vmatmul.mubr.msk.f32.gmra.mrb[8].mxu1 %vm867_vm5, %v2638_v54  ;;  %v2606_v1 = vsel %vm767_vm3, %v4508_v13, %v7067_v58  ;;  %v4514_v54 = vld [vmem:[%s4621_s8 + $0x98] sm:$0xff] }
 0x2a0   : > { %v6119_v45 = vpop.permute.xlu0 %2387  ;;  %4286 = vmatprep.mubr.msk.f32.mxu1 %vm867_vm5, %v2639_v19  ;;  %v6122_v50 = vpop.permute.xlu1 %2389  ;;  %v2642_v31 = vsel %vm816_vm4, %v2606_v1, %v7071_v38  ;;  %v2612_v49 = vsel %vm767_vm3, %v4514_v54, %v7082_v10  ;;  %v7083_v19 = vld [vmem:[#allocation85_spill] sm:$0xff]  ;;  %v7085_v1 = vld [vmem:[#allocation84_spill] sm:$0xff] }
 0x2a1   : > { %v2647_v29 = vsel %vm816_vm4, %v2611_v6, %v7083_v19  ;;  %v2648_v60 = vsel %vm816_vm4, %v2612_v49, %v7085_v1  ;;  %v7100_v49 = vld [vmem:[#allocation27_spill] sm:$0xff]  ;;  %v7103_v1 = vld [vmem:[#allocation28_spill] sm:$0xff] }
 0x2a3   : > { %1535 = vrot.lane.b32.xlu1 %v7069_v40, %s4545_s10  ;;  %4287 = vmatmul.mubr.msk.f32.gmra.mrb[10].mxu1 %vm867_vm5, %v2640_v33  ;;  %v2613_v33 = vsel %vm767_vm3, %v4515_v20, %v5967_v42  ;;  %v4517_v42 = vld [vmem:[%s4621_s8 + $0xc0] sm:$0xff] }
 0x2a4   : > { %v6137_v36 = vpop.permute.xlu0 %2531  ;;  %4289 = vmatprep.mubr.msk.f32.mxu1 %vm867_vm5, %v2641_v5  ;;  %v6140_v12 = vpop.permute.xlu1 %2533  ;;  %v4516_v5 = vld [vmem:[%s4621_s8 + $0xb0] sm:$0xff]  ;;  %v2649_v48 = vsel %vm816_vm4, %v2613_v33, %v5981_v14  ;;  %v2615_v34 = vsel %vm767_vm3, %v4517_v42, %v5991_v47  ;;  %v7088_v47 = vld [vmem:[#allocation21_spill] sm:$0xff] }
 0x2a5   : > { %v2614_v40 = vsel %vm767_vm3, %v4516_v5, %v5965_v61  ;;  %v7087_v61 = vld [vmem:[#allocation54_spill] sm:$0xff]  ;;  %v2651_v35 = vsel %vm816_vm4, %v2615_v34, %v6003_v41  ;;  %v7090_v41 = vld [vmem:[#allocation56_spill] sm:$0xff] }
 0x2a6   : > { %v2650_v22 = vsel %vm816_vm4, %v2614_v40, %v5979_v55  ;;  %v2617_v14 = vsel %vm767_vm3, %v7087_v61, %v6079_v63  ;;  %v2619_v25 = vsel %vm767_vm3, %v7090_v41, %v6119_v45  ;;  %v7093_v45 = vld [vmem:[#allocation59_spill] sm:$0xff]  ;;  %v7105_v34 = vld [vmem:[#allocation76_spill] sm:$0xff] }
 0x2a7   : > { %1663 = vrot.lane.b32.xlu1 %v7074_v52, %s4544_s9  ;;  %4290 = vmatmul.mubr.msk.f32.gmra.mrb[12].mxu1 %vm867_vm5, %v2642_v31  ;;  %v7089_v52 = vld [vmem:[#allocation55_spill] sm:$0xff]  ;;  %v2653_v15 = vsel %vm816_vm4, %v2617_v14, %v6099_v8  ;;  %v7092_v8 = vld [vmem:[#allocation57_spill] sm:$0xff]  ;;  %v2655_v4 = vsel %vm816_vm4, %v2619_v25, %v6137_v36 }
 0x2a8   : > { %v2392_v0 = vpop.permute.xlu0 %2391  ;;  %4292 = vmatprep.mubr.msk.f32.mxu1 %vm867_vm5, %v2643_v53  ;;  %v6156_v32 = vpop.permute.xlu1 %2393  ;;  %v2618_v63 = vsel %vm767_vm3, %v7089_v52, %v6082_v56  ;;  %v2620_v37 = vsel %vm767_vm3, %v7092_v8, %v6122_v50  ;;  %v7095_v50 = vld [vmem:[#allocation60_spill] sm:$0xff] }
 0x2a9   : > { %v2654_v26 = vsel %vm816_vm4, %v2618_v63, %v6102_v23  ;;  %v2621_v18 = vsel %vm767_vm3, %v7093_v45, %v2392_v0  ;;  %v2656_v23 = vsel %vm816_vm4, %v2620_v37, %v6140_v12 }
 0x2ab   : > { %1537 = vrot.lane.b32.xlu1 %v7079_v30, %s4545_s10  ;;  %4293 = vmatmul.mubr.msk.f32.gmra.mrb[14].mxu1 %vm867_vm5, %v2644_v39  ;;  %v2622_v30 = vsel %vm767_vm3, %v7095_v50, %v6156_v32 }
 0x2ac   : > { %v2536_v2 = vpop.permute.xlu0 %2535  ;;  %4295 = vmatprep.mubr.msk.f32.mxu1 %vm867_vm5, %v2645_v59  ;;  %v2538_v51 = vpop.permute.xlu1 %2537 }
 0x2ad   : > { %v2657_v36 = vsel %vm816_vm4, %v2621_v18, %v2536_v2  ;;  %v2658_v12 = vsel %vm816_vm4, %v2622_v30, %v2538_v51  ;;  %v7099_v2 = vld [vmem:[#allocation68_spill] sm:$0xff] }
 0x2af   : > { %1539 = vrot.lane.b32.xlu1 %v7084_v7, %s4545_s10  ;;  %4296 = vmatmul.mubr.msk.f32.gmra.mrb[16].mxu1 %vm867_vm5, %v2646_v27  ;;  %v7098_v27 = vld [vmem:[#allocation63_spill] sm:$0xff]  ;;  %v7101_v7 = vld [vmem:[#allocation69_spill] sm:$0xff] }
 0x2b0   : > { %v2396_v13 = vpop.permute.xlu0 %2395  ;;  %4298 = vmatprep.mubr.msk.f32.mxu1 %vm867_vm5, %v2647_v29  ;;  %v2398_v58 = vpop.permute.xlu1 %2397 }
 0x2b1   : > { %v2623_v0 = vsel %vm767_vm3, %v7096_v21, %v2396_v13  ;;  %v2624_v54 = vsel %vm767_vm3, %v7098_v27, %v2398_v58  ;;  %v7102_v13 = vld [vmem:[#allocation72_spill] sm:$0xff]  ;;  %v7118_v27 = vld [vmem:[#allocation43_spill] sm:$0xff] }
 0x2b3   : > { %1667 = vrot.lane.b32.xlu1 %v7086_v28, %s4544_s9  ;;  %4299 = vmatmul.mubr.msk.f32.gmra.mrb[18].mxu1 %vm867_vm5, %v2648_v60 }
 0x2b4   : > { %v2540_v38 = vpop.permute.xlu0 %2539  ;;  %4301 = vmatprep.mubr.msk.f32.mxu1 %vm867_vm5, %v2649_v48  ;;  %v2542_v31 = vpop.permute.xlu1 %2541  ;;  %v7104_v48 = vld [vmem:[#allocation73_spill] sm:$0xff] }
 0x2b5   : > { %v2659_v32 = vsel %vm816_vm4, %v2623_v0, %v2540_v38  ;;  %v2660_v19 = vsel %vm816_vm4, %v2624_v54, %v2542_v31  ;;  %v7106_v31 = vld [vmem:[#allocation31_spill] sm:$0xff]  ;;  %v7116_v0 = vld [vmem:[#allocation41_spill] sm:$0xff] }
 0x2b7   : > { %1541 = vrot.lane.b32.xlu1 %v7088_v47, %s4545_s10  ;;  %4302 = vmatmul.mubr.msk.f32.gmra.mrb[20].mxu1 %vm867_vm5, %v2650_v22  ;;  %v7108_v47 = vld [vmem:[#allocation82_spill] sm:$0xff] }
 0x2b8   : > { %v2400_v53 = vpop.permute.xlu0 %2399  ;;  %4304 = vmatprep.mubr.msk.f32.mxu1 %vm867_vm5, %v2651_v35  ;;  %v2402_v55 = vpop.permute.xlu1 %2401 }
 0x2b9   : > { %v2625_v10 = vsel %vm767_vm3, %v7099_v2, %v2400_v53  ;;  %v2626_v20 = vsel %vm767_vm3, %v7101_v7, %v2402_v55  ;;  %v7109_v55 = vld [vmem:[#allocation33_spill] sm:$0xff]  ;;  %v7119_v2 = vld [vmem:[#allocation4_spill] sm:$0xff] }
 0x2ba   : > { %v7122_v7 = vld [vmem:[#allocation5_spill] sm:$0xff] }
 0x2bb   : > { %1543 = vrot.lane.b32.xlu1 %v7091_v24, %s4545_s10  ;;  %4305 = vmatmul.mubr.msk.f32.gmra.mrb[22].mxu1 %vm867_vm5, %v2652_v44  ;;  %v7110_v44 = vld [vmem:[#allocation83_spill] sm:$0xff]  ;;  %v7111_v24 = vld [vmem:[#allocation34_spill] sm:$0xff] }
 0x2bc   : > { %v2544_v39 = vpop.permute.xlu0 %2543  ;;  %v2546_v56 = vpop.permute.xlu1 %2545  ;;  %4307 = vmatprep.mubr.msk.f32.mxu1 %vm867_vm5, %v2653_v15 }
 0x2bd   : > { %v2661_v33 = vsel %vm816_vm4, %v2625_v10, %v2544_v39  ;;  %v2662_v60 = vsel %vm816_vm4, %v2626_v20, %v2546_v56 }
 0x2bf   : > { %1671 = vrot.lane.b32.xlu1 %v7094_v43, %s4544_s9  ;;  %4308 = vmatmul.mubr.msk.f32.gmra.mrb[24].mxu1 %vm867_vm5, %v2654_v26 }
 0x2c0   : > { %v2404_v46 = vpop.permute.xlu0 %2403  ;;  %v2406_v59 = vpop.permute.xlu1 %2405  ;;  %4310 = vmatprep.mubr.msk.f32.mxu1 %vm867_vm5, %v2655_v4  ;;  %v7112_v4 = vld [vmem:[#allocation36_spill] sm:$0xff] }
 0x2c1   : > { %v2627_v58 = vsel %vm767_vm3, %v7102_v13, %v2404_v46  ;;  %v2628_v28 = vsel %vm767_vm3, %v7104_v48, %v2406_v59  ;;  %v7113_v46 = vld [vmem:[#allocation37_spill] sm:$0xff]  ;;  %v7114_v59 = vld [vmem:[#allocation3_spill] sm:$0xff]  ;;  %v7125_v48 = vld [vmem:[#allocation48_spill] sm:$0xff] }
 0x2c3   : > { %1545 = vrot.lane.b32.xlu1 %v7097_v17, %s4545_s10  ;;  %4311 = vmatmul.mubr.msk.f32.gmra.mrb[26].mxu1 %vm867_vm5, %v2656_v23  ;;  %v7117_v17 = vld [vmem:[#allocation2_spill] sm:$0xff] }
 0x2c4   : > { %v2548_v6 = vpop.permute.xlu0 %2547  ;;  %v2550_v57 = vpop.permute.xlu1 %2549  ;;  %4313 = vmatprep.mubr.msk.f32.mxu1 %vm867_vm5, %v2657_v36  ;;  %v7115_v36 = vld [vmem:[#allocation38_spill] sm:$0xff] }
 0x2c5   : > { %v2663_v42 = vsel %vm816_vm4, %v2627_v58, %v2548_v6  ;;  %v2664_v22 = vsel %vm816_vm4, %v2628_v28, %v2550_v57  ;;  %v7123_v58 = vld [vmem:[#allocation47_spill] sm:$0xff] }
 0x2c7   : > { %1547 = vrot.lane.b32.xlu1 %v7100_v49, %s4545_s10  ;;  %4314 = vmatmul.mubr.msk.f32.gmra.mrb[28].mxu1 %vm867_vm5, %v2658_v12 }
 0x2c8   : > { %v2408_v51 = vpop.permute.xlu0 %2407  ;;  %v2410_v29 = vpop.permute.xlu1 %2409  ;;  %4316 = vmatprep.mubr.msk.f32.mxu1 %vm867_vm5, %v2659_v32 }
 0x2c9   : > { %v2629_v38 = vsel %vm767_vm3, %v7105_v34, %v2408_v51  ;;  %v2630_v9 = vsel %vm767_vm3, %v7107_v11, %v2410_v29  ;;  %v7121_v29 = vld [vmem:[#allocation46_spill] sm:$0xff]  ;;  %v7126_v34 = vld [vmem:[#allocation51_spill] sm:$0xff] }
 0x2cb   : > { %1675 = vrot.lane.b32.xlu1 %v7103_v1, %s4544_s9  ;;  %4317 = vmatmul.mubr.msk.f32.gmra.mrb[30].mxu1 %vm867_vm5, %v2660_v19  ;;  %v7120_v19 = vld [vmem:[#allocation44_spill] sm:$0xff] }
 0x2cc   : > { %v2552_v5 = vpop.permute.xlu0 %2551  ;;  %v2554_v40 = vpop.permute.xlu1 %2553  ;;  %4319 = vmatprep.mubr.msk.f32.mxu1 %vm867_vm5, %v2661_v33 }
 0x2cd   : > { %v2665_v35 = vsel %vm816_vm4, %v2629_v38, %v2552_v5  ;;  %v2666_v52 = vsel %vm816_vm4, %v2630_v9, %v2554_v40  ;;  %v7124_v5 = vld [vmem:[#allocation7_spill] sm:$0xff]  ;;  %v7127_v38 = vld [vmem:[#allocation6_spill] sm:$0xff] }
 0x2cf   : > { %1549 = vrot.lane.b32.xlu1 %v7106_v31, %s4545_s10  ;;  %4320 = vmatmul.mubr.msk.f32.gmra.mrb[32].mxu1 %vm867_vm5, %v2662_v60 }
 0x2d0   : > { %v2412_v61 = vpop.permute.xlu0 %2411  ;;  %v2414_v14 = vpop.permute.xlu1 %2413  ;;  %4322 = vmatprep.mubr.msk.f32.mxu1 %vm867_vm5, %v2663_v42 }
 0x2d1   : > { %v2631_v53 = vsel %vm767_vm3, %v7108_v47, %v2412_v61  ;;  %v2632_v41 = vsel %vm767_vm3, %v7110_v44, %v2414_v14  ;;  %v7128_v14 = vld [vmem:[#allocation52_spill] sm:$0xff] }
 0x2d3   : > { %1551 = vrot.lane.b32.xlu1 %v7109_v55, %s4545_s10  ;;  %4323 = vmatmul.mubr.msk.f32.gmra.mrb[34].mxu1 %vm867_vm5, %v2664_v22 }
 0x2d4   : > { %v2556_v63 = vpop.permute.xlu0 %2555  ;;  %v2558_v15 = vpop.permute.xlu1 %2557  ;;  %4325 = vmatprep.mubr.msk.f32.mxu1 %vm867_vm5, %v2665_v35  ;;  %v7129_v35 = vld [vmem:[#allocation8_spill] sm:$0xff] }
 0x2d5   : > { %v2667_v25 = vsel %vm816_vm4, %v2631_v53, %v2556_v63  ;;  %v2668_v26 = vsel %vm816_vm4, %v2632_v41, %v2558_v15  ;;  %v7130_v53 = vld [vmem:[#allocation53_spill] sm:$0xff] }
 0x2d6   : > { %v7131_v63 = vld [vmem:[#allocation9_spill] sm:$0xff] }
 0x2d7   : > { %1679 = vrot.lane.b32.xlu1 %v7111_v24, %s4544_s9  ;;  %4326 = vmatmul.mubr.msk.f32.gmra.mrb[36].mxu1 %vm867_vm5, %v2666_v52 }
 0x2d8   : > { %v2416_v39 = vpop.permute.xlu0 %2415  ;;  %v2418_v56 = vpop.permute.xlu1 %2417  ;;  %4328 = vmatprep.mubr.msk.f32.mxu1 %vm867_vm5, %v2667_v25 }
 0x2d9   : > { %v2633_v8 = vsel %vm767_vm3, %v5951_v62, %v2416_v39  ;;  %v2634_v37 = vsel %vm767_vm3, %v5958_v16, %v2418_v56 }
 0x2db   : > { %1553 = vrot.lane.b32.xlu1 %v7112_v4, %s4545_s10  ;;  %4329 = vmatmul.mubr.msk.f32.gmra.mrb[38].mxu1 %vm867_vm5, %v2668_v26  ;;  %v7132_v26 = vld [vmem:[#allocation11_spill] sm:$0xff] }
 0x2dc   : > { %v2560_v45 = vpop.permute.xlu0 %2559  ;;  %v2562_v18 = vpop.permute.xlu1 %2561 }
 0x2dd   : > { %v2669_v43 = vsel %vm816_vm4, %v2633_v8, %v2560_v45  ;;  %v2670_v23 = vsel %vm816_vm4, %v2634_v37, %v2562_v18  ;;  %v7133_v37 = vld [vmem:[#allocation10_spill] sm:$0xff] }
 0x2de   : > { %4331 = vmatprep.mubr.msk.f32.mxu1 %vm867_vm5, %v2669_v43 }
 0x2df   : > { %1555 = vrot.lane.b32.xlu1 %v7113_v46, %s4545_s10  ;;  %4332 = vmatmul.mubr.msk.f32.gmra.mrb[40].mxu1 %vm867_vm5, %v2670_v23  ;;  %v7134_v46 = vld [vmem:[#allocation12_spill] sm:$0xff] }
 0x2e0   : > { %v1646_v62 = vpop.permute.xlu0 %1645  ;;  %v1518_v16 = vpop.permute.xlu1 %1517 }
 0x2e1   : > { %v1741_v50 = vsel %vm767_vm3, %v7114_v59, %v1518_v16 }
 0x2e2   : > { %v1773_v30 = vsel %vm816_vm4, %v1741_v50, %v1646_v62  ;;  %v7135_v50 = vld [vmem:[#allocation15_spill] sm:$0xff] }
 0x2e3   : > { %1683 = vrot.lane.b32.xlu1 %v7115_v36, %s4544_s9  ;;  %4228 = vmatprep.mubr.msk.f32.mxu0 %vm867_vm5, %v1773_v30 }
 0x2e4   : > { %v1520_v21 = vpop.permute.xlu1 %1519  ;;  %v1650_v32 = vpop.permute.xlu0 %1649 }
 0x2e5   : > { %v1742_v12 = vsel %vm767_vm3, %v7117_v17, %v1520_v21 }
 0x2e7   : > { %1557 = vrot.lane.b32.xlu1 %v7116_v0, %s4545_s10 }
 0x2e8   : > { %v1648_v6 = vpop.permute.xlu1 %1647  ;;  %v1654_v60 = vpop.permute.xlu0 %1653 }
 0x2e9   : > { %v1774_v57 = vsel %vm816_vm4, %v1742_v12, %v1648_v6  ;;  %v7136_v12 = vld [vmem:[#allocation20_spill] sm:$0xff] }
 0x2ea   : > { %4229 = vmatmul.mubr.msk.f32.vlgmr.msra.gmra.mrb[48].mxu0 %vm867_vm5, %v1774_v57 }
 0x2eb   : > { %1559 = vrot.lane.b32.xlu1 %v7118_v27, %s4545_s10 }
 0x2ec   : > { %v1522_v54 = vpop.permute.xlu1 %1521  ;;  %v1658_v9 = vpop.permute.xlu0 %1657 }
 0x2ed   : > { %v1743_v10 = vsel %vm767_vm3, %v7119_v2, %v1522_v54  ;;  %v7137_v54 = vld [vmem:[#allocation19_spill] sm:$0xff] }
 0x2ee   : > { %v1775_v49 = vsel %vm816_vm4, %v1743_v10, %v1650_v32 }
 0x2ef   : > { %1687 = vrot.lane.b32.xlu1 %v7120_v19, %s4544_s9  ;;  %4231 = vmatprep.mubr.msk.f32.mxu0 %vm867_vm5, %v1775_v49 }
 0x2f0   : > { %v1662_v24 = vpop.permute.xlu0 %1661 }
 0x2f1   : > { %v1524_v51 = vpop.permute.xlu1 %1523 }
 0x2f2   : > { %v1744_v20 = vsel %vm767_vm3, %v7122_v7, %v1524_v51  ;;  %v7138_v51 = vld [vmem:[#allocation22_spill] sm:$0xff] }
 0x2f3   : > { %1561 = vrot.lane.b32.xlu1 %v7121_v29, %s4545_s10 }
 0x2f4   : > { %v1666_v23 = vpop.permute.xlu0 %1665 }
 0x2f5   : > { %v1652_v33 = vpop.permute.xlu1 %1651 }
 0x2f6   : > { %v1776_v13 = vsel %vm816_vm4, %v1744_v20, %v1652_v33  ;;  %v7139_v33 = vld [vmem:[#allocation25_spill] sm:$0xff] }
 0x2f7   : > { %1563 = vrot.lane.b32.xlu1 %v7123_v58, %s4545_s10  ;;  %4232 = vmatmul.mubr.msk.f32.gmra.mrb[50].mxu0 %vm867_vm5, %v1776_v13 }
 0x2f8   : > { %v1670_v17 = vpop.permute.xlu0 %1669 }
 0x2f9   : > { %v1526_v1 = vpop.permute.xlu1 %1525 }
 0x2fa   : > { %v1745_v40 = vsel %vm767_vm3, %v7124_v5, %v1526_v1 }
 0x2fb   : > { %1691 = vrot.lane.b32.xlu1 %v7125_v48, %s4544_s9  ;;  %v1777_v28 = vsel %vm816_vm4, %v1745_v40, %v1654_v60  ;;  %v7140_v40 = vld [vmem:[#allocation30_spill] sm:$0xff] }
 0x2fc   : > { %4234 = vmatprep.mubr.msk.f32.mxu0 %vm867_vm5, %v1777_v28  ;;  %v1674_v19 = vpop.permute.xlu0 %1673 }
 0x2fd   : > { %v1528_v42 = vpop.permute.xlu1 %1527 }
 0x2fe   : > { %v1746_v31 = vsel %vm767_vm3, %v7127_v38, %v1528_v42 }
 0x2ff   : > { %1565 = vrot.lane.b32.xlu1 %v7126_v34, %s4545_s10  ;;  %v7141_v34 = vld [vmem:[#allocation29_spill] sm:$0xff] }
 0x300   : > { %v1678_v5 = vpop.permute.xlu0 %1677 }
 0x301   : > { %v1656_v22 = vpop.permute.xlu1 %1655 }
 0x302   : > { %v1778_v61 = vsel %vm816_vm4, %v1746_v31, %v1656_v22 }
 0x303   : > { %1567 = vrot.lane.b32.xlu1 %v7128_v14, %s4545_s10  ;;  %4235 = vmatmul.mubr.msk.f32.gmra.mrb[52].mxu0 %vm867_vm5, %v1778_v61 }
 0x304   : > { %v1682_v14 = vpop.permute.xlu0 %1681 }
 0x305   : > { %v1530_v11 = vpop.permute.xlu1 %1529 }
 0x306   : > { %v1747_v47 = vsel %vm767_vm3, %v7129_v35, %v1530_v11  ;;  %v7142_v11 = vld [vmem:[#allocation32_spill] sm:$0xff] }
 0x307   : > { %1695 = vrot.lane.b32.xlu1 %v7130_v53, %s4544_s9  ;;  %v1779_v55 = vsel %vm816_vm4, %v1747_v47, %v1658_v9  ;;  %v7143_v53 = vld [vmem:[#allocation35_spill] sm:$0xff] }
 0x308   : > { %4237 = vmatprep.mubr.msk.f32.mxu0 %vm867_vm5, %v1779_v55 }
 0x309   : > { %v1532_v52 = vpop.permute.xlu1 %1531 }
 0x30a   : > { %v1748_v15 = vsel %vm767_vm3, %v7131_v63, %v1532_v52 }
 0x30d   : > { %v1660_v44 = vpop.permute.xlu1 %1659 }
 0x30e   : > { %v1780_v41 = vsel %vm816_vm4, %v1748_v15, %v1660_v44  ;;  %v1686_v44 = vpop.permute.xlu0 %1685 }
 0x30f   : > { %4238 = vmatmul.mubr.msk.f32.gmra.mrb[54].mxu0 %vm867_vm5, %v1780_v41  ;;  %v7144_v41 = vld [vmem:[#allocation40_spill] sm:$0xff] }
 0x311   : > { %v1534_v25 = vpop.permute.xlu1 %1533 }
 0x312   : > { %v1749_v39 = vsel %vm767_vm3, %v7132_v26, %v1534_v25 }
 0x313   : > { %v1781_v56 = vsel %vm816_vm4, %v1749_v39, %v1662_v24  ;;  %v7145_v39 = vld [vmem:[#allocation39_spill] sm:$0xff] }
 0x314   : > { %4240 = vmatprep.mubr.msk.f32.mxu0 %vm867_vm5, %v1781_v56 }
 0x315   : > { %v1536_v8 = vpop.permute.xlu1 %1535 }
 0x316   : > { %v1750_v4 = vsel %vm767_vm3, %v7133_v37, %v1536_v8 }
 0x319   : > { %v1664_v45 = vpop.permute.xlu1 %1663 }
 0x31a   : > { %v1782_v18 = vsel %vm816_vm4, %v1750_v4, %v1664_v45  ;;  %v1690_v45 = vpop.permute.xlu0 %1689 }
 0x31b   : > { %4241 = vmatmul.mubr.msk.f32.gmra.mrb[56].mxu0 %vm867_vm5, %v1782_v18  ;;  %v7146_v18 = vld [vmem:[#allocation42_spill] sm:$0xff] }
 0x31d   : > { %v1538_v43 = vpop.permute.xlu1 %1537 }
 0x31e   : > { %v1751_v62 = vsel %vm767_vm3, %v7134_v46, %v1538_v43  ;;  %v3319_v46 = vld [vmem:[%s6936_s5] sm:$0xff] }
 0x31f   : > { %v1783_v16 = vsel %vm816_vm4, %v1751_v62, %v1666_v23  ;;  %v3320_v62 = vld [vmem:[%s6936_s5 + $0x8] sm:$0xf] }
 0x320   : > { %4243 = vmatprep.mubr.msk.f32.mxu0 %vm867_vm5, %v1783_v16 }
 0x321   : > { %v1540_v59 = vpop.permute.xlu1 %1539 }
 0x322   : > { %v1752_v30 = vsel %vm767_vm3, %v7135_v50, %v1540_v59  ;;  %v4404_v59 = vpack.c.bf16 %v3320_v62, %v3319_v46  ;;  %v7147_v50 = vld [vmem:[#allocation45_spill] sm:$0xff] }
 0x324   : > { %4406 = vmatprep.subr.msk.bf16.mxu1 %vm4607_vm2, %v4404_v59 }
 0x325   : > { %v1668_v36 = vpop.permute.xlu1 %1667  ;;  %4409 = vmatpush3.bf16.msk.msra.mxu1 %vm4607_vm2, %v4404_v59 }
 0x326   : > { %v1784_v21 = vsel %vm816_vm4, %v1752_v30, %v1668_v36 }
 0x327   : > { %4244 = vmatmul.mubr.msk.f32.gmra.mrb[58].mxu0 %vm867_vm5, %v1784_v21 }
 0x329   : > { %v1542_v0 = vpop.permute.xlu1 %1541 }
 0x32a   : > { %v1753_v6 = vsel %vm767_vm3, %v7136_v12, %v1542_v0 }
 0x32b   : > { %v1785_v57 = vsel %vm816_vm4, %v1753_v6, %v1670_v17  ;;  %v1694_v6 = vpop.permute.xlu0 %1693 }
 0x32c   : > { %4246 = vmatprep.mubr.msk.f32.mxu0 %vm867_vm5, %v1785_v57  ;;  %v7148_v57 = vld [vmem:[#allocation50_spill] sm:$0xff] }
 0x32d   : > { %v1544_v27 = vpop.permute.xlu1 %1543 }
 0x32e   : > { %v1754_v32 = vsel %vm767_vm3, %v7137_v54, %v1544_v27 }
 0x331   : > { %v1672_v2 = vpop.permute.xlu1 %1671 }
 0x332   : > { %v1786_v10 = vsel %vm816_vm4, %v1754_v32, %v1672_v2 }
 0x333   : > { %4247 = vmatmul.mubr.msk.f32.gmra.mrb[60].mxu0 %vm867_vm5, %v1786_v10 }
 0x335   : > { %v1546_v49 = vpop.permute.xlu1 %1545 }
 0x336   : > { %v1755_v29 = vsel %vm767_vm3, %v7138_v51, %v1546_v49 }
 0x337   : > { %v1787_v7 = vsel %vm816_vm4, %v1755_v29, %v1674_v19  ;;  %v7149_v19 = vld [vmem:[#allocation49_spill] sm:$0xff] }
 0x338   : > { %4249 = vmatprep.mubr.msk.f32.mxu0 %vm867_vm5, %v1787_v7 }
 0x339   : > { %v1548_v20 = vpop.permute.xlu1 %1547 }
 0x33a   : > { %v1756_v13 = vsel %vm767_vm3, %v7139_v33, %v1548_v20 }
 0x33d   : > { %v1676_v58 = vpop.permute.xlu1 %1675 }
 0x33e   : > { %v1788_v1 = vsel %vm816_vm4, %v1756_v13, %v1676_v58 }
 0x33f   : > { %4250 = vmatmul.mubr.msk.f32.gmra.mrb[62].mxu0 %vm867_vm5, %v1788_v1 }
 0x341   : > { %v1550_v60 = vpop.permute.xlu1 %1549 }
 0x342   : > { %v1757_v48 = vsel %vm767_vm3, %v7140_v40, %v1550_v60 }
 0x343   : > { %v1789_v28 = vsel %vm816_vm4, %v1757_v48, %v1678_v5 }
 0x344   : > { %4252 = vmatprep.mubr.msk.f32.mxu0 %vm867_vm5, %v1789_v28 }
 0x345   : > { %v1552_v42 = vpop.permute.xlu1 %1551 }
 0x346   : > { %v1758_v38 = vsel %vm767_vm3, %v7141_v34, %v1552_v42 }
 0x349   : > { %v1680_v31 = vpop.permute.xlu1 %1679 }
 0x34a   : > { %v1790_v22 = vsel %vm816_vm4, %v1758_v38, %v1680_v31 }
 0x34b   : > { %4253 = vmatmul.mubr.msk.f32.gmra.mrb[64].mxu0 %vm867_vm5, %v1790_v22 }
 0x34d   : > { %v1554_v61 = vpop.permute.xlu1 %1553 }
 0x34e   : > { %v1759_v9 = vsel %vm767_vm3, %v7142_v11, %v1554_v61 }
 0x34f   : > { %v1791_v35 = vsel %vm816_vm4, %v1759_v9, %v1682_v14 }
 0x350   : > { %4255 = vmatprep.mubr.msk.f32.mxu0 %vm867_vm5, %v1791_v35 }
 0x351   : > { %v1556_v47 = vpop.permute.xlu1 %1555 }
 0x352   : > { %v1760_v55 = vsel %vm767_vm3, %v7143_v53, %v1556_v47 }
 0x355   : > { %v1684_v52 = vpop.permute.xlu1 %1683 }
 0x356   : > { %v1792_v63 = vsel %vm816_vm4, %v1760_v55, %v1684_v52 }
 0x357   : > { %4256 = vmatmul.mubr.msk.f32.gmra.mrb[66].mxu0 %vm867_vm5, %v1792_v63 }
 0x359   : > { %v1558_v15 = vpop.permute.xlu1 %1557 }
 0x35a   : > { %v1761_v25 = vsel %vm767_vm3, %v7144_v41, %v1558_v15 }
 0x35b   : > { %v1793_v24 = vsel %vm816_vm4, %v1761_v25, %v1686_v44 }
 0x35c   : > { %4258 = vmatprep.mubr.msk.f32.mxu0 %vm867_vm5, %v1793_v24 }
 0x35d   : > { %v1560_v26 = vpop.permute.xlu1 %1559 }
 0x35e   : > { %v1762_v56 = vsel %vm767_vm3, %v7145_v39, %v1560_v26 }
 0x361   : > { %v1688_v8 = vpop.permute.xlu1 %1687 }
 0x362   : > { %v1794_v37 = vsel %vm816_vm4, %v1762_v56, %v1688_v8 }
 0x363   : > { %4259 = vmatmul.mubr.msk.f32.gmra.mrb[68].mxu0 %vm867_vm5, %v1794_v37 }
 0x365   : > { %v1562_v4 = vpop.permute.xlu1 %1561 }
 0x366   : > { %v1763_v43 = vsel %vm767_vm3, %v7146_v18, %v1562_v4 }
 0x367   : > { %v1795_v23 = vsel %vm816_vm4, %v1763_v43, %v1690_v45 }
 0x368   : > { %4261 = vmatprep.mubr.msk.f32.mxu0 %vm867_vm5, %v1795_v23 }
 0x369   : > { %v1564_v16 = vpop.permute.xlu1 %1563 }
 0x36a   : > { %v1764_v30 = vsel %vm767_vm3, %v7147_v50, %v1564_v16 }
 0x36d   : > { %v1692_v36 = vpop.permute.xlu1 %1691 }
 0x36e   : > { %v1796_v21 = vsel %vm816_vm4, %v1764_v30, %v1692_v36  ;;  %v6440_v0 = vpop.f32.mrb[6].mxu1 }
 0x36f   : > { %4262 = vmatmul.mubr.msk.f32.gmra.mrb[70].mxu0 %vm867_vm5, %v1796_v21  ;;  %v6443_v17 = vpop.f32.mrb[7].mxu1 }
 0x371   : > { %v1566_v12 = vpop.permute.xlu1 %1565 }
 0x372   : > { %v1765_v27 = vsel %vm767_vm3, %v7148_v57, %v1566_v12  ;;  %v6447_v54 = vpop.f32.mrb[8].mxu1 }
 0x373   : > { %v6449_v3 = vpop.f32.mrb[9].mxu1  ;;  %3063 = vrot.lane.b32.xlu1 %v6447_v54, %s4545_s10  ;;  %v1797_v32 = vsel %vm816_vm4, %v1765_v27, %v1694_v6 }
 0x374   : > { %4264 = vmatprep.mubr.msk.f32.mxu0 %vm867_vm5, %v1797_v32  ;;  %3061 = vrot.lane.b32.xlu0 %v6449_v3, %s4545_s10 }
 0x375   : > { %v1568_v2 = vpop.permute.xlu1 %1567 }
 0x376   : > { %v6457_v10 = vpop.f32.mrb[10].mxu1  ;;  %v1766_v51 = vsel %vm767_vm3, %v7149_v19, %v1568_v2 }
 0x377   : > { %v6459_v49 = vpop.f32.mrb[11].mxu1  ;;  %3161 = vrot.lane.b32.xlu1 %v6457_v10, %s4544_s9 }
 0x378   : > { %3159 = vrot.lane.b32.xlu0 %v6459_v49, %s4544_s9 }
 0x379   : > { %v1696_v29 = vpop.permute.xlu1 %1695 }
 0x37a   : > { %v1798_v7 = vsel %vm816_vm4, %v1766_v51, %v1696_v29  ;;  %v6468_v20 = vpop.f32.mrb[12].mxu1 }
 0x37b   : > { %4265 = vmatmul.mubr.msk.f32.gmra.mrb[72].mxu0 %vm867_vm5, %v1798_v7  ;;  %v6471_v33 = vpop.f32.mrb[13].mxu1  ;;  %3067 = vrot.lane.b32.xlu1 %v6457_v10, %s4545_s10 }
 0x37c   : > { %3065 = vrot.lane.b32.xlu0 %v6459_v49, %s4545_s10 }
 0x37e   : > { %v6477_v13 = vpop.f32.mrb[14].mxu1 }
 0x37f   : > { %v6479_v58 = vpop.f32.mrb[15].mxu1  ;;  %3165 = vrot.lane.b32.xlu1 %v6468_v20, %s4544_s9 }
 0x380   : > { %3163 = vrot.lane.b32.xlu0 %v6471_v33, %s4544_s9 }
 0x382   : > { %v6485_v1 = vpop.f32.mrb[16].mxu1 }
 0x383   : > { %v6487_v60 = vpop.f32.mrb[17].mxu1  ;;  %3071 = vrot.lane.b32.xlu1 %v6468_v20, %s4545_s10 }
 0x384   : > { %3069 = vrot.lane.b32.xlu0 %v6471_v33, %s4545_s10 }
 0x386   : > { %v6493_v5 = vpop.f32.mrb[18].mxu1 }
 0x387   : > { %v6495_v40 = vpop.f32.mrb[19].mxu1  ;;  %3075 = vrot.lane.b32.xlu1 %v6477_v13, %s4545_s10 }
 0x388   : > { %3169 = vrot.lane.b32.xlu0 %v6477_v13, %s4544_s9 }
 0x38a   : > { %v6501_v48 = vpop.f32.mrb[20].mxu1 }
 0x38b   : > { %v6503_v28 = vpop.f32.mrb[21].mxu1  ;;  %3079 = vrot.lane.b32.xlu1 %v6485_v1, %s4545_s10 }
 0x38c   : > { %3167 = vrot.lane.b32.xlu0 %v6479_v58, %s4544_s9 }
 0x38e   : > { %v6509_v42 = vpop.f32.mrb[22].mxu1 }
 0x38f   : > { %v6511_v34 = vpop.f32.mrb[23].mxu1  ;;  %3083 = vrot.lane.b32.xlu1 %v6493_v5, %s4545_s10 }
 0x390   : > { %3073 = vrot.lane.b32.xlu0 %v6479_v58, %s4545_s10 }
 0x392   : > { %v6517_v38 = vpop.f32.mrb[24].mxu1 }
 0x393   : > { %3087 = vrot.lane.b32.xlu1 %v6501_v48, %s4545_s10  ;;  %v6521_v31 = vpop.f32.mrb[25].mxu1 }
 0x394   : > { %3173 = vrot.lane.b32.xlu0 %v6485_v1, %s4544_s9 }
 0x396   : > { %v6525_v22 = vpop.f32.mrb[26].mxu1 }
 0x397   : > { %3091 = vrot.lane.b32.xlu1 %v6509_v42, %s4545_s10  ;;  %v6529_v61 = vpop.f32.mrb[27].mxu1 }
 0x398   : > { %3171 = vrot.lane.b32.xlu0 %v6487_v60, %s4544_s9 }
 0x39a   : > { %v6533_v14 = vpop.f32.mrb[28].mxu1 }
 0x39b   : > { %3095 = vrot.lane.b32.xlu1 %v6517_v38, %s4545_s10  ;;  %v6537_v11 = vpop.f32.mrb[29].mxu1 }
 0x39c   : > { %3077 = vrot.lane.b32.xlu0 %v6487_v60, %s4545_s10 }
 0x39e   : > { %v6541_v9 = vpop.f32.mrb[30].mxu1 }
 0x39f   : > { %3099 = vrot.lane.b32.xlu1 %v6525_v22, %s4545_s10  ;;  %v6545_v35 = vpop.f32.mrb[31].mxu1 }
 0x3a0   : > { %3177 = vrot.lane.b32.xlu0 %v6493_v5, %s4544_s9 }
 0x3a2   : > { %v6549_v47 = vpop.f32.mrb[32].mxu1 }
 0x3a3   : > { %3103 = vrot.lane.b32.xlu1 %v6533_v14, %s4545_s10  ;;  %v6553_v53 = vpop.f32.mrb[33].mxu1 }
 0x3a4   : > { %3175 = vrot.lane.b32.xlu0 %v6495_v40, %s4544_s9 }
 0x3a6   : > { %v6557_v55 = vpop.f32.mrb[34].mxu1 }
 0x3a7   : > { %3107 = vrot.lane.b32.xlu1 %v6541_v9, %s4545_s10  ;;  %v6561_v52 = vpop.f32.mrb[35].mxu1 }
 0x3a8   : > { %3081 = vrot.lane.b32.xlu0 %v6495_v40, %s4545_s10 }
 0x3aa   : > { %v6565_v63 = vpop.f32.mrb[36].mxu1 }
 0x3ab   : > { %3111 = vrot.lane.b32.xlu1 %v6549_v47, %s4545_s10  ;;  %v6569_v15 = vpop.f32.mrb[37].mxu1 }
 0x3ac   : > { %3181 = vrot.lane.b32.xlu0 %v6501_v48, %s4544_s9 }
 0x3ae   : > { %v6573_v44 = vpop.f32.mrb[38].mxu1 }
 0x3af   : > { %3115 = vrot.lane.b32.xlu1 %v6557_v55, %s4545_s10  ;;  %v6577_v41 = vpop.f32.mrb[39].mxu1 }
 0x3b0   : > { %3179 = vrot.lane.b32.xlu0 %v6503_v28, %s4544_s9 }
 0x3b2   : > { %v4333_v25 = vpop.f32.mrb[40].mxu1 }
 0x3b3   : > { %3119 = vrot.lane.b32.xlu1 %v6565_v63, %s4545_s10  ;;  %v6583_v24 = vpop.f32.mrb[41].mxu1 }
 0x3b4   : > { %3085 = vrot.lane.b32.xlu0 %v6503_v28, %s4545_s10 }
 0x3b7   : > { %3123 = vrot.lane.b32.xlu1 %v6573_v44, %s4545_s10 }
 0x3b8   : > { %3185 = vrot.lane.b32.xlu0 %v6509_v42, %s4544_s9 }
 0x3bb   : > { %3221 = vrot.lane.b32.xlu1 %v4333_v25, %s4544_s9 }
 0x3bc   : > { %3183 = vrot.lane.b32.xlu0 %v6511_v34, %s4544_s9 }
 0x3bd   : > { %v6594_v26 = vpop.f32.mrb[48].mxu0 }
 0x3be   : > { %v6596_v39 = vpop.f32.mrb[49].mxu0 }
 0x3c0   : > { %3089 = vrot.lane.b32.xlu0 %v6511_v34, %s4545_s10 }
 0x3c4   : > { %3189 = vrot.lane.b32.xlu0 %v6517_v38, %s4544_s9 }
 0x3c8   : > { %3187 = vrot.lane.b32.xlu0 %v6521_v31, %s4544_s9 }
 0x3ca   : > { %v6604_v56 = vpop.f32.mrb[50].mxu0 }
 0x3cb   : > { %v6606_v8 = vpop.f32.mrb[51].mxu0 }
 0x3cc   : > { %3093 = vrot.lane.b32.xlu0 %v6521_v31, %s4545_s10 }
 0x3d0   : > { %3193 = vrot.lane.b32.xlu0 %v6525_v22, %s4544_s9 }
 0x3d4   : > { %3191 = vrot.lane.b32.xlu0 %v6529_v61, %s4544_s9 }
 0x3d6   : > { %v6614_v37 = vpop.f32.mrb[52].mxu0 }
 0x3d7   : > { %v6616_v4 = vpop.f32.mrb[53].mxu0 }
 0x3d8   : > { %3097 = vrot.lane.b32.xlu0 %v6529_v61, %s4545_s10 }
 0x3dc   : > { %3197 = vrot.lane.b32.xlu0 %v6533_v14, %s4544_s9 }
 0x3e0   : > { %3195 = vrot.lane.b32.xlu0 %v6537_v11, %s4544_s9 }
 0x3e2   : > { %v6624_v45 = vpop.f32.mrb[54].mxu0 }
 0x3e3   : > { %v6626_v18 = vpop.f32.mrb[55].mxu0 }
 0x3e4   : > { %3101 = vrot.lane.b32.xlu0 %v6537_v11, %s4545_s10 }
 0x3e5   : > { %v3064_v43 = vpop.permute.xlu1 %3063 }
 0x3e6   : > { %v3062_v23 = vpop.permute.xlu0 %3061  ;;  %v3256_v59 = vsel %vm767_vm3, %v6440_v0, %v3064_v43 }
 0x3e7   : > { %v3255_v62 = vsel %vm767_vm3, %v6443_v17, %v3062_v23 }
 0x3e8   : > { %3201 = vrot.lane.b32.xlu0 %v6541_v9, %s4544_s9 }
 0x3e9   : > { %v3162_v46 = vpop.permute.xlu1 %3161 }
 0x3ea   : > { %v3160_v16 = vpop.permute.xlu0 %3159  ;;  %v3288_v30 = vsel %vm816_vm4, %v3256_v59, %v3162_v46 }
 0x3eb   : > { %v3287_v50 = vsel %vm816_vm4, %v3255_v62, %v3160_v16 }
 0x3ec   : > { %3199 = vrot.lane.b32.xlu0 %v6545_v35, %s4544_s9  ;;  %4338 = vmatprep.mubr.msk.f32.mxu1 %vm867_vm5, %v3287_v50 }
 0x3ed   : > { %4339 = vmatmul.mubr.msk.f32.vlgmr.msra.gmra.mrb[42].mxu1 %vm867_vm5, %v3288_v30  ;;  %v3068_v36 = vpop.permute.xlu1 %3067 }
 0x3ee   : > { %v6642_v21 = vpop.f32.mrb[56].mxu0  ;;  %v3066_v12 = vpop.permute.xlu0 %3065  ;;  %v3258_v27 = vsel %vm767_vm3, %v6447_v54, %v3068_v36 }
 0x3ef   : > { %v6644_v17 = vpop.f32.mrb[57].mxu0  ;;  %v3257_v6 = vsel %vm767_vm3, %v6449_v3, %v3066_v12 }
 0x3f0   : > { %3105 = vrot.lane.b32.xlu0 %v6545_v35, %s4545_s10 }
 0x3f1   : > { %v3166_v0 = vpop.permute.xlu1 %3165 }
 0x3f2   : > { %v3164_v57 = vpop.permute.xlu0 %3163  ;;  %v3290_v2 = vsel %vm816_vm4, %v3258_v27, %v3166_v0 }
 0x3f3   : > { %v3289_v32 = vsel %vm816_vm4, %v3257_v6, %v3164_v57 }
 0x3f4   : > { %3205 = vrot.lane.b32.xlu0 %v6549_v47, %s4544_s9  ;;  %4341 = vmatprep.mubr.msk.f32.mxu1 %vm867_vm5, %v3289_v32 }
 0x3f5   : > { %4342 = vmatmul.mubr.msk.f32.gmra.mrb[44].mxu1 %vm867_vm5, %v3290_v2  ;;  %v3072_v54 = vpop.permute.xlu1 %3071 }
 0x3f6   : > { %v3070_v19 = vpop.permute.xlu0 %3069  ;;  %v3260_v43 = vsel %vm767_vm3, %v6457_v10, %v3072_v54 }
 0x3f7   : > { %v3259_v7 = vsel %vm767_vm3, %v6459_v49, %v3070_v19 }
 0x3f8   : > { %3203 = vrot.lane.b32.xlu0 %v6553_v53, %s4544_s9 }
 0x3f9   : > { %v3076_v10 = vpop.permute.xlu1 %3075 }
 0x3fa   : > { %v6660_v3 = vpop.f32.mrb[58].mxu0  ;;  %v3170_v51 = vpop.permute.xlu0 %3169  ;;  %v3262_v36 = vsel %vm767_vm3, %v6468_v20, %v3076_v10 }
 0x3fb   : > { %v6662_v29 = vpop.f32.mrb[59].mxu0  ;;  %v3292_v46 = vsel %vm816_vm4, %v3260_v43, %v3170_v51 }
 0x3fc   : > { %3109 = vrot.lane.b32.xlu0 %v6553_v53, %s4545_s10 }
 0x3fd   : > { %v3080_v20 = vpop.permute.xlu1 %3079 }
 0x3fe   : > { %v3168_v25 = vpop.permute.xlu0 %3167  ;;  %v3264_v19 = vsel %vm767_vm3, %v6477_v13, %v3080_v20 }
 0x3ff   : > { %v3291_v23 = vsel %vm816_vm4, %v3259_v7, %v3168_v25 }
 0x400   : > { %3209 = vrot.lane.b32.xlu0 %v6557_v55, %s4544_s9  ;;  %4344 = vmatprep.mubr.msk.f32.mxu1 %vm867_vm5, %v3291_v23 }
 0x401   : > { %4345 = vmatmul.mubr.msk.f32.gmra.mrb[46].mxu1 %vm867_vm5, %v3292_v46  ;;  %v3084_v13 = vpop.permute.xlu1 %3083 }
 0x402   : > { %v3074_v62 = vpop.permute.xlu0 %3073  ;;  %v3266_v46 = vsel %vm767_vm3, %v6485_v1, %v3084_v13 }
 0x403   : > { %v3261_v50 = vsel %vm767_vm3, %v6471_v33, %v3074_v62 }
 0x404   : > { %3207 = vrot.lane.b32.xlu0 %v6561_v52, %s4544_s9 }
 0x406   : > { %v6678_v49 = vpop.f32.mrb[60].mxu0  ;;  %v3174_v16 = vpop.permute.xlu0 %3173 }
 0x407   : > { %v6680_v59 = vpop.f32.mrb[61].mxu0  ;;  %v3294_v0 = vsel %vm816_vm4, %v3262_v36, %v3174_v16 }
 0x408   : > { %3113 = vrot.lane.b32.xlu0 %v6561_v52, %s4545_s10 }
 0x40a   : > { %v3172_v30 = vpop.permute.xlu0 %3171 }
 0x40b   : > { %v3293_v12 = vsel %vm816_vm4, %v3261_v50, %v3172_v30  ;;  %v3088_v30 = vpop.permute.xlu1 %3087 }
 0x40c   : > { %3213 = vrot.lane.b32.xlu0 %v6565_v63, %s4544_s9  ;;  %4347 = vmatprep.mubr.msk.f32.mxu1 %vm867_vm5, %v3293_v12  ;;  %v3268_v12 = vsel %vm767_vm3, %v6493_v5, %v3088_v30 }
 0x40d   : > { %4348 = vmatmul.mubr.msk.f32.gmra.mrb[48].mxu1 %vm867_vm5, %v3294_v0 }
 0x40e   : > { %v3078_v6 = vpop.permute.xlu0 %3077 }
 0x40f   : > { %v3263_v32 = vsel %vm767_vm3, %v6479_v58, %v3078_v6 }
 0x410   : > { %3211 = vrot.lane.b32.xlu0 %v6569_v15, %s4544_s9 }
 0x412   : > { %v6696_v33 = vpop.f32.mrb[62].mxu0  ;;  %v3178_v57 = vpop.permute.xlu0 %3177 }
 0x413   : > { %v6698_v27 = vpop.f32.mrb[63].mxu0  ;;  %v3296_v54 = vsel %vm816_vm4, %v3264_v19, %v3178_v57 }
 0x414   : > { %3117 = vrot.lane.b32.xlu0 %v6569_v15, %s4545_s10 }
 0x416   : > { %v3176_v2 = vpop.permute.xlu0 %3175 }
 0x417   : > { %v3295_v51 = vsel %vm816_vm4, %v3263_v32, %v3176_v2  ;;  %v3092_v2 = vpop.permute.xlu1 %3091 }
 0x418   : > { %3217 = vrot.lane.b32.xlu0 %v6573_v44, %s4544_s9  ;;  %4350 = vmatprep.mubr.msk.f32.mxu1 %vm867_vm5, %v3295_v51  ;;  %v3270_v5 = vsel %vm767_vm3, %v6501_v48, %v3092_v2 }
 0x419   : > { %4351 = vmatmul.mubr.msk.f32.gmra.mrb[50].mxu1 %vm867_vm5, %v3296_v54 }
 0x41a   : > { %v3082_v7 = vpop.permute.xlu0 %3081 }
 0x41b   : > { %v3265_v44 = vsel %vm767_vm3, %v6487_v60, %v3082_v7 }
 0x41c   : > { %3215 = vrot.lane.b32.xlu0 %v6577_v41, %s4544_s9 }
 0x41e   : > { %v6714_v58 = vpop.f32.mrb[64].mxu0  ;;  %v3182_v25 = vpop.permute.xlu0 %3181 }
 0x41f   : > { %v6716_v43 = vpop.f32.mrb[65].mxu0  ;;  %v3298_v16 = vsel %vm816_vm4, %v3266_v46, %v3182_v25 }
 0x420   : > { %3121 = vrot.lane.b32.xlu0 %v6577_v41, %s4545_s10  ;;  %s6830_s10 = scalar_lea.vmem %s6937_s6, %s3991_s7 }
 0x422   : > { %v3180_v23 = vpop.permute.xlu0 %3179 }
 0x423   : > { %v3297_v62 = vsel %vm816_vm4, %v3265_v44, %v3180_v23  ;;  %v3096_v23 = vpop.permute.xlu1 %3095 }
 0x424   : > { %3219 = vrot.lane.b32.xlu0 %v6583_v24, %s4544_s9  ;;  %4353 = vmatprep.mubr.msk.f32.mxu1 %vm867_vm5, %v3297_v62  ;;  %v3272_v48 = vsel %vm767_vm3, %v6509_v42, %v3096_v23 }
 0x425   : > { %4354 = vmatmul.mubr.msk.f32.gmra.mrb[52].mxu1 %vm867_vm5, %v3298_v16 }
 0x426   : > { %v3086_v10 = vpop.permute.xlu0 %3085 }
 0x427   : > { %v3267_v1 = vsel %vm767_vm3, %v6495_v40, %v3086_v10 }
 0x42a   : > { %v6730_v41 = vpop.f32.mrb[66].mxu0  ;;  %v3186_v50 = vpop.permute.xlu0 %3185 }
 0x42b   : > { %v6732_v60 = vpop.f32.mrb[67].mxu0  ;;  %v3300_v0 = vsel %vm816_vm4, %v3268_v12, %v3186_v50 }
 0x42e   : > { %v3184_v36 = vpop.permute.xlu0 %3183 }
 0x42f   : > { %v3299_v24 = vsel %vm816_vm4, %v3267_v1, %v3184_v36  ;;  %v3100_v36 = vpop.permute.xlu1 %3099 }
 0x430   : > { %4356 = vmatprep.mubr.msk.f32.mxu1 %vm867_vm5, %v3299_v24  ;;  %v3274_v42 = vsel %vm767_vm3, %v6517_v38, %v3100_v36 }
 0x431   : > { %4357 = vmatmul.mubr.msk.f32.gmra.mrb[54].mxu1 %vm867_vm5, %v3300_v0 }
 0x432   : > { %v3090_v6 = vpop.permute.xlu0 %3089 }
 0x433   : > { %v3269_v40 = vsel %vm767_vm3, %v6503_v28, %v3090_v6  ;;  %v3104_v2 = vpop.permute.xlu1 %3103 }
 0x436   : > { %v6742_v57 = vpop.f32.mrb[68].mxu0  ;;  %v3190_v20 = vpop.permute.xlu0 %3189 }
 0x437   : > { %v6744_v32 = vpop.f32.mrb[69].mxu0  ;;  %v3302_v54 = vsel %vm816_vm4, %v3270_v5, %v3190_v20 }
 0x43a   : > { %v3188_v19 = vpop.permute.xlu0 %3187 }
 0x43b   : > { %v3301_v51 = vsel %vm816_vm4, %v3269_v40, %v3188_v19 }
 0x43c   : > { %4359 = vmatprep.mubr.msk.f32.mxu1 %vm867_vm5, %v3301_v51 }
 0x43d   : > { %4360 = vmatmul.mubr.msk.f32.gmra.mrb[56].mxu1 %vm867_vm5, %v3302_v54 }
 0x43e   : > { %v3094_v7 = vpop.permute.xlu0 %3093 }
 0x43f   : > { %v3271_v28 = vsel %vm767_vm3, %v6511_v34, %v3094_v7  ;;  %v3108_v7 = vpop.permute.xlu1 %3107 }
 0x442   : > { %v6754_v25 = vpop.f32.mrb[70].mxu0  ;;  %v3194_v13 = vpop.permute.xlu0 %3193 }
 0x443   : > { %v6756_v44 = vpop.f32.mrb[71].mxu0  ;;  %v3304_v16 = vsel %vm816_vm4, %v3272_v48, %v3194_v13 }
 0x446   : > { %v3192_v46 = vpop.permute.xlu0 %3191 }
 0x447   : > { %v3303_v62 = vsel %vm816_vm4, %v3271_v28, %v3192_v46 }
 0x448   : > { %4362 = vmatprep.mubr.msk.f32.mxu1 %vm867_vm5, %v3303_v62  ;;  %v3112_v62 = vpop.permute.xlu1 %3111 }
 0x449   : > { %4363 = vmatmul.mubr.msk.f32.gmra.mrb[58].mxu1 %vm867_vm5, %v3304_v16 }
 0x44a   : > { %v3098_v10 = vpop.permute.xlu0 %3097 }
 0x44b   : > { %v3273_v34 = vsel %vm767_vm3, %v6521_v31, %v3098_v10  ;;  %v3276_v31 = vsel %vm767_vm3, %v6525_v22, %v3104_v2 }
 0x44e   : > { %v6766_v50 = vpop.f32.mrb[72].mxu0  ;;  %v3198_v30 = vpop.permute.xlu0 %3197 }
 0x44f   : > { %v6768_v1 = vpop.f32.mrb[73].mxu0  ;;  %v3306_v0 = vsel %vm816_vm4, %v3274_v42, %v3198_v30 }
 0x452   : > { %v3196_v12 = vpop.permute.xlu0 %3195 }
 0x453   : > { %v3305_v24 = vsel %vm816_vm4, %v3273_v34, %v3196_v12  ;;  %v3116_v12 = vpop.permute.xlu1 %3115 }
 0x454   : > { %4365 = vmatprep.mubr.msk.f32.mxu1 %vm867_vm5, %v3305_v24 }
 0x455   : > { %4366 = vmatmul.mubr.msk.f32.gmra.mrb[60].mxu1 %vm867_vm5, %v3306_v0 }
 0x456   : > { %v3102_v6 = vpop.permute.xlu0 %3101 }
 0x457   : > { %v3275_v40 = vsel %vm767_vm3, %v6529_v61, %v3102_v6  ;;  %v3278_v61 = vsel %vm767_vm3, %v6533_v14, %v3108_v7 }
 0x45a   : > { %v3202_v20 = vpop.permute.xlu0 %3201 }
 0x45b   : > { %v3308_v5 = vsel %vm816_vm4, %v3276_v31, %v3202_v20  ;;  %v3120_v20 = vpop.permute.xlu1 %3119 }
 0x45e   : > { %v3200_v19 = vpop.permute.xlu0 %3199 }
 0x45f   : > { %v3307_v38 = vsel %vm816_vm4, %v3275_v40, %v3200_v19 }
 0x460   : > { %4368 = vmatprep.mubr.msk.f32.mxu1 %vm867_vm5, %v3307_v38 }
 0x461   : > { %4369 = vmatmul.mubr.msk.f32.gmra.mrb[62].mxu1 %vm867_vm5, %v3308_v5 }
 0x462   : > { %v3106_v51 = vpop.permute.xlu0 %3105 }
 0x463   : > { %v3277_v13 = vsel %vm767_vm3, %v6537_v11, %v3106_v51  ;;  %v3280_v11 = vsel %vm767_vm3, %v6541_v9, %v3112_v62 }
 0x466   : > { %v3206_v54 = vpop.permute.xlu0 %3205 }
 0x467   : > { %v3310_v28 = vsel %vm816_vm4, %v3278_v61, %v3206_v54 }
 0x46a   : > { %v3204_v23 = vpop.permute.xlu0 %3203 }
 0x46b   : > { %v3309_v22 = vsel %vm816_vm4, %v3277_v13, %v3204_v23 }
 0x46c   : > { %4371 = vmatprep.mubr.msk.f32.mxu1 %vm867_vm5, %v3309_v22 }
 0x46d   : > { %4372 = vmatmul.mubr.msk.f32.gmra.mrb[64].mxu1 %vm867_vm5, %v3310_v28 }
 0x46e   : > { %v3110_v46 = vpop.permute.xlu0 %3109 }
 0x46f   : > { %v3279_v16 = vsel %vm767_vm3, %v6545_v35, %v3110_v46  ;;  %v3282_v35 = vsel %vm767_vm3, %v6549_v47, %v3116_v12  ;;  %v3124_v47 = vpop.permute.xlu1 %3123 }
 0x470   : > { %v3286_v7 = vsel %vm767_vm3, %v6565_v63, %v3124_v47 }
 0x472   : > { %v3210_v48 = vpop.permute.xlu0 %3209 }
 0x473   : > { %v3312_v30 = vsel %vm816_vm4, %v3280_v11, %v3210_v48  ;;  %v3222_v51 = vpop.permute.xlu1 %3221 }
 0x474   : > { %v3318_v13 = vsel %vm816_vm4, %v3286_v7, %v3222_v51 }
 0x476   : > { %v3208_v10 = vpop.permute.xlu0 %3207 }
 0x477   : > { %v3311_v14 = vsel %vm816_vm4, %v3279_v16, %v3208_v10 }
 0x478   : > { %4374 = vmatprep.mubr.msk.f32.mxu1 %vm867_vm5, %v3311_v14 }
 0x479   : > { %4375 = vmatmul.mubr.msk.f32.gmra.mrb[66].mxu1 %vm867_vm5, %v3312_v30 }
 0x47a   : > { %v3114_v36 = vpop.permute.xlu0 %3113 }
 0x47b   : > { %v3281_v42 = vsel %vm767_vm3, %v6553_v53, %v3114_v36  ;;  %v3284_v53 = vsel %vm767_vm3, %v6557_v55, %v3120_v20 }
 0x47e   : > { %v3214_v34 = vpop.permute.xlu0 %3213 }
 0x47f   : > { %v3314_v0 = vsel %vm816_vm4, %v3282_v35, %v3214_v34 }
 0x482   : > { %v3212_v24 = vpop.permute.xlu0 %3211 }
 0x483   : > { %v3313_v9 = vsel %vm816_vm4, %v3281_v42, %v3212_v24 }
 0x484   : > { %4377 = vmatprep.mubr.msk.f32.mxu1 %vm867_vm5, %v3313_v9 }
 0x485   : > { %4378 = vmatmul.mubr.msk.f32.gmra.mrb[0].mxu1 %vm867_vm5, %v3314_v0 }
 0x486   : > { %v3118_v6 = vpop.permute.xlu0 %3117 }
 0x487   : > { %v3283_v40 = vsel %vm767_vm3, %v6561_v52, %v3118_v6 }
 0x48a   : > { %v3218_v2 = vpop.permute.xlu0 %3217 }
 0x48b   : > { %v3316_v38 = vsel %vm816_vm4, %v3284_v53, %v3218_v2 }
 0x48e   : > { %v3216_v19 = vpop.permute.xlu0 %3215 }
 0x48f   : > { %v3315_v31 = vsel %vm816_vm4, %v3283_v40, %v3216_v19 }
 0x490   : > { %4380 = vmatprep.mubr.msk.f32.mxu1 %vm867_vm5, %v3315_v31 }
 0x491   : > { %4381 = vmatmul.mubr.msk.f32.gmra.mrb[2].mxu1 %vm867_vm5, %v3316_v38 }
 0x492   : > { %v3122_v5 = vpop.permute.xlu0 %3121 }
 0x493   : > { %v3285_v54 = vsel %vm767_vm3, %v6569_v15, %v3122_v5 }
 0x496   : > { %v3220_v52 = vpop.permute.xlu0 %3219 }
 0x497   : > { %v3317_v55 = vsel %vm816_vm4, %v3285_v54, %v3220_v52 }
 0x498   : > { %4383 = vmatprep.mubr.msk.f32.mxu1 %vm867_vm5, %v3317_v55 }
 0x499   : > { %4384 = vmatmul.mubr.msk.f32.gmra.mrb[4].mxu1 %vm867_vm5, %v3318_v13 }
 0x4c0   : > { %v4340_v15 = vpop.f32.mrb[42].mxu1 }
 0x4c1   : > { %v3646_v63 = vadd.f32 %v4340_v15, %v6594_v26  ;;  %v3486_v23 = vpop.f32.mrb[43].mxu1 }
 0x4c2   : > { %v3645_v61 = vadd.f32 %v3486_v23, %v6596_v39 }
 0x4c3   : > { %3678 = vst.msk [vmem:[%s6830_s10 + $0x8] sm:$0xff] %vm767_vm3, %v3646_v63 }
 0x4c4   : > { %3677 = vst.msk [vmem:[%s6830_s10] sm:$0xff] %vm767_vm3, %v3645_v61 }
 0x4c8   : > { %v4343_v22 = vpop.f32.mrb[44].mxu1 }
 0x4c9   : > { %v3648_v28 = vadd.f32 %v4343_v22, %v6604_v56  ;;  %v3496_v46 = vpop.f32.mrb[45].mxu1 }
 0x4ca   : > { %v3647_v48 = vadd.f32 %v3496_v46, %v6606_v8 }
 0x4cb   : > { %3680 = vst.msk [vmem:[%s6830_s10 + $0x18] sm:$0xff] %vm767_vm3, %v3648_v28 }
 0x4cc   : > { %3679 = vst.msk [vmem:[%s6830_s10 + $0x10] sm:$0xff] %vm767_vm3, %v3647_v48 }
 0x4d4   : > { %v4346_v26 = vpop.f32.mrb[46].mxu1 }
 0x4d5   : > { %v3650_v39 = vadd.f32 %v4346_v26, %v6614_v37  ;;  %v3506_v62 = vpop.f32.mrb[47].mxu1 }
 0x4d6   : > { %v3649_v16 = vadd.f32 %v3506_v62, %v6616_v4 }
 0x4d7   : > { %3682 = vst.msk [vmem:[%s6830_s10 + $0x28] sm:$0xff] %vm767_vm3, %v3650_v39 }
 0x4d8   : > { %3681 = vst.msk [vmem:[%s6830_s10 + $0x20] sm:$0xff] %vm767_vm3, %v3649_v16 }
 0x4e0   : > { %v4349_v56 = vpop.f32.mrb[48].mxu1 }
 0x4e1   : > { %v3652_v8 = vadd.f32 %v4349_v56, %v6624_v45  ;;  %v3516_v10 = vpop.f32.mrb[49].mxu1 }
 0x4e2   : > { %v3651_v11 = vadd.f32 %v3516_v10, %v6626_v18 }
 0x4e3   : > { %3684 = vst.msk [vmem:[%s6830_s10 + $0x38] sm:$0xff] %vm767_vm3, %v3652_v8 }
 0x4e4   : > { %3683 = vst.msk [vmem:[%s6830_s10 + $0x30] sm:$0xff] %vm767_vm3, %v3651_v11 }
 0x4ec   : > { %v4352_v37 = vpop.f32.mrb[50].mxu1 }
 0x4ed   : > { %v3654_v4 = vadd.f32 %v4352_v37, %v6642_v21  ;;  %v3526_v14 = vpop.f32.mrb[51].mxu1 }
 0x4ee   : > { %v3653_v30 = vadd.f32 %v3526_v14, %v6644_v17 }
 0x4ef   : > { %3686 = vst.msk [vmem:[%s6830_s10 + $0x48] sm:$0xff] %vm767_vm3, %v3654_v4 }
 0x4f0   : > { %3685 = vst.msk [vmem:[%s6830_s10 + $0x40] sm:$0xff] %vm767_vm3, %v3653_v30 }
 0x4f8   : > { %v4355_v45 = vpop.f32.mrb[52].mxu1 }
 0x4f9   : > { %v3656_v18 = vadd.f32 %v4355_v45, %v6660_v3  ;;  %v3536_v36 = vpop.f32.mrb[53].mxu1 }
 0x4fa   : > { %v3655_v34 = vadd.f32 %v3536_v36, %v6662_v29 }
 0x4fb   : > { %3688 = vst.msk [vmem:[%s6830_s10 + $0x58] sm:$0xff] %vm767_vm3, %v3656_v18 }
 0x4fc   : > { %3687 = vst.msk [vmem:[%s6830_s10 + $0x50] sm:$0xff] %vm767_vm3, %v3655_v34 }
 0x504   : > { %v4358_v21 = vpop.f32.mrb[54].mxu1 }
 0x505   : > { %v3658_v17 = vadd.f32 %v4358_v21, %v6678_v49  ;;  %v3546_v12 = vpop.f32.mrb[55].mxu1 }
 0x506   : > { %v3657_v42 = vadd.f32 %v3546_v12, %v6680_v59 }
 0x507   : > { %3690 = vst.msk [vmem:[%s6830_s10 + $0x68] sm:$0xff] %vm767_vm3, %v3658_v17 }
 0x508   : > { %3689 = vst.msk [vmem:[%s6830_s10 + $0x60] sm:$0xff] %vm767_vm3, %v3657_v42 }
 0x510   : > { %v4361_v3 = vpop.f32.mrb[56].mxu1 }
 0x511   : > { %v3660_v29 = vadd.f32 %v4361_v3, %v6696_v33  ;;  %v3556_v24 = vpop.f32.mrb[57].mxu1 }
 0x512   : > { %v3659_v35 = vadd.f32 %v3556_v24, %v6698_v27 }
 0x513   : > { %3692 = vst.msk [vmem:[%s6830_s10 + $0x78] sm:$0xff] %vm767_vm3, %v3660_v29 }
 0x514   : > { %3691 = vst.msk [vmem:[%s6830_s10 + $0x70] sm:$0xff] %vm767_vm3, %v3659_v35 }
 0x51c   : > { %v4364_v49 = vpop.f32.mrb[58].mxu1 }
 0x51d   : > { %v3662_v59 = vadd.f32 %v4364_v49, %v6714_v58  ;;  %v3566_v9 = vpop.f32.mrb[59].mxu1 }
 0x51e   : > { %v3661_v0 = vadd.f32 %v3566_v9, %v6716_v43 }
 0x51f   : > { %3694 = vst.msk [vmem:[%s6830_s10 + $0x88] sm:$0xff] %vm767_vm3, %v3662_v59 }
 0x520   : > { %3693 = vst.msk [vmem:[%s6830_s10 + $0x80] sm:$0xff] %vm767_vm3, %v3661_v0 }
 0x528   : > { %v4367_v33 = vpop.f32.mrb[60].mxu1 }
 0x529   : > { %v3664_v27 = vadd.f32 %v4367_v33, %v6730_v41  ;;  %v3576_v6 = vpop.f32.mrb[61].mxu1 }
 0x52a   : > { %v3663_v20 = vadd.f32 %v3576_v6, %v6732_v60 }
 0x52b   : > { %3696 = vst.msk [vmem:[%s6830_s10 + $0x98] sm:$0xff] %vm767_vm3, %v3664_v27 }
 0x52c   : > { %3695 = vst.msk [vmem:[%s6830_s10 + $0x90] sm:$0xff] %vm767_vm3, %v3663_v20 }
 0x534   : > { %v4370_v58 = vpop.f32.mrb[62].mxu1 }
 0x535   : > { %v3666_v43 = vadd.f32 %v4370_v58, %v6742_v57  ;;  %v3586_v2 = vpop.f32.mrb[63].mxu1 }
 0x536   : > { %v3665_v40 = vadd.f32 %v3586_v2, %v6744_v32 }
 0x537   : > { %3698 = vst.msk [vmem:[%s6830_s10 + $0xa8] sm:$0xff] %vm767_vm3, %v3666_v43 }
 0x538   : > { %3697 = vst.msk [vmem:[%s6830_s10 + $0xa0] sm:$0xff] %vm767_vm3, %v3665_v40 }
 0x540   : > { %v4373_v41 = vpop.f32.mrb[64].mxu1 }
 0x541   : > { %v3668_v60 = vadd.f32 %v4373_v41, %v6754_v25  ;;  %v3596_v19 = vpop.f32.mrb[65].mxu1 }
 0x542   : > { %v3667_v53 = vadd.f32 %v3596_v19, %v6756_v44 }
 0x543   : > { %3700 = vst.msk [vmem:[%s6830_s10 + $0xb8] sm:$0xff] %vm767_vm3, %v3668_v60 }
 0x544   : > { %3699 = vst.msk [vmem:[%s6830_s10 + $0xb0] sm:$0xff] %vm767_vm3, %v3667_v53 }
 0x54c   : > { %v4376_v57 = vpop.f32.mrb[66].mxu1 }
 0x54d   : > { %v3670_v32 = vadd.f32 %v4376_v57, %v6766_v50  ;;  %v3606_v47 = vpop.f32.mrb[67].mxu1 }
 0x54e   : > { %v3669_v31 = vadd.f32 %v3606_v47, %v6768_v1 }
 0x54f   : > { %3702 = vst.msk [vmem:[%s6830_s10 + $0xc8] sm:$0xff] %vm767_vm3, %v3670_v32 }
 0x550   : > { %3701 = vst.msk [vmem:[%s6830_s10 + $0xc0] sm:$0xff] %vm767_vm3, %v3669_v31 }
 0x558   : > { %v4379_v25 = vpop.f32.mrb[0].mxu1 }
 0x559   : > { %3704 = vst.msk [vmem:[%s6830_s10 + $0xd8] sm:$0xff] %vm767_vm3, %v4379_v25  ;;  %v3616_v44 = vpop.f32.mrb[1].mxu1 }
 0x55a   : > { %3703 = vst.msk [vmem:[%s6830_s10 + $0xd0] sm:$0xff] %vm767_vm3, %v3616_v44 }
 0x564   : > { %v4382_v38 = vpop.f32.mrb[2].mxu1 }
 0x565   : > { %3706 = vst.msk [vmem:[%s6830_s10 + $0xe8] sm:$0xff] %vm767_vm3, %v4382_v38  ;;  %v3626_v5 = vpop.f32.mrb[3].mxu1 }
 0x566   : > { %3705 = vst.msk [vmem:[%s6830_s10 + $0xe0] sm:$0xff] %vm767_vm3, %v3626_v5 }
 0x56c   : > { %v4385_v50 = vpop.f32.mrb[4].mxu1 }
 0x56d   : > { %3708 = vst.msk [vmem:[%s6830_s10 + $0xf8] sm:$0xff] %vm767_vm3, %v4385_v50  ;;  %v3636_v1 = vpop.f32.mrb[5].mxu1 }
 0x56e   : > { %3707 = vst.msk [vmem:[%s6830_s10 + $0xf0] sm:$0xff] %vm767_vm3, %v3636_v1 }
 0x56f PF: > { %s16_s23 = sadd.s32 1, %s4541_s23   ;;  %s7150_s21 = smov %s4537_s22 }
 0x570   : > { %p13_p5 = scmp.ge.s32.totalorder %s16_s23, 4   ;;  %s7151_s22 = smov %s7153_s24 }
 0x572   :  { %15 = sbr.rel (!%p13_p5) target bundleno = 2 (0x2), region = 77 }

</bundles_post_ra>
